<compile_context>
chip_gen: v6e
topology: v6e:2x2x1
jax: 0.10.0
libtpu: 0.0.40
codegen_flags: <defaults>
</compile_context>

<pallas_src>
import jax
import jax.numpy as jnp
import numpy as np
from jax.experimental import pallas as pl
from jax.experimental.pallas import tpu as pltpu

# ----------------------- static model configuration -----------------------
B = 2          # batch
N = 16         # sequence length (time)
DIN = 3        # dim_in   (vector channels)
SIN = 2        # scalar_dim_in
H = 8          # hidden_dim
SH = 4         # scalar_hidden_dim
DEPTH = 2      # depth
DOUT = 2       # dim_out (two frame vectors)
KT = 16        # conv kernel along time, kernel=(16,1)
PAD_L, PAD_R = 7, 8   # PyTorch 'same' padding for an even kernel
EPS_LN = 1e-5

NH = N * H            # 128 vector lanes  (time-major: lane = t*H + c)
NS = N * SH           # 64  scalar lanes
NG = N * (H + SH)     # 192 gate lanes  ([gate_v | gate_s])
XW = N * DIN          # 48  activation-slab width
WW = NG               # 192 weight-slab width

# --------------------- host-side constant matrices -------------------------
_EYE_N = np.eye(N, dtype=np.float32)

# conv tap selector: SEL[k, t_in, t_out] = 1 iff clamp(t_out + k - PAD_L, 0, N-1) == t_in
_CONV_SEL = np.zeros((KT, N, N), np.float32)
for _t in range(N):
    for _k in range(KT):
        _CONV_SEL[_k, min(max(_t + _k - PAD_L, 0), N - 1), _t] += 1.0

_ONES_HH = np.kron(_EYE_N, np.ones((H, H), np.float32))
_ONES_HS = np.kron(_EYE_N, np.ones((H, SH), np.float32))
_ONES_SH = np.kron(_EYE_N, np.ones((SH, H), np.float32))
_ONES_SS = np.kron(_EYE_N, np.ones((SH, SH), np.float32))
_MEAN_G = (np.block([[_ONES_HH, _ONES_HS],
                     [_ONES_SH, _ONES_SS]]) / (H + SH)).astype(np.float32)   # (192, 192)
_MEAN_H = (_ONES_HH / H).astype(np.float32)                                  # (128, 128)
_MEAN_S = (_ONES_SS / SH).astype(np.float32)                                 # (64, 64)
_POOL_V = (np.kron(np.ones((N, 1), np.float32), np.eye(H, dtype=np.float32)) / N
           ).astype(np.float32)                                              # (128, 8)
_POOL_S = (np.kron(np.ones((N, 1), np.float32), np.eye(SH, dtype=np.float32)) / N
           ).astype(np.float32)                                              # (64, 4)


# --------------------- host-side weight expansion ---------------------------
def _bd_time(w):
    """(cin, cout) -> block-diagonal (N*cin, N*cout) over time (time-major lanes)."""
    cin, cout = w.shape
    return jnp.einsum('tu,io->tiuo', _EYE_N, w).reshape(N * cin, N * cout)


def _conv_toeplitz(w):
    """Conv taps (KT, cin, cout) -> block-Toeplitz (N*cin, N*cout); replicate pad folded in."""
    cin, cout = w.shape[1], w.shape[2]
    return jnp.einsum('ktu,kio->tiuo', _CONV_SEL, w).reshape(N * cin, N * cout)


def _nl_big(w):
    """NonLinearity linear (H+SH, H+SH) -> (NG, NG): [|v| lanes | s lanes] -> [gate_v | gate_s]."""
    top = jnp.concatenate([_bd_time(w[:H, :H]), _bd_time(w[:H, H:])], axis=1)   # (NH, NG)
    bot = jnp.concatenate([_bd_time(w[H:, :H]), _bd_time(w[H:, H:])], axis=1)   # (NS, NG)
    return jnp.concatenate([top, bot], axis=0)


def _pack_slab(entries, width, align=8):
    """Row-stack 2-D matrices (zero-padded to `width` lanes, rows aligned to 8)."""
    layout, pieces, row = {}, [], 0
    for name, m in entries:
        m = jnp.asarray(m, jnp.float32)
        nr, nc = m.shape
        layout[name] = (row, nr, nc)
        pr = (-nr) % align
        pieces.append(jnp.pad(m, ((0, pr), (0, width - nc))))
        row += nr + pr
    return jnp.concatenate(pieces, axis=0), layout


# ----------------------------- kernel helpers -------------------------------
def _mm(a, b):
    return jnp.dot(a, b, preferred_element_type=jnp.float32)


def _inv_clamped(n2, eps):
    # 1 / max(sqrt(n2), eps)  ==  rsqrt(max(n2, eps**2))  (EUP path, exact semantics)
    return jax.lax.rsqrt(jnp.maximum(n2, eps * eps))


def _ln_lane(x):
    # LayerNorm over the full last dim; gamma=1, beta=0.
    m = jnp.mean(x, axis=-1, keepdims=True)
    c = x - m
    v = jnp.mean(c * c, axis=-1, keepdims=True)
    return c * jax.lax.rsqrt(v + EPS_LN)


def _ln_grouped(x, mean_mat):
    # Per-time LayerNorm in lane-dense layout: x @ mean_mat broadcasts each per-time
    # group mean back to its own lanes (MXU does the segmented reduction).
    m = _mm(x, mean_mat)
    c = x - m
    v = _mm(c * c, mean_mat)
    return c * jax.lax.rsqrt(v + EPS_LN)


def _nonlinearity_time(V, S, w_big, mean_g):
    # V: (2B, NH) rows [comp0(b0,b1) ; comp1(b0,b1)],  S: (B, NS)
    v0, v1 = V[:B], V[B:]
    n2 = v0 * v0 + v1 * v1
    n = jnp.sqrt(n2)                                              # |v| per (b, t, c)
    g = jnp.maximum(_mm(jnp.concatenate([n, S], axis=-1), w_big), 0.0)
    g = _ln_grouped(g, mean_g)                                    # LN over the (H+SH) group
    scale = g[:, :NH] * _inv_clamped(n2, 1e-6)
    return jnp.concatenate([v0 * scale, v1 * scale], axis=0), g[:, NH:]


def _vnlayernorm_time(V, mean_h):
    v0, v1 = V[:B], V[B:]
    n2 = v0 * v0 + v1 * v1
    n = jnp.sqrt(n2)
    g = _ln_grouped(n, mean_h) * _inv_clamped(n2, 1e-6)
    return jnp.concatenate([v0 * g, v1 * g], axis=0)


def _nonlinearity_head(V, S, w):
    # post-pooling NonLinearity with scalar_dim_out = 0 (LN over the full H lanes)
    v0, v1 = V[:B], V[B:]
    n2 = v0 * v0 + v1 * v1
    n = jnp.sqrt(n2)
    x = _ln_lane(jnp.maximum(_mm(jnp.concatenate([n, S], axis=-1), w), 0.0))
    scale = x * _inv_clamped(n2, 1e-6)
    return jnp.concatenate([v0 * scale, v1 * scale], axis=0)


def _vnlayernorm_head(V):
    v0, v1 = V[:B], V[B:]
    n2 = v0 * v0 + v1 * v1
    n = jnp.sqrt(n2)
    g = _ln_lane(n) * _inv_clamped(n2, 1e-6)
    return jnp.concatenate([v0 * g, v1 * g], axis=0)


# ------------------------------- wrapper ------------------------------------
def eq_motion_forward(vector, scalar, original_scalars, params):
    # ---- weight expansion (block-diag / block-Toeplitz / group-mean), one slab ----
    entries = [
        ('bd_vn0', _bd_time(params['wvn0'])),            # (48, 128)
        ('bd_s0', _bd_time(params['ws0'])),              # (32, 64)
        ('nl_stem', _nl_big(params['wnl0'])),            # (192, 192)
        ('mean_g', _MEAN_G), ('mean_h', _MEAN_H), ('mean_s', _MEAN_S),
        ('pool_v', _POOL_V), ('pool_s', _POOL_S),
        ('wvn1', params['wvn1']), ('ws1', params['ws1']), ('wnl1', params['wnl1']),
        ('wvn2', params['wvn2']), ('wout', params['wout']),
    ]
    for l in range(DEPTH):
        entries += [
            (f'conv_v{l}', _conv_toeplitz(params['convv'][l])),   # (128, 128)
            (f'conv_s{l}', _conv_toeplitz(params['convs'][l])),   # (64, 64)
            (f'nl{l}', _nl_big(params['wnl'][l])),                # (192, 192)
        ]
    w_slab, w_lay = _pack_slab(entries, WW)

    # ---- activation packing: one slab -> 2 input DMAs total ----
    vin = jnp.transpose(vector, (2, 0, 1, 3)).reshape(2 * B, N * DIN)        # rows c*B + b
    sin = scalar.reshape(B, N * SIN)
    v0t = jnp.transpose(vector[:, :, 0, :], (2, 0, 1)).reshape(DIN * B, N)   # rows d*B + b
    v1t = jnp.transpose(vector[:, :, 1, :], (2, 0, 1)).reshape(DIN * B, N)
    origt = jnp.transpose(original_scalars, (2, 0, 1)).reshape(3 * B, N)
    x_slab, x_lay = _pack_slab(
        [('vin', vin), ('sin', sin), ('v0t', v0t), ('v1t', v1t), ('origt', origt)], XW)

    def kernel(w_ref, x_ref, frame_ref, llio_ref):
        def W(name):
            r, nr, nc = w_lay[name]
            return w_ref[r:r + nr, 0:nc]

        def Xa(name):
            r, nr, nc = x_lay[name]
            return x_ref[r:r + nr, 0:nc]

        mean_g, mean_h, mean_s = W('mean_g'), W('mean_h'), W('mean_s')

        # ---- stem: VNLinear0 / Linear0 / NonLinearity0 (lane-dense, single matmuls) ----
        V = _mm(Xa('vin'), W('bd_vn0'))            # (4, 128)
        S = _mm(Xa('sin'), W('bd_s0'))             # (2, 64)
        V, S = _nonlinearity_time(V, S, W('nl_stem'), mean_g)

        # ---- depth x (block-Toeplitz conv -> NonLinearity -> VNLayerNorm -> LayerNorm) ----
        for l in range(DEPTH):
            V = _mm(V, W(f'conv_v{l}'))            # conv = ONE (4,128)@(128,128) matmul
            S = _mm(S, W(f'conv_s{l}'))            # conv = ONE (2,64)@(64,64)  matmul
            V, S = _nonlinearity_time(V, S, W(f'nl{l}'), mean_g)
            V = _vnlayernorm_time(V, mean_h)
            S = _ln_grouped(S, mean_s)

        # ---- mean pooling over time (pooling_dim = 1): one matmul per tensor ----
        Vp = _mm(V, W('pool_v'))                   # (4, 8)
        Sp = _mm(S, W('pool_s'))                   # (2, 4)

        # ---- head ----
        Vh = _mm(Vp, W('wvn1'))
        Sh = _mm(Sp, W('ws1'))
        Vh = _nonlinearity_head(Vh, Sh, W('wnl1'))
        Vh = _mm(Vh, W('wvn2'))
        Vh = _vnlayernorm_head(Vh)
        Vo = _mm(Vh, W('wout'))                    # (4, 2): rows [c0b0, c0b1, c1b0, c1b1]

        # ---- Gram-Schmidt frame, both batches at once ----
        vax, vay = Vo[0:B, 0:1], Vo[B:, 0:1]
        vbx, vby = Vo[0:B, 1:2], Vo[B:, 1:2]
        inv_na = _inv_clamped(vax * vax + vay * vay, 1e-8)
        u1x, u1y = vax * inv_na, vay * inv_na
        d = vbx * u1x + vby * u1y
        cx, cy = vbx - d * u1x, vby - d * u1y
        inv_nc = _inv_clamped(cx * cx + cy * cy, 1e-8)
        u2x, u2y = cx * inv_nc, cy * inv_nc
        frame_ref[...] = jnp.concatenate([u1x, u1y, u2x, u2y], axis=1)       # (B, 4)

        # ---- epilogue: rotate ORIGINAL vectors into the frame (batch-vectorized,
        #      time on lanes) and write the 6-channel llio input as (B, 6, N) ----
        v0t_, v1t_, ot = Xa('v0t'), Xa('v1t'), Xa('origt')     # (3B, N), rows d*B + b
        U1X = jnp.concatenate([u1x] * DIN, axis=0)             # (3B, 1)
        U1Y = jnp.concatenate([u1y] * DIN, axis=0)
        U2X = jnp.concatenate([u2x] * DIN, axis=0)
        U2Y = jnp.concatenate([u2y] * DIN, axis=0)
        r0 = v0t_ * U1X + v1t_ * U1Y                           # rotated component 0
        r1 = v0t_ * U2X + v1t_ * U2Y                           # rotated component 1
        a0, a1, a2 = r0[0:B], r1[0:B], ot[0:B]                 # a   (d = 0)
        p0, p1, p2 = r0[B:2 * B], r1[B:2 * B], ot[B:2 * B]     # w1  (d = 1)
        q0, q1, q2 = r0[2 * B:], r1[2 * B:], ot[2 * B:]        # w2  (d = 2)
        inv_nw = _inv_clamped(p0 * p0 + p1 * p1 + p2 * p2, 1e-8)
        llio_ref[...] = jnp.stack(
            [a0, a1, a2,
             (p1 * q2 - p2 * q1) * inv_nw,
             (p2 * q0 - p0 * q2) * inv_nw,
             (p0 * q1 - p1 * q0) * inv_nw], axis=1)            # (B, 6, N)
        # TODO(synk): self.llio (TwoLayerModel ResMLP/MeanMLP head) is not defined in the
        # provided source; the kernel returns the frame and the 6-channel llio input
        # instead of (disp, cov).

    vmem = pl.BlockSpec(memory_space=pltpu.MemorySpace.VMEM)
    nbytes = int(4 * (w_slab.size + x_slab.size + B * 4 + B * 6 * N))
    frame_flat, llio = pl.pallas_call(
        kernel,
        in_specs=[vmem, vmem],
        out_specs=(vmem, vmem),
        out_shape=(jax.ShapeDtypeStruct((B, 4), jnp.float32),
                   jax.ShapeDtypeStruct((B, 6, N), jnp.float32)),
        cost_estimate=pl.CostEstimate(flops=2_500_000, transcendentals=10_000,
                                      bytes_accessed=nbytes),
    )(w_slab, x_slab)
    # frame rows are [u1 ; u2] per batch == torch.stack([v1, v2], -1).permute(0, 2, 1)
    return frame_flat.reshape(B, 2, 2), llio


# ------------------------- deterministic parameters -------------------------
def init_params(key):
    ks = jax.random.split(key, 11)

    def lin(k, fan_in, shape):
        return (jax.random.normal(k, shape, jnp.float32) / np.sqrt(fan_in)
                ).astype(jnp.float32)

    p = {}
    p['wvn0'] = lin(ks[0], DIN, (DIN, H))                 # VNLinear0 (stored input-major)
    p['ws0'] = lin(ks[1], SIN, (SIN, SH))                 # slinear_layer0
    p['wnl0'] = lin(ks[2], H + SH, (H + SH, H + SH))      # nonlinearity0
    p['convv'] = lin(ks[3], H * KT, (DEPTH, KT, H, H))    # conv weights (layer, tap, Cin, Cout)
    p['convs'] = lin(ks[4], SH * KT, (DEPTH, KT, SH, SH))
    p['wnl'] = lin(ks[5], H + SH, (DEPTH, H + SH, H + SH))
    p['wvn1'] = lin(ks[6], H, (H, H))
    p['ws1'] = lin(ks[7], SH, (SH, SH))
    p['wnl1'] = lin(ks[8], H + SH, (H + SH, H))           # nonlinearity1 (scalar_dim_out = 0)
    p['wvn2'] = lin(ks[9], H, (H, H))
    p['wout'] = lin(ks[10], H, (H, DOUT))                 # vnoutput_layer
    return p


# -------------------------- pure-JAX reference ------------------------------
def reference_forward(vector, scalar, orig, p):
    hp = jax.lax.Precision.HIGHEST

    def mm(a, w):
        return jnp.einsum('...i,io->...o', a, w, precision=hp)

    def ln(x):
        m = x.mean(-1, keepdims=True)
        v = ((x - m) ** 2).mean(-1, keepdims=True)
        return (x - m) / jnp.sqrt(v + EPS_LN)

    def nonlin(v, s, w, sh_out):
        n = jnp.linalg.norm(v, axis=-2)
        x = ln(jax.nn.relu(mm(jnp.concatenate([n, s], axis=-1), w)))
        u = v / jnp.maximum(n, 1e-6)[..., None, :]
        vout = x[..., :H][..., None, :] * u
        if sh_out == 0:
            return vout
        return vout, x[..., -sh_out:]

    def vnln(v):
        n = jnp.linalg.norm(v, axis=-2)
        return v / jnp.maximum(n, 1e-6)[..., None, :] * ln(n)[..., None, :]

    def conv_v(x, w):
        xp = jnp.pad(x, ((0, 0), (PAD_L, PAD_R), (0, 0), (0, 0)), mode='edge')
        return sum(jnp.einsum('bnmc,co->bnmo', xp[:, k:k + N], w[k], precision=hp)
                   for k in range(KT))

    def conv_s(x, w):
        xp = jnp.pad(x, ((0, 0), (PAD_L, PAD_R), (0, 0)), mode='edge')
        return sum(jnp.einsum('bnc,co->bno', xp[:, k:k + N], w[k], precision=hp)
                   for k in range(KT))

    v = mm(vector, p['wvn0'])
    s = mm(scalar, p['ws0'])
    v, s = nonlin(v, s, p['wnl0'], SH)
    for l in range(DEPTH):
        v = conv_v(v, p['convv'][l]); s = conv_s(s, p['convs'][l])
        v, s = nonlin(v, s, p['wnl'][l], SH)
        v = vnln(v); s = ln(s)
    v = v.mean(axis=1); s = s.mean(axis=1)
    v = mm(v, p['wvn1']); s = mm(s, p['ws1'])
    v = nonlin(v, s, p['wnl1'], 0)
    v = mm(v, p['wvn2'])
    v = vnln(v)
    v = mm(v, p['wout'])                                  # (B, 2, DOUT)
    v1 = v[..., 0]
    v1 = v1 / jnp.maximum(jnp.linalg.norm(v1, axis=-1, keepdims=True), 1e-8)
    v2 = v[..., 1] - jnp.sum(v[..., 1] * v1, axis=-1, keepdims=True) * v1
    v2 = v2 / jnp.maximum(jnp.linalg.norm(v2, axis=-1, keepdims=True), 1e-8)
    frame = jnp.transpose(jnp.stack([v1, v2], axis=-1), (0, 2, 1))
    vr = jnp.einsum('bij,bnjc->bnic', frame, vector, precision=hp)
    a = jnp.concatenate([vr[..., 0], orig[..., 0:1]], axis=-1)
    w1 = jnp.concatenate([vr[..., 1], orig[..., 1:2]], axis=-1)
    w2 = jnp.concatenate([vr[..., 2], orig[..., 2:3]], axis=-1)
    w = jnp.cross(w1, w2) / jnp.maximum(
        jnp.linalg.norm(w1, axis=-1, keepdims=True), 1e-8)
    llio_in = jnp.transpose(jnp.concatenate([a, w], axis=-1), (0, 2, 1))
    return frame, llio_in


# ---------------------------------- main -------------------------------------
if __name__ == "__main__":
    key = jax.random.PRNGKey(0)
    kp, kv, ks, ko = jax.random.split(key, 4)
    params = init_params(kp)
    vector = jax.random.normal(kv, (B, N, 2, DIN), jnp.float32)
    scalar = jax.random.normal(ks, (B, N, SIN), jnp.float32)
    original_scalars = jax.random.normal(ko, (B, N, 3), jnp.float32)

    frame, llio_in = jax.block_until_ready(
        eq_motion_forward(vector, scalar, original_scalars, params))

    ref_frame, ref_llio = reference_forward(vector, scalar, original_scalars, params)
    np.testing.assert_allclose(np.asarray(frame), np.asarray(ref_frame),
                               rtol=5e-3, atol=5e-3)
    np.testing.assert_allclose(np.asarray(llio_in), np.asarray(ref_llio),
                               rtol=5e-3, atol=5e-3)
    print("KERNEL_OK")
</pallas_src>

<mosaic_0001>
module attributes {stable_mosaic.version = 11 : i64} {
  func.func @kernel(%arg0: memref<1664x192xf32, #tpu.memory_space<vmem>>, %arg1: memref<40x48xf32, #tpu.memory_space<vmem>>, %arg2: memref<2x4xf32, #tpu.memory_space<vmem>>, %arg3: memref<2x6x16xf32, #tpu.memory_space<vmem>>) attributes {dimension_semantics = [], scalar_prefetch = 0 : i64, scratch_operands = 0 : i64, tpu.core_type = #tpu.core_type<tc>} {
    %c272 = arith.constant 272 : index
    %c0 = arith.constant 0 : index
    %0 = vector.load %arg0[%c272, %c0] : memref<1664x192xf32, #tpu.memory_space<vmem>>, vector<192x192xf32>
    %c464 = arith.constant 464 : index
    %c0_0 = arith.constant 0 : index
    %1 = vector.load %arg0[%c464, %c0_0] : memref<1664x192xf32, #tpu.memory_space<vmem>>, vector<128x128xf32>
    %c592 = arith.constant 592 : index
    %c0_1 = arith.constant 0 : index
    %2 = vector.load %arg0[%c592, %c0_1] : memref<1664x192xf32, #tpu.memory_space<vmem>>, vector<64x64xf32>
    %c0_2 = arith.constant 0 : index
    %c0_3 = arith.constant 0 : index
    %3 = vector.load %arg1[%c0_2, %c0_3] : memref<40x48xf32, #tpu.memory_space<vmem>>, vector<4x48xf32>
    %c0_4 = arith.constant 0 : index
    %c0_5 = arith.constant 0 : index
    %4 = vector.load %arg0[%c0_4, %c0_5] : memref<1664x192xf32, #tpu.memory_space<vmem>>, vector<48x128xf32>
    %cst = arith.constant dense<0.000000e+00> : vector<4x128xf32>
    %5 = tpu.matmul %3, %4, %cst {dimension_numbers = #tpu.dot_dimension_numbers<[1], [0], [0], [1], [0, 0, 1, 1], [], []>} : vector<4x48xf32>, vector<48x128xf32>, vector<4x128xf32> -> vector<4x128xf32>
    %c8 = arith.constant 8 : index
    %c0_6 = arith.constant 0 : index
    %6 = vector.load %arg1[%c8, %c0_6] : memref<40x48xf32, #tpu.memory_space<vmem>>, vector<2x32xf32>
    %c48 = arith.constant 48 : index
    %c0_7 = arith.constant 0 : index
    %7 = vector.load %arg0[%c48, %c0_7] : memref<1664x192xf32, #tpu.memory_space<vmem>>, vector<32x64xf32>
    %cst_8 = arith.constant dense<0.000000e+00> : vector<2x64xf32>
    %8 = tpu.matmul %6, %7, %cst_8 {dimension_numbers = #tpu.dot_dimension_numbers<[1], [0], [0], [1], [0, 0, 1, 1], [], []>} : vector<2x32xf32>, vector<32x64xf32>, vector<2x64xf32> -> vector<2x64xf32>
    %c80 = arith.constant 80 : index
    %c0_9 = arith.constant 0 : index
    %9 = vector.load %arg0[%c80, %c0_9] : memref<1664x192xf32, #tpu.memory_space<vmem>>, vector<192x192xf32>
    %10 = vector.extract_strided_slice %5 {offsets = [0, 0], sizes = [2, 128], strides = [1, 1]} : vector<4x128xf32> to vector<2x128xf32>
    %11 = vector.extract_strided_slice %5 {offsets = [2, 0], sizes = [2, 128], strides = [1, 1]} : vector<4x128xf32> to vector<2x128xf32>
    %12 = arith.mulf %10, %10 : vector<2x128xf32>
    %13 = arith.mulf %11, %11 : vector<2x128xf32>
    %14 = arith.addf %12, %13 : vector<2x128xf32>
    %15 = math.sqrt %14 : vector<2x128xf32>
    %16 = tpu.concatenate %15, %8 in 1 : vector<2x128xf32>, vector<2x64xf32> -> vector<2x192xf32>
    %cst_10 = arith.constant dense<0.000000e+00> : vector<2x192xf32>
    %17 = tpu.matmul %16, %9, %cst_10 {dimension_numbers = #tpu.dot_dimension_numbers<[1], [0], [0], [1], [0, 0, 1, 1], [], []>} : vector<2x192xf32>, vector<192x192xf32>, vector<2x192xf32> -> vector<2x192xf32>
    %cst_11 = arith.constant 0.000000e+00 : f32
    %18 = vector.broadcast %cst_11 : f32 to vector<2x192xf32>
    %19 = arith.maximumf %17, %18 : vector<2x192xf32>
    %cst_12 = arith.constant dense<0.000000e+00> : vector<2x192xf32>
    %20 = tpu.matmul %19, %0, %cst_12 {dimension_numbers = #tpu.dot_dimension_numbers<[1], [0], [0], [1], [0, 0, 1, 1], [], []>} : vector<2x192xf32>, vector<192x192xf32>, vector<2x192xf32> -> vector<2x192xf32>
    %21 = arith.subf %19, %20 : vector<2x192xf32>
    %22 = arith.mulf %21, %21 : vector<2x192xf32>
    %cst_13 = arith.constant dense<0.000000e+00> : vector<2x192xf32>
    %23 = tpu.matmul %22, %0, %cst_13 {dimension_numbers = #tpu.dot_dimension_numbers<[1], [0], [0], [1], [0, 0, 1, 1], [], []>} : vector<2x192xf32>, vector<192x192xf32>, vector<2x192xf32> -> vector<2x192xf32>
    %cst_14 = arith.constant 9.99999974E-6 : f32
    %24 = vector.broadcast %cst_14 : f32 to vector<2x192xf32>
    %25 = arith.addf %23, %24 : vector<2x192xf32>
    %26 = math.rsqrt %25 : vector<2x192xf32>
    %27 = arith.mulf %21, %26 : vector<2x192xf32>
    %28 = vector.extract_strided_slice %27 {offsets = [0, 0], sizes = [2, 128], strides = [1, 1]} : vector<2x192xf32> to vector<2x128xf32>
    %cst_15 = arith.constant 9.99999996E-13 : f32
    %29 = vector.broadcast %cst_15 : f32 to vector<2x128xf32>
    %30 = arith.maximumf %14, %29 : vector<2x128xf32>
    %31 = math.rsqrt %30 : vector<2x128xf32>
    %32 = arith.mulf %28, %31 : vector<2x128xf32>
    %33 = arith.mulf %10, %32 : vector<2x128xf32>
    %34 = arith.mulf %11, %32 : vector<2x128xf32>
    %35 = tpu.concatenate %33, %34 in 0 : vector<2x128xf32>, vector<2x128xf32> -> vector<4x128xf32>
    %36 = vector.extract_strided_slice %27 {offsets = [0, 128], sizes = [2, 64], strides = [1, 1]} : vector<2x192xf32> to vector<2x64xf32>
    %c896 = arith.constant 896 : index
    %c0_16 = arith.constant 0 : index
    %37 = vector.load %arg0[%c896, %c0_16] : memref<1664x192xf32, #tpu.memory_space<vmem>>, vector<128x128xf32>
    %cst_17 = arith.constant dense<0.000000e+00> : vector<4x128xf32>
    %38 = tpu.matmul %35, %37, %cst_17 {dimension_numbers = #tpu.dot_dimension_numbers<[1], [0], [0], [1], [0, 0, 1, 1], [], []>} : vector<4x128xf32>, vector<128x128xf32>, vector<4x128xf32> -> vector<4x128xf32>
    %c1024 = arith.constant 1024 : index
    %c0_18 = arith.constant 0 : index
    %39 = vector.load %arg0[%c1024, %c0_18] : memref<1664x192xf32, #tpu.memory_space<vmem>>, vector<64x64xf32>
    %cst_19 = arith.constant dense<0.000000e+00> : vector<2x64xf32>
    %40 = tpu.matmul %36, %39, %cst_19 {dimension_numbers = #tpu.dot_dimension_numbers<[1], [0], [0], [1], [0, 0, 1, 1], [], []>} : vector<2x64xf32>, vector<64x64xf32>, vector<2x64xf32> -> vector<2x64xf32>
    %c1088 = arith.constant 1088 : index
    %c0_20 = arith.constant 0 : index
    %41 = vector.load %arg0[%c1088, %c0_20] : memref<1664x192xf32, #tpu.memory_space<vmem>>, vector<192x192xf32>
    %42 = vector.extract_strided_slice %38 {offsets = [0, 0], sizes = [2, 128], strides = [1, 1]} : vector<4x128xf32> to vector<2x128xf32>
    %43 = vector.extract_strided_slice %38 {offsets = [2, 0], sizes = [2, 128], strides = [1, 1]} : vector<4x128xf32> to vector<2x128xf32>
    %44 = arith.mulf %42, %42 : vector<2x128xf32>
    %45 = arith.mulf %43, %43 : vector<2x128xf32>
    %46 = arith.addf %44, %45 : vector<2x128xf32>
    %47 = math.sqrt %46 : vector<2x128xf32>
    %48 = tpu.concatenate %47, %40 in 1 : vector<2x128xf32>, vector<2x64xf32> -> vector<2x192xf32>
    %cst_21 = arith.constant dense<0.000000e+00> : vector<2x192xf32>
    %49 = tpu.matmul %48, %41, %cst_21 {dimension_numbers = #tpu.dot_dimension_numbers<[1], [0], [0], [1], [0, 0, 1, 1], [], []>} : vector<2x192xf32>, vector<192x192xf32>, vector<2x192xf32> -> vector<2x192xf32>
    %cst_22 = arith.constant 0.000000e+00 : f32
    %50 = vector.broadcast %cst_22 : f32 to vector<2x192xf32>
    %51 = arith.maximumf %49, %50 : vector<2x192xf32>
    %cst_23 = arith.constant dense<0.000000e+00> : vector<2x192xf32>
    %52 = tpu.matmul %51, %0, %cst_23 {dimension_numbers = #tpu.dot_dimension_numbers<[1], [0], [0], [1], [0, 0, 1, 1], [], []>} : vector<2x192xf32>, vector<192x192xf32>, vector<2x192xf32> -> vector<2x192xf32>
    %53 = arith.subf %51, %52 : vector<2x192xf32>
    %54 = arith.mulf %53, %53 : vector<2x192xf32>
    %cst_24 = arith.constant dense<0.000000e+00> : vector<2x192xf32>
    %55 = tpu.matmul %54, %0, %cst_24 {dimension_numbers = #tpu.dot_dimension_numbers<[1], [0], [0], [1], [0, 0, 1, 1], [], []>} : vector<2x192xf32>, vector<192x192xf32>, vector<2x192xf32> -> vector<2x192xf32>
    %cst_25 = arith.constant 9.99999974E-6 : f32
    %56 = vector.broadcast %cst_25 : f32 to vector<2x192xf32>
    %57 = arith.addf %55, %56 : vector<2x192xf32>
    %58 = math.rsqrt %57 : vector<2x192xf32>
    %59 = arith.mulf %53, %58 : vector<2x192xf32>
    %60 = vector.extract_strided_slice %59 {offsets = [0, 0], sizes = [2, 128], strides = [1, 1]} : vector<2x192xf32> to vector<2x128xf32>
    %cst_26 = arith.constant 9.99999996E-13 : f32
    %61 = vector.broadcast %cst_26 : f32 to vector<2x128xf32>
    %62 = arith.maximumf %46, %61 : vector<2x128xf32>
    %63 = math.rsqrt %62 : vector<2x128xf32>
    %64 = arith.mulf %60, %63 : vector<2x128xf32>
    %65 = arith.mulf %42, %64 : vector<2x128xf32>
    %66 = arith.mulf %43, %64 : vector<2x128xf32>
    %67 = tpu.concatenate %65, %66 in 0 : vector<2x128xf32>, vector<2x128xf32> -> vector<4x128xf32>
    %68 = vector.extract_strided_slice %59 {offsets = [0, 128], sizes = [2, 64], strides = [1, 1]} : vector<2x192xf32> to vector<2x64xf32>
    %69 = vector.extract_strided_slice %67 {offsets = [0, 0], sizes = [2, 128], strides = [1, 1]} : vector<4x128xf32> to vector<2x128xf32>
    %70 = vector.extract_strided_slice %67 {offsets = [2, 0], sizes = [2, 128], strides = [1, 1]} : vector<4x128xf32> to vector<2x128xf32>
    %71 = arith.mulf %69, %69 : vector<2x128xf32>
    %72 = arith.mulf %70, %70 : vector<2x128xf32>
    %73 = arith.addf %71, %72 : vector<2x128xf32>
    %74 = math.sqrt %73 : vector<2x128xf32>
    %cst_27 = arith.constant dense<0.000000e+00> : vector<2x128xf32>
    %75 = tpu.matmul %74, %1, %cst_27 {dimension_numbers = #tpu.dot_dimension_numbers<[1], [0], [0], [1], [0, 0, 1, 1], [], []>} : vector<2x128xf32>, vector<128x128xf32>, vector<2x128xf32> -> vector<2x128xf32>
    %76 = arith.subf %74, %75 : vector<2x128xf32>
    %77 = arith.mulf %76, %76 : vector<2x128xf32>
    %cst_28 = arith.constant dense<0.000000e+00> : vector<2x128xf32>
    %78 = tpu.matmul %77, %1, %cst_28 {dimension_numbers = #tpu.dot_dimension_numbers<[1], [0], [0], [1], [0, 0, 1, 1], [], []>} : vector<2x128xf32>, vector<128x128xf32>, vector<2x128xf32> -> vector<2x128xf32>
    %cst_29 = arith.constant 9.99999974E-6 : f32
    %79 = vector.broadcast %cst_29 : f32 to vector<2x128xf32>
    %80 = arith.addf %78, %79 : vector<2x128xf32>
    %81 = math.rsqrt %80 : vector<2x128xf32>
    %82 = arith.mulf %76, %81 : vector<2x128xf32>
    %cst_30 = arith.constant 9.99999996E-13 : f32
    %83 = vector.broadcast %cst_30 : f32 to vector<2x128xf32>
    %84 = arith.maximumf %73, %83 : vector<2x128xf32>
    %85 = math.rsqrt %84 : vector<2x128xf32>
    %86 = arith.mulf %82, %85 : vector<2x128xf32>
    %87 = arith.mulf %69, %86 : vector<2x128xf32>
    %88 = arith.mulf %70, %86 : vector<2x128xf32>
    %89 = tpu.concatenate %87, %88 in 0 : vector<2x128xf32>, vector<2x128xf32> -> vector<4x128xf32>
    %cst_31 = arith.constant dense<0.000000e+00> : vector<2x64xf32>
    %90 = tpu.matmul %68, %2, %cst_31 {dimension_numbers = #tpu.dot_dimension_numbers<[1], [0], [0], [1], [0, 0, 1, 1], [], []>} : vector<2x64xf32>, vector<64x64xf32>, vector<2x64xf32> -> vector<2x64xf32>
    %91 = arith.subf %68, %90 : vector<2x64xf32>
    %92 = arith.mulf %91, %91 : vector<2x64xf32>
    %cst_32 = arith.constant dense<0.000000e+00> : vector<2x64xf32>
    %93 = tpu.matmul %92, %2, %cst_32 {dimension_numbers = #tpu.dot_dimension_numbers<[1], [0], [0], [1], [0, 0, 1, 1], [], []>} : vector<2x64xf32>, vector<64x64xf32>, vector<2x64xf32> -> vector<2x64xf32>
    %cst_33 = arith.constant 9.99999974E-6 : f32
    %94 = vector.broadcast %cst_33 : f32 to vector<2x64xf32>
    %95 = arith.addf %93, %94 : vector<2x64xf32>
    %96 = math.rsqrt %95 : vector<2x64xf32>
    %97 = arith.mulf %91, %96 : vector<2x64xf32>
    %c1280 = arith.constant 1280 : index
    %c0_34 = arith.constant 0 : index
    %98 = vector.load %arg0[%c1280, %c0_34] : memref<1664x192xf32, #tpu.memory_space<vmem>>, vector<128x128xf32>
    %cst_35 = arith.constant dense<0.000000e+00> : vector<4x128xf32>
    %99 = tpu.matmul %89, %98, %cst_35 {dimension_numbers = #tpu.dot_dimension_numbers<[1], [0], [0], [1], [0, 0, 1, 1], [], []>} : vector<4x128xf32>, vector<128x128xf32>, vector<4x128xf32> -> vector<4x128xf32>
    %c1408 = arith.constant 1408 : index
    %c0_36 = arith.constant 0 : index
    %100 = vector.load %arg0[%c1408, %c0_36] : memref<1664x192xf32, #tpu.memory_space<vmem>>, vector<64x64xf32>
    %cst_37 = arith.constant dense<0.000000e+00> : vector<2x64xf32>
    %101 = tpu.matmul %97, %100, %cst_37 {dimension_numbers = #tpu.dot_dimension_numbers<[1], [0], [0], [1], [0, 0, 1, 1], [], []>} : vector<2x64xf32>, vector<64x64xf32>, vector<2x64xf32> -> vector<2x64xf32>
    %c1472 = arith.constant 1472 : index
    %c0_38 = arith.constant 0 : index
    %102 = vector.load %arg0[%c1472, %c0_38] : memref<1664x192xf32, #tpu.memory_space<vmem>>, vector<192x192xf32>
    %103 = vector.extract_strided_slice %99 {offsets = [0, 0], sizes = [2, 128], strides = [1, 1]} : vector<4x128xf32> to vector<2x128xf32>
    %104 = vector.extract_strided_slice %99 {offsets = [2, 0], sizes = [2, 128], strides = [1, 1]} : vector<4x128xf32> to vector<2x128xf32>
    %105 = arith.mulf %103, %103 : vector<2x128xf32>
    %106 = arith.mulf %104, %104 : vector<2x128xf32>
    %107 = arith.addf %105, %106 : vector<2x128xf32>
    %108 = math.sqrt %107 : vector<2x128xf32>
    %109 = tpu.concatenate %108, %101 in 1 : vector<2x128xf32>, vector<2x64xf32> -> vector<2x192xf32>
    %cst_39 = arith.constant dense<0.000000e+00> : vector<2x192xf32>
    %110 = tpu.matmul %109, %102, %cst_39 {dimension_numbers = #tpu.dot_dimension_numbers<[1], [0], [0], [1], [0, 0, 1, 1], [], []>} : vector<2x192xf32>, vector<192x192xf32>, vector<2x192xf32> -> vector<2x192xf32>
    %cst_40 = arith.constant 0.000000e+00 : f32
    %111 = vector.broadcast %cst_40 : f32 to vector<2x192xf32>
    %112 = arith.maximumf %110, %111 : vector<2x192xf32>
    %cst_41 = arith.constant dense<0.000000e+00> : vector<2x192xf32>
    %113 = tpu.matmul %112, %0, %cst_41 {dimension_numbers = #tpu.dot_dimension_numbers<[1], [0], [0], [1], [0, 0, 1, 1], [], []>} : vector<2x192xf32>, vector<192x192xf32>, vector<2x192xf32> -> vector<2x192xf32>
    %114 = arith.subf %112, %113 : vector<2x192xf32>
    %115 = arith.mulf %114, %114 : vector<2x192xf32>
    %cst_42 = arith.constant dense<0.000000e+00> : vector<2x192xf32>
    %116 = tpu.matmul %115, %0, %cst_42 {dimension_numbers = #tpu.dot_dimension_numbers<[1], [0], [0], [1], [0, 0, 1, 1], [], []>} : vector<2x192xf32>, vector<192x192xf32>, vector<2x192xf32> -> vector<2x192xf32>
    %cst_43 = arith.constant 9.99999974E-6 : f32
    %117 = vector.broadcast %cst_43 : f32 to vector<2x192xf32>
    %118 = arith.addf %116, %117 : vector<2x192xf32>
    %119 = math.rsqrt %118 : vector<2x192xf32>
    %120 = arith.mulf %114, %119 : vector<2x192xf32>
    %121 = vector.extract_strided_slice %120 {offsets = [0, 0], sizes = [2, 128], strides = [1, 1]} : vector<2x192xf32> to vector<2x128xf32>
    %cst_44 = arith.constant 9.99999996E-13 : f32
    %122 = vector.broadcast %cst_44 : f32 to vector<2x128xf32>
    %123 = arith.maximumf %107, %122 : vector<2x128xf32>
    %124 = math.rsqrt %123 : vector<2x128xf32>
    %125 = arith.mulf %121, %124 : vector<2x128xf32>
    %126 = arith.mulf %103, %125 : vector<2x128xf32>
    %127 = arith.mulf %104, %125 : vector<2x128xf32>
    %128 = tpu.concatenate %126, %127 in 0 : vector<2x128xf32>, vector<2x128xf32> -> vector<4x128xf32>
    %129 = vector.extract_strided_slice %120 {offsets = [0, 128], sizes = [2, 64], strides = [1, 1]} : vector<2x192xf32> to vector<2x64xf32>
    %130 = vector.extract_strided_slice %128 {offsets = [0, 0], sizes = [2, 128], strides = [1, 1]} : vector<4x128xf32> to vector<2x128xf32>
    %131 = vector.extract_strided_slice %128 {offsets = [2, 0], sizes = [2, 128], strides = [1, 1]} : vector<4x128xf32> to vector<2x128xf32>
    %132 = arith.mulf %130, %130 : vector<2x128xf32>
    %133 = arith.mulf %131, %131 : vector<2x128xf32>
    %134 = arith.addf %132, %133 : vector<2x128xf32>
    %135 = math.sqrt %134 : vector<2x128xf32>
    %cst_45 = arith.constant dense<0.000000e+00> : vector<2x128xf32>
    %136 = tpu.matmul %135, %1, %cst_45 {dimension_numbers = #tpu.dot_dimension_numbers<[1], [0], [0], [1], [0, 0, 1, 1], [], []>} : vector<2x128xf32>, vector<128x128xf32>, vector<2x128xf32> -> vector<2x128xf32>
    %137 = arith.subf %135, %136 : vector<2x128xf32>
    %138 = arith.mulf %137, %137 : vector<2x128xf32>
    %cst_46 = arith.constant dense<0.000000e+00> : vector<2x128xf32>
    %139 = tpu.matmul %138, %1, %cst_46 {dimension_numbers = #tpu.dot_dimension_numbers<[1], [0], [0], [1], [0, 0, 1, 1], [], []>} : vector<2x128xf32>, vector<128x128xf32>, vector<2x128xf32> -> vector<2x128xf32>
    %cst_47 = arith.constant 9.99999974E-6 : f32
    %140 = vector.broadcast %cst_47 : f32 to vector<2x128xf32>
    %141 = arith.addf %139, %140 : vector<2x128xf32>
    %142 = math.rsqrt %141 : vector<2x128xf32>
    %143 = arith.mulf %137, %142 : vector<2x128xf32>
    %cst_48 = arith.constant 9.99999996E-13 : f32
    %144 = vector.broadcast %cst_48 : f32 to vector<2x128xf32>
    %145 = arith.maximumf %134, %144 : vector<2x128xf32>
    %146 = math.rsqrt %145 : vector<2x128xf32>
    %147 = arith.mulf %143, %146 : vector<2x128xf32>
    %148 = arith.mulf %130, %147 : vector<2x128xf32>
    %149 = arith.mulf %131, %147 : vector<2x128xf32>
    %150 = tpu.concatenate %148, %149 in 0 : vector<2x128xf32>, vector<2x128xf32> -> vector<4x128xf32>
    %cst_49 = arith.constant dense<0.000000e+00> : vector<2x64xf32>
    %151 = tpu.matmul %129, %2, %cst_49 {dimension_numbers = #tpu.dot_dimension_numbers<[1], [0], [0], [1], [0, 0, 1, 1], [], []>} : vector<2x64xf32>, vector<64x64xf32>, vector<2x64xf32> -> vector<2x64xf32>
    %152 = arith.subf %129, %151 : vector<2x64xf32>
    %153 = arith.mulf %152, %152 : vector<2x64xf32>
    %cst_50 = arith.constant dense<0.000000e+00> : vector<2x64xf32>
    %154 = tpu.matmul %153, %2, %cst_50 {dimension_numbers = #tpu.dot_dimension_numbers<[1], [0], [0], [1], [0, 0, 1, 1], [], []>} : vector<2x64xf32>, vector<64x64xf32>, vector<2x64xf32> -> vector<2x64xf32>
    %cst_51 = arith.constant 9.99999974E-6 : f32
    %155 = vector.broadcast %cst_51 : f32 to vector<2x64xf32>
    %156 = arith.addf %154, %155 : vector<2x64xf32>
    %157 = math.rsqrt %156 : vector<2x64xf32>
    %158 = arith.mulf %152, %157 : vector<2x64xf32>
    %c656 = arith.constant 656 : index
    %c0_52 = arith.constant 0 : index
    %159 = vector.load %arg0[%c656, %c0_52] : memref<1664x192xf32, #tpu.memory_space<vmem>>, vector<128x8xf32>
    %cst_53 = arith.constant dense<0.000000e+00> : vector<4x8xf32>
    %160 = tpu.matmul %150, %159, %cst_53 {dimension_numbers = #tpu.dot_dimension_numbers<[1], [0], [0], [1], [0, 0, 1, 1], [], []>} : vector<4x128xf32>, vector<128x8xf32>, vector<4x8xf32> -> vector<4x8xf32>
    %c784 = arith.constant 784 : index
    %c0_54 = arith.constant 0 : index
    %161 = vector.load %arg0[%c784, %c0_54] : memref<1664x192xf32, #tpu.memory_space<vmem>>, vector<64x4xf32>
    %cst_55 = arith.constant dense<0.000000e+00> : vector<2x4xf32>
    %162 = tpu.matmul %158, %161, %cst_55 {dimension_numbers = #tpu.dot_dimension_numbers<[1], [0], [0], [1], [0, 0, 1, 1], [], []>} : vector<2x64xf32>, vector<64x4xf32>, vector<2x4xf32> -> vector<2x4xf32>
    %c848 = arith.constant 848 : index
    %c0_56 = arith.constant 0 : index
    %163 = vector.load %arg0[%c848, %c0_56] : memref<1664x192xf32, #tpu.memory_space<vmem>>, vector<8x8xf32>
    %cst_57 = arith.constant dense<0.000000e+00> : vector<4x8xf32>
    %164 = tpu.matmul %160, %163, %cst_57 {dimension_numbers = #tpu.dot_dimension_numbers<[1], [0], [0], [1], [0, 0, 1, 1], [], []>} : vector<4x8xf32>, vector<8x8xf32>, vector<4x8xf32> -> vector<4x8xf32>
    %c856 = arith.constant 856 : index
    %c0_58 = arith.constant 0 : index
    %165 = vector.load %arg0[%c856, %c0_58] : memref<1664x192xf32, #tpu.memory_space<vmem>>, vector<4x4xf32>
    %cst_59 = arith.constant dense<0.000000e+00> : vector<2x4xf32>
    %166 = tpu.matmul %162, %165, %cst_59 {dimension_numbers = #tpu.dot_dimension_numbers<[1], [0], [0], [1], [0, 0, 1, 1], [], []>} : vector<2x4xf32>, vector<4x4xf32>, vector<2x4xf32> -> vector<2x4xf32>
    %c864 = arith.constant 864 : index
    %c0_60 = arith.constant 0 : index
    %167 = vector.load %arg0[%c864, %c0_60] : memref<1664x192xf32, #tpu.memory_space<vmem>>, vector<12x8xf32>
    %168 = vector.extract_strided_slice %164 {offsets = [0, 0], sizes = [2, 8], strides = [1, 1]} : vector<4x8xf32> to vector<2x8xf32>
    %169 = vector.extract_strided_slice %164 {offsets = [2, 0], sizes = [2, 8], strides = [1, 1]} : vector<4x8xf32> to vector<2x8xf32>
    %170 = arith.mulf %168, %168 : vector<2x8xf32>
    %171 = arith.mulf %169, %169 : vector<2x8xf32>
    %172 = arith.addf %170, %171 : vector<2x8xf32>
    %173 = math.sqrt %172 : vector<2x8xf32>
    %174 = tpu.concatenate %173, %166 in 1 : vector<2x8xf32>, vector<2x4xf32> -> vector<2x12xf32>
    %cst_61 = arith.constant dense<0.000000e+00> : vector<2x8xf32>
    %175 = tpu.matmul %174, %167, %cst_61 {dimension_numbers = #tpu.dot_dimension_numbers<[1], [0], [0], [1], [0, 0, 1, 1], [], []>} : vector<2x12xf32>, vector<12x8xf32>, vector<2x8xf32> -> vector<2x8xf32>
    %cst_62 = arith.constant 0.000000e+00 : f32
    %176 = vector.broadcast %cst_62 : f32 to vector<2x8xf32>
    %177 = arith.maximumf %175, %176 : vector<2x8xf32>
    %cst_63 = arith.constant dense<0.000000e+00> : vector<2xf32>
    %178 = vector.multi_reduction <add>, %177, %cst_63 [1] : vector<2x8xf32> to vector<2xf32>
    %179 = vector.shape_cast %178 : vector<2xf32> to vector<2x1xf32>
    %cst_64 = arith.constant 8.000000e+00 : f32
    %180 = vector.broadcast %cst_64 : f32 to vector<2x1xf32>
    %181 = arith.divf %179, %180 : vector<2x1xf32>
    %182 = vector.broadcast %181 : vector<2x1xf32> to vector<2x8xf32>
    %183 = arith.subf %177, %182 : vector<2x8xf32>
    %184 = arith.mulf %183, %183 : vector<2x8xf32>
    %cst_65 = arith.constant dense<0.000000e+00> : vector<2xf32>
    %185 = vector.multi_reduction <add>, %184, %cst_65 [1] : vector<2x8xf32> to vector<2xf32>
    %186 = vector.shape_cast %185 : vector<2xf32> to vector<2x1xf32>
    %cst_66 = arith.constant 8.000000e+00 : f32
    %187 = vector.broadcast %cst_66 : f32 to vector<2x1xf32>
    %188 = arith.divf %186, %187 : vector<2x1xf32>
    %cst_67 = arith.constant 9.99999974E-6 : f32
    %189 = vector.broadcast %cst_67 : f32 to vector<2x1xf32>
    %190 = arith.addf %188, %189 : vector<2x1xf32>
    %191 = math.rsqrt %190 : vector<2x1xf32>
    %192 = vector.broadcast %191 : vector<2x1xf32> to vector<2x8xf32>
    %193 = arith.mulf %183, %192 : vector<2x8xf32>
    %cst_68 = arith.constant 9.99999996E-13 : f32
    %194 = vector.broadcast %cst_68 : f32 to vector<2x8xf32>
    %195 = arith.maximumf %172, %194 : vector<2x8xf32>
    %196 = math.rsqrt %195 : vector<2x8xf32>
    %197 = arith.mulf %193, %196 : vector<2x8xf32>
    %198 = arith.mulf %168, %197 : vector<2x8xf32>
    %199 = arith.mulf %169, %197 : vector<2x8xf32>
    %200 = tpu.concatenate %198, %199 in 0 : vector<2x8xf32>, vector<2x8xf32> -> vector<4x8xf32>
    %c880 = arith.constant 880 : index
    %c0_69 = arith.constant 0 : index
    %201 = vector.load %arg0[%c880, %c0_69] : memref<1664x192xf32, #tpu.memory_space<vmem>>, vector<8x8xf32>
    %cst_70 = arith.constant dense<0.000000e+00> : vector<4x8xf32>
    %202 = tpu.matmul %200, %201, %cst_70 {dimension_numbers = #tpu.dot_dimension_numbers<[1], [0], [0], [1], [0, 0, 1, 1], [], []>} : vector<4x8xf32>, vector<8x8xf32>, vector<4x8xf32> -> vector<4x8xf32>
    %203 = vector.extract_strided_slice %202 {offsets = [0, 0], sizes = [2, 8], strides = [1, 1]} : vector<4x8xf32> to vector<2x8xf32>
    %204 = vector.extract_strided_slice %202 {offsets = [2, 0], sizes = [2, 8], strides = [1, 1]} : vector<4x8xf32> to vector<2x8xf32>
    %205 = arith.mulf %203, %203 : vector<2x8xf32>
    %206 = arith.mulf %204, %204 : vector<2x8xf32>
    %207 = arith.addf %205, %206 : vector<2x8xf32>
    %208 = math.sqrt %207 : vector<2x8xf32>
    %cst_71 = arith.constant dense<0.000000e+00> : vector<2xf32>
    %209 = vector.multi_reduction <add>, %208, %cst_71 [1] : vector<2x8xf32> to vector<2xf32>
    %210 = vector.shape_cast %209 : vector<2xf32> to vector<2x1xf32>
    %cst_72 = arith.constant 8.000000e+00 : f32
    %211 = vector.broadcast %cst_72 : f32 to vector<2x1xf32>
    %212 = arith.divf %210, %211 : vector<2x1xf32>
    %213 = vector.broadcast %212 : vector<2x1xf32> to vector<2x8xf32>
    %214 = arith.subf %208, %213 : vector<2x8xf32>
    %215 = arith.mulf %214, %214 : vector<2x8xf32>
    %cst_73 = arith.constant dense<0.000000e+00> : vector<2xf32>
    %216 = vector.multi_reduction <add>, %215, %cst_73 [1] : vector<2x8xf32> to vector<2xf32>
    %217 = vector.shape_cast %216 : vector<2xf32> to vector<2x1xf32>
    %cst_74 = arith.constant 8.000000e+00 : f32
    %218 = vector.broadcast %cst_74 : f32 to vector<2x1xf32>
    %219 = arith.divf %217, %218 : vector<2x1xf32>
    %cst_75 = arith.constant 9.99999974E-6 : f32
    %220 = vector.broadcast %cst_75 : f32 to vector<2x1xf32>
    %221 = arith.addf %219, %220 : vector<2x1xf32>
    %222 = math.rsqrt %221 : vector<2x1xf32>
    %223 = vector.broadcast %222 : vector<2x1xf32> to vector<2x8xf32>
    %224 = arith.mulf %214, %223 : vector<2x8xf32>
    %cst_76 = arith.constant 9.99999996E-13 : f32
    %225 = vector.broadcast %cst_76 : f32 to vector<2x8xf32>
    %226 = arith.maximumf %207, %225 : vector<2x8xf32>
    %227 = math.rsqrt %226 : vector<2x8xf32>
    %228 = arith.mulf %224, %227 : vector<2x8xf32>
    %229 = arith.mulf %203, %228 : vector<2x8xf32>
    %230 = arith.mulf %204, %228 : vector<2x8xf32>
    %231 = tpu.concatenate %229, %230 in 0 : vector<2x8xf32>, vector<2x8xf32> -> vector<4x8xf32>
    %c888 = arith.constant 888 : index
    %c0_77 = arith.constant 0 : index
    %232 = vector.load %arg0[%c888, %c0_77] : memref<1664x192xf32, #tpu.memory_space<vmem>>, vector<8x2xf32>
    %cst_78 = arith.constant dense<0.000000e+00> : vector<4x2xf32>
    %233 = tpu.matmul %231, %232, %cst_78 {dimension_numbers = #tpu.dot_dimension_numbers<[1], [0], [0], [1], [0, 0, 1, 1], [], []>} : vector<4x8xf32>, vector<8x2xf32>, vector<4x2xf32> -> vector<4x2xf32>
    %234 = vector.extract_strided_slice %233 {offsets = [0, 0], sizes = [2, 1], strides = [1, 1]} : vector<4x2xf32> to vector<2x1xf32>
    %235 = vector.extract_strided_slice %233 {offsets = [2, 0], sizes = [2, 1], strides = [1, 1]} : vector<4x2xf32> to vector<2x1xf32>
    %236 = vector.extract_strided_slice %233 {offsets = [0, 1], sizes = [2, 1], strides = [1, 1]} : vector<4x2xf32> to vector<2x1xf32>
    %237 = vector.extract_strided_slice %233 {offsets = [2, 1], sizes = [2, 1], strides = [1, 1]} : vector<4x2xf32> to vector<2x1xf32>
    %238 = arith.mulf %234, %234 : vector<2x1xf32>
    %239 = arith.mulf %235, %235 : vector<2x1xf32>
    %240 = arith.addf %238, %239 : vector<2x1xf32>
    %cst_79 = arith.constant 1.000000e-16 : f32
    %241 = vector.broadcast %cst_79 : f32 to vector<2x1xf32>
    %242 = arith.maximumf %240, %241 : vector<2x1xf32>
    %243 = math.rsqrt %242 : vector<2x1xf32>
    %244 = arith.mulf %234, %243 : vector<2x1xf32>
    %245 = arith.mulf %235, %243 : vector<2x1xf32>
    %246 = arith.mulf %236, %244 : vector<2x1xf32>
    %247 = arith.mulf %237, %245 : vector<2x1xf32>
    %248 = arith.addf %246, %247 : vector<2x1xf32>
    %249 = arith.mulf %248, %244 : vector<2x1xf32>
    %250 = arith.subf %236, %249 : vector<2x1xf32>
    %251 = arith.mulf %248, %245 : vector<2x1xf32>
    %252 = arith.subf %237, %251 : vector<2x1xf32>
    %253 = arith.mulf %250, %250 : vector<2x1xf32>
    %254 = arith.mulf %252, %252 : vector<2x1xf32>
    %255 = arith.addf %253, %254 : vector<2x1xf32>
    %cst_80 = arith.constant 1.000000e-16 : f32
    %256 = vector.broadcast %cst_80 : f32 to vector<2x1xf32>
    %257 = arith.maximumf %255, %256 : vector<2x1xf32>
    %258 = math.rsqrt %257 : vector<2x1xf32>
    %259 = arith.mulf %250, %258 : vector<2x1xf32>
    %260 = arith.mulf %252, %258 : vector<2x1xf32>
    %261 = tpu.concatenate %244, %245, %259, %260 in 1 : vector<2x1xf32>, vector<2x1xf32>, vector<2x1xf32>, vector<2x1xf32> -> vector<2x4xf32>
    %c0_81 = arith.constant 0 : index
    %c0_82 = arith.constant 0 : index
    %262 = vector.load %arg2[%c0_81, %c0_82] : memref<2x4xf32, #tpu.memory_space<vmem>>, vector<2x4xf32>
    tpu.vector_store %arg2[%c0_81, %c0_82], %261 {strides = array<i32>} : memref<2x4xf32, #tpu.memory_space<vmem>>, vector<2x4xf32>,
    %c16 = arith.constant 16 : index
    %c0_83 = arith.constant 0 : index
    %263 = vector.load %arg1[%c16, %c0_83] : memref<40x48xf32, #tpu.memory_space<vmem>>, vector<6x16xf32>
    %c24 = arith.constant 24 : index
    %c0_84 = arith.constant 0 : index
    %264 = vector.load %arg1[%c24, %c0_84] : memref<40x48xf32, #tpu.memory_space<vmem>>, vector<6x16xf32>
    %c32 = arith.constant 32 : index
    %c0_85 = arith.constant 0 : index
    %265 = vector.load %arg1[%c32, %c0_85] : memref<40x48xf32, #tpu.memory_space<vmem>>, vector<6x16xf32>
    %266 = tpu.concatenate %244, %244, %244 in 0 : vector<2x1xf32>, vector<2x1xf32>, vector<2x1xf32> -> vector<6x1xf32>
    %267 = tpu.concatenate %245, %245, %245 in 0 : vector<2x1xf32>, vector<2x1xf32>, vector<2x1xf32> -> vector<6x1xf32>
    %268 = tpu.concatenate %259, %259, %259 in 0 : vector<2x1xf32>, vector<2x1xf32>, vector<2x1xf32> -> vector<6x1xf32>
    %269 = tpu.concatenate %260, %260, %260 in 0 : vector<2x1xf32>, vector<2x1xf32>, vector<2x1xf32> -> vector<6x1xf32>
    %270 = vector.broadcast %266 : vector<6x1xf32> to vector<6x16xf32>
    %271 = arith.mulf %263, %270 : vector<6x16xf32>
    %272 = vector.broadcast %267 : vector<6x1xf32> to vector<6x16xf32>
    %273 = arith.mulf %264, %272 : vector<6x16xf32>
    %274 = arith.addf %271, %273 : vector<6x16xf32>
    %275 = vector.broadcast %268 : vector<6x1xf32> to vector<6x16xf32>
    %276 = arith.mulf %263, %275 : vector<6x16xf32>
    %277 = vector.broadcast %269 : vector<6x1xf32> to vector<6x16xf32>
    %278 = arith.mulf %264, %277 : vector<6x16xf32>
    %279 = arith.addf %276, %278 : vector<6x16xf32>
    %280 = vector.extract_strided_slice %274 {offsets = [0, 0], sizes = [2, 16], strides = [1, 1]} : vector<6x16xf32> to vector<2x16xf32>
    %281 = vector.extract_strided_slice %279 {offsets = [0, 0], sizes = [2, 16], strides = [1, 1]} : vector<6x16xf32> to vector<2x16xf32>
    %282 = vector.extract_strided_slice %265 {offsets = [0, 0], sizes = [2, 16], strides = [1, 1]} : vector<6x16xf32> to vector<2x16xf32>
    %283 = vector.extract_strided_slice %274 {offsets = [2, 0], sizes = [2, 16], strides = [1, 1]} : vector<6x16xf32> to vector<2x16xf32>
    %284 = vector.extract_strided_slice %279 {offsets = [2, 0], sizes = [2, 16], strides = [1, 1]} : vector<6x16xf32> to vector<2x16xf32>
    %285 = vector.extract_strided_slice %265 {offsets = [2, 0], sizes = [2, 16], strides = [1, 1]} : vector<6x16xf32> to vector<2x16xf32>
    %286 = vector.extract_strided_slice %274 {offsets = [4, 0], sizes = [2, 16], strides = [1, 1]} : vector<6x16xf32> to vector<2x16xf32>
    %287 = vector.extract_strided_slice %279 {offsets = [4, 0], sizes = [2, 16], strides = [1, 1]} : vector<6x16xf32> to vector<2x16xf32>
    %288 = vector.extract_strided_slice %265 {offsets = [4, 0], sizes = [2, 16], strides = [1, 1]} : vector<6x16xf32> to vector<2x16xf32>
    %289 = arith.mulf %283, %283 : vector<2x16xf32>
    %290 = arith.mulf %284, %284 : vector<2x16xf32>
    %291 = arith.addf %289, %290 : vector<2x16xf32>
    %292 = arith.mulf %285, %285 : vector<2x16xf32>
    %293 = arith.addf %291, %292 : vector<2x16xf32>
    %cst_86 = arith.constant 1.000000e-16 : f32
    %294 = vector.broadcast %cst_86 : f32 to vector<2x16xf32>
    %295 = arith.maximumf %293, %294 : vector<2x16xf32>
    %296 = math.rsqrt %295 : vector<2x16xf32>
    %297 = arith.mulf %284, %288 : vector<2x16xf32>
    %298 = arith.mulf %285, %287 : vector<2x16xf32>
    %299 = arith.subf %297, %298 : vector<2x16xf32>
    %300 = arith.mulf %299, %296 : vector<2x16xf32>
    %301 = arith.mulf %285, %286 : vector<2x16xf32>
    %302 = arith.mulf %283, %288 : vector<2x16xf32>
    %303 = arith.subf %301, %302 : vector<2x16xf32>
    %304 = arith.mulf %303, %296 : vector<2x16xf32>
    %305 = arith.mulf %283, %287 : vector<2x16xf32>
    %306 = arith.mulf %284, %286 : vector<2x16xf32>
    %307 = arith.subf %305, %306 : vector<2x16xf32>
    %308 = arith.mulf %307, %296 : vector<2x16xf32>
    %309 = vector.shape_cast %280 : vector<2x16xf32> to vector<2x1x16xf32>
    %310 = vector.shape_cast %281 : vector<2x16xf32> to vector<2x1x16xf32>
    %311 = vector.shape_cast %282 : vector<2x16xf32> to vector<2x1x16xf32>
    %312 = vector.shape_cast %300 : vector<2x16xf32> to vector<2x1x16xf32>
    %313 = vector.shape_cast %304 : vector<2x16xf32> to vector<2x1x16xf32>
    %314 = vector.shape_cast %308 : vector<2x16xf32> to vector<2x1x16xf32>
    %315 = tpu.concatenate %309, %310, %311, %312, %313, %314 in 1 : vector<2x1x16xf32>, vector<2x1x16xf32>, vector<2x1x16xf32>, vector<2x1x16xf32>, vector<2x1x16xf32>, vector<2x1x16xf32> -> vector<2x6x16xf32>
    %c0_87 = arith.constant 0 : index
    %c0_88 = arith.constant 0 : index
    %c0_89 = arith.constant 0 : index
    %316 = vector.load %arg3[%c0_87, %c0_88, %c0_89] : memref<2x6x16xf32, #tpu.memory_space<vmem>>, vector<2x6x16xf32>
    tpu.vector_store %arg3[%c0_87, %c0_88, %c0_89], %315 {strides = array<i32>} : memref<2x6x16xf32, #tpu.memory_space<vmem>>, vector<2x6x16xf32>,
    return
  }
}

</mosaic_0001>

<bundles_post_ra>
// kernel: tpu_custom_call.1
= control target key start
LH: loop header
LB: loop body
LE: loop exit
PB: predicated region body
PF: predicated region fallthrough
CT: control target
= control target key end

     0   :  { %v6127_v1 = vmov 0.0   ;;  %vm3939_vm0 = vmmov 0   ;;  %vm172_vm1 = vcmask 261120   ;;  %vm93_vm2 = vcmask 392192   ;;  %s6123_s0 = inlined_call_operand.vmem [shape: f32[1664,192], index: 0, kind: input, shape index: {}]   ;;  %s6124_s1 = inlined_call_operand.vmem [shape: f32[40,48], index: 1, kind: input, shape index: {}]   ;;  %s6125_s2 = inlined_call_operand.hbm [shape: f32[2,4], index: 2, kind: output, shape index: {0}]   ;;  %s6126_s3 = inlined_call_operand.vmem [shape: f32[2,6,16], index: 3, kind: output, shape index: {1}]  }
   0x1   :  { %v92_v0 = vld [vmem:[%s6123_s0 + $0x50] sm:$0xff]  ;;  %3342 = vmatprep.subr.mxu0 %v6127_v1  ;;  %v91_v2 = vld [vmem:[%s6123_s0 + $0x40] sm:$0xff]  ;;  %3354 = vmatprep.mubr.msk.f32.mxu0 %vm3939_vm0, %v6127_v1  ;;  %v167_v10 = vld [vmem:[%s6124_s1 + $0x8] sm:$0x3] }
   0x2   :  { %3343 = vmatpush3.msra.mxu0 %v92_v0  ;;  %3357 = vmatprep.subr.mxu1 %v6127_v1  ;;  %v171_v3 = vld [vmem:[%s6123_s0 + $0x90] sm:$0xff]  ;;  %v170_v4 = vld [vmem:[%s6123_s0 + $0x80] sm:$0xff]  ;;  %v277_v12 = vld [vmem:[%s6123_s0 + $0x198] sm:$0xff] }
   0x3   :  { %3344 = vmatprep.subr.mxu0 %v6127_v1  ;;  %v90_v5 = vld [vmem:[%s6123_s0 + $0x30] sm:$0xff]  ;;  %3358 = vmatpush3.msra.mxu1 %v171_v3  ;;  %v89_v7 = vld [vmem:[%s6123_s0 + $0x20] sm:$0xff]  ;;  %v275_v15 = vld [vmem:[%s6123_s0 + $0x188] sm:$0xff] }
   0x4   :  { %3345 = vmatpush3.msra.mxu0 %v91_v2  ;;  %3359 = vmatprep.subr.mxu1 %v6127_v1  ;;  %v169_v6 = vld [vmem:[%s6123_s0 + $0x70] sm:$0xff]  ;;  %v168_v8 = vld [vmem:[%s6123_s0 + $0x60] sm:$0xff] }
   0x5   :  { %3346 = vmatprep.subr.mxu0 %v6127_v1  ;;  %3360 = vmatpush3.msra.mxu1 %v170_v4  ;;  %v88_v9 = vld [vmem:[%s6123_s0 + $0x10] sm:$0xff]  ;;  %v87_v11 = vld [vmem:[%s6123_s0] sm:$0xff] }
   0x6   :  { %3347 = vmatpush3.msra.mxu0 %v90_v5  ;;  %3361 = vmatprep.subr.mxu1 %v6127_v1  ;;  %v86_v13 = vld [vmem:[%s6124_s1] sm:$0xf]  ;;  %v276_v14 = vld [vmem:[%s6123_s0 + $0x190] sm:$0xff] }
   0x7   :  { %3348 = vmatprep.subr.mxu0 %v6127_v1  ;;  %3362 = vmatpush3.msra.mxu1 %v169_v6 }
   0x8   :  { %3349 = vmatpush3.msra.mxu0 %v89_v7  ;;  %3363 = vmatprep.subr.mxu1 %v6127_v1 }
   0x9   :  { %3350 = vmatprep.subr.mxu0 %v6127_v1  ;;  %3364 = vmatpush3.msra.mxu1 %v168_v8 }
   0xa   :  { %3351 = vmatpush3.msra.mxu0 %v88_v9  ;;  %3365 = vmatprep.mubr.msk.f32.mxu1 %vm3939_vm0, %v6127_v1 }
   0xb   :  { %3352 = vmatprep.subr.mxu0 %v6127_v1  ;;  %3366 = vmatmul.mubr.msk.f32.vlgmr.msra.gmra.mxu1 %vm172_vm1, %v167_v10 }
   0xc   :  { %9 = vsyncpa [#allocation3], 0  ;;  %3353 = vmatpush3.msra.mxu0 %v87_v11  ;;  %310 = vmatprep.subr.mxu1 %v277_v12  ;;  %v274_v16 = vld [vmem:[%s6123_s0 + $0x180] sm:$0xff]  ;;  %v273_v17 = vld [vmem:[%s6123_s0 + $0x178] sm:$0xff]  ;;  %vm306_vm3 = vcmask 523264   ;;  %vm547_vm6 = vcmask 1041408  }
   0xd   :  { %3355 = vmatmul.mubr.msk.f32.vlgmr.msra.gmra.mxu0 %vm93_vm2, %v86_v13  ;;  %311 = vmatpush1.msra.mxu1 %v276_v14  ;;  %v272_v18 = vld [vmem:[%s6123_s0 + $0x170] sm:$0xff]  ;;  %v271_v19 = vld [vmem:[%s6123_s0 + $0x168] sm:$0xff]  ;;  %v270_v20 = vld [vmem:[%s6123_s0 + $0x160] sm:$0xff]  ;;  %vm2362_vm15 = vcmask 1043456   ;;  %vm2358_vm1 = vcmask 31744   ;;  %vm2283_vm2 = vcmask 64512  }
   0xe   :  { %312 = vmatprep.subr.mxu1 %v275_v15  ;;  %v269_v21 = vld [vmem:[%s6123_s0 + $0x158] sm:$0xff]  ;;  %v268_v22 = vld [vmem:[%s6123_s0 + $0x150] sm:$0xff]  ;;  %v267_v23 = vld [vmem:[%s6123_s0 + $0x148] sm:$0xff]  ;;  %s3940_s8 = smov 8   ;;  %s3944_s13 = smov 2  }
   0xf   :  { %313 = vmatpush1.msra.mxu1 %v274_v16  ;;  %v266_v24 = vld [vmem:[%s6123_s0 + $0x140] sm:$0xff]  ;;  %v265_v25 = vld [vmem:[%s6123_s0 + $0x138] sm:$0xff]  ;;  %v264_v26 = vld [vmem:[%s6123_s0 + $0x130] sm:$0xff]  ;;  %s3945_s20 = smov [#allocation2]  }
  0x10   :  { %314 = vmatprep.subr.mxu1 %v273_v17  ;;  %v263_v27 = vld [vmem:[%s6123_s0 + $0x128] sm:$0xff]  ;;  %v262_v28 = vld [vmem:[%s6123_s0 + $0x120] sm:$0xff]  ;;  %v261_v29 = vld [vmem:[%s6123_s0 + $0x118] sm:$0xff]  ;;  %s3100_s21 = sshll.u32 %s3945_s20, 4  ;;  %s3101_s21 = int_to_ptr.vmem [resolvable:$true] %s3100_s21 }
  0x11   :  { %315 = vmatpush1.msra.mxu1 %v272_v18  ;;  %v260_v30 = vld [vmem:[%s6123_s0 + $0x110] sm:$0xff]  ;;  %v259_v31 = vld [vmem:[%s6123_s0 + $0x108] sm:$0xff]  ;;  %v258_v32 = vld [vmem:[%s6123_s0 + $0x100] sm:$0xff]  ;;  %p3921_p1 = scmp.lt.s32.totalorder %s3101_s21, %s3101_s21 }
  0x12   :  { %316 = vmatprep.subr.mxu1 %v271_v19  ;;  %v257_v33 = vld [vmem:[%s6123_s0 + $0xf8] sm:$0xff]  ;;  %v256_v34 = vld [vmem:[%s6123_s0 + $0xf0] sm:$0xff]  ;;  %v255_v35 = vld [vmem:[%s6123_s0 + $0xe8] sm:$0xff] }
  0x13   :  { %317 = vmatpush1.msra.mxu1 %v270_v20  ;;  %v254_v36 = vld [vmem:[%s6123_s0 + $0xe0] sm:$0xff]  ;;  %v253_v37 = vld [vmem:[%s6123_s0 + $0xd8] sm:$0xff]  ;;  %v252_v38 = vld [vmem:[%s6123_s0 + $0xd0] sm:$0xff] }
  0x14   :  { %318 = vmatprep.subr.mxu1 %v269_v21  ;;  %v251_v39 = vld [vmem:[%s6123_s0 + $0xc8] sm:$0xff]  ;;  %v250_v40 = vld [vmem:[%s6123_s0 + $0xc0] sm:$0xff]  ;;  %v249_v41 = vld [vmem:[%s6123_s0 + $0xb8] sm:$0xff] }
  0x15   :  { %319 = vmatpush1.msra.mxu1 %v268_v22  ;;  %v248_v42 = vld [vmem:[%s6123_s0 + $0xb0] sm:$0xff]  ;;  %v247_v43 = vld [vmem:[%s6123_s0 + $0xa8] sm:$0xff]  ;;  %v246_v44 = vld [vmem:[%s6123_s0 + $0xa0] sm:$0xff] }
  0x16   :  { %320 = vmatprep.subr.mxu1 %v267_v23  ;;  %v293_v45 = vld [vmem:[%s6123_s0 + $0x218] sm:$0xff]  ;;  %v292_v46 = vld [vmem:[%s6123_s0 + $0x210] sm:$0xff]  ;;  %v291_v47 = vld [vmem:[%s6123_s0 + $0x208] sm:$0xff] }
  0x17   :  { %321 = vmatpush1.msra.mxu1 %v266_v24  ;;  %v290_v48 = vld [vmem:[%s6123_s0 + $0x200] sm:$0xff]  ;;  %v289_v49 = vld [vmem:[%s6123_s0 + $0x1f8] sm:$0xff]  ;;  %v288_v50 = vld [vmem:[%s6123_s0 + $0x1f0] sm:$0xff] }
  0x18   :  { %322 = vmatprep.subr.mxu1 %v265_v25  ;;  %v287_v51 = vld [vmem:[%s6123_s0 + $0x1e8] sm:$0xff]  ;;  %v286_v52 = vld [vmem:[%s6123_s0 + $0x1e0] sm:$0xff]  ;;  %v285_v53 = vld [vmem:[%s6123_s0 + $0x1d8] sm:$0xff] }
  0x19   :  { %323 = vmatpush1.msra.mxu1 %v264_v26  ;;  %v284_v54 = vld [vmem:[%s6123_s0 + $0x1d0] sm:$0xff]  ;;  %v283_v55 = vld [vmem:[%s6123_s0 + $0x1c8] sm:$0xff]  ;;  %v282_v56 = vld [vmem:[%s6123_s0 + $0x1c0] sm:$0xff] }
  0x1a   :  { %324 = vmatprep.subr.mxu1 %v263_v27  ;;  %v281_v57 = vld [vmem:[%s6123_s0 + $0x1b8] sm:$0xff]  ;;  %v280_v58 = vld [vmem:[%s6123_s0 + $0x1b0] sm:$0xff]  ;;  %v279_v59 = vld [vmem:[%s6123_s0 + $0x1a8] sm:$0xff] }
  0x1b   :  { %325 = vmatpush1.msra.mxu1 %v262_v28  ;;  %v278_v60 = vld [vmem:[%s6123_s0 + $0x1a0] sm:$0xff]  ;;  %v4164_v61 = vld [vmem:[%s6123_s0 + $0x318] sm:$0xff]  ;;  %v4169_v62 = vld [vmem:[%s6123_s0 + $0x310] sm:$0xff] }
  0x1c   :  { %326 = vmatprep.subr.mxu1 %v261_v29  ;;  %v4174_v63 = vld [vmem:[%s6123_s0 + $0x308] sm:$0xff]  ;;  %386 = vmatprep.subr.mxu0 %v4164_v61  ;;  %v4180_v0 = vld [vmem:[%s6123_s0 + $0x300] sm:$0xff]  ;;  %v4187_v2 = vld [vmem:[%s6123_s0 + $0x2f8] sm:$0xff] }
  0x1d   :  { %327 = vmatpush1.msra.mxu1 %v260_v30  ;;  %387 = vmatpush1.msra.mxu0 %v4169_v62  ;;  %v4193_v3 = vld [vmem:[%s6123_s0 + $0x2f0] sm:$0xff]  ;;  %v4199_v4 = vld [vmem:[%s6123_s0 + $0x2e8] sm:$0xff]  ;;  %v4205_v5 = vld [vmem:[%s6123_s0 + $0x2e0] sm:$0xff] }
  0x1e   :  { %328 = vmatprep.subr.mxu1 %v259_v31  ;;  %388 = vmatprep.subr.mxu0 %v4174_v63  ;;  %v4211_v6 = vld [vmem:[%s6123_s0 + $0x2d8] sm:$0xff]  ;;  %v4217_v7 = vld [vmem:[%s6123_s0 + $0x2d0] sm:$0xff]  ;;  %v4223_v8 = vld [vmem:[%s6123_s0 + $0x2c8] sm:$0xff] }
  0x1f   :  { %329 = vmatpush1.msra.mxu1 %v258_v32  ;;  %389 = vmatpush1.msra.mxu0 %v4180_v0  ;;  %v4229_v9 = vld [vmem:[%s6123_s0 + $0x2c0] sm:$0xff]  ;;  %v4235_v10 = vld [vmem:[%s6123_s0 + $0x2b8] sm:$0xff]  ;;  %v4241_v11 = vld [vmem:[%s6123_s0 + $0x2b0] sm:$0xff] }
  0x20   :  { %330 = vmatprep.subr.mxu1 %v257_v33  ;;  %390 = vmatprep.subr.mxu0 %v4187_v2  ;;  %v4247_v12 = vld [vmem:[%s6123_s0 + $0x2a8] sm:$0xff]  ;;  %v4253_v13 = vld [vmem:[%s6123_s0 + $0x2a0] sm:$0xff]  ;;  %v4259_v14 = vld [vmem:[%s6123_s0 + $0x298] sm:$0xff] }
  0x21   :  { %331 = vmatpush1.msra.mxu1 %v256_v34  ;;  %391 = vmatpush1.msra.mxu0 %v4193_v3  ;;  %v4265_v15 = vld [vmem:[%s6123_s0 + $0x290] sm:$0xff]  ;;  %v4271_v16 = vld [vmem:[%s6123_s0 + $0x288] sm:$0xff]  ;;  %v4277_v17 = vld [vmem:[%s6123_s0 + $0x280] sm:$0xff] }
  0x22   :  { %332 = vmatprep.subr.mxu1 %v255_v35  ;;  %392 = vmatprep.subr.mxu0 %v4199_v4  ;;  %v4283_v18 = vld [vmem:[%s6123_s0 + $0x278] sm:$0xff]  ;;  %v4289_v19 = vld [vmem:[%s6123_s0 + $0x270] sm:$0xff]  ;;  %v4295_v20 = vld [vmem:[%s6123_s0 + $0x268] sm:$0xff] }
  0x23   :  { %333 = vmatpush1.msra.mxu1 %v254_v36  ;;  %393 = vmatpush1.msra.mxu0 %v4205_v5  ;;  %v4301_v21 = vld [vmem:[%s6123_s0 + $0x260] sm:$0xff]  ;;  %v4307_v22 = vld [vmem:[%s6123_s0 + $0x258] sm:$0xff]  ;;  %v4313_v23 = vld [vmem:[%s6123_s0 + $0x250] sm:$0xff] }
  0x24   :  { %334 = vmatprep.subr.mxu1 %v253_v37  ;;  %394 = vmatprep.subr.mxu0 %v4211_v6  ;;  %v4319_v24 = vld [vmem:[%s6123_s0 + $0x248] sm:$0xff]  ;;  %v4325_v25 = vld [vmem:[%s6123_s0 + $0x240] sm:$0xff]  ;;  %v4331_v26 = vld [vmem:[%s6123_s0 + $0x238] sm:$0xff] }
  0x25   :  { %335 = vmatpush1.msra.mxu1 %v252_v38  ;;  %395 = vmatpush1.msra.mxu0 %v4217_v7  ;;  %v4337_v27 = vld [vmem:[%s6123_s0 + $0x230] sm:$0xff]  ;;  %v4343_v28 = vld [vmem:[%s6123_s0 + $0x228] sm:$0xff]  ;;  %v4349_v29 = vld [vmem:[%s6123_s0 + $0x220] sm:$0xff] }
  0x26   :  { %336 = vmatprep.subr.mxu1 %v251_v39  ;;  %396 = vmatprep.subr.mxu0 %v4223_v8  ;;  %v4355_v30 = vld [vmem:[%s6123_s0 + $0x398] sm:$0xff]  ;;  %v4361_v31 = vld [vmem:[%s6123_s0 + $0x390] sm:$0xff]  ;;  %v4367_v32 = vld [vmem:[%s6123_s0 + $0x388] sm:$0xff] }
  0x27   :  { %337 = vmatpush1.msra.mxu1 %v250_v40  ;;  %397 = vmatpush1.msra.mxu0 %v4229_v9  ;;  %v4373_v33 = vld [vmem:[%s6123_s0 + $0x380] sm:$0xff]  ;;  %v4379_v34 = vld [vmem:[%s6123_s0 + $0x378] sm:$0xff]  ;;  %v4385_v35 = vld [vmem:[%s6123_s0 + $0x370] sm:$0xff] }
  0x28   :  { %338 = vmatprep.subr.mxu1 %v249_v41  ;;  %398 = vmatprep.subr.mxu0 %v4235_v10  ;;  %v4391_v36 = vld [vmem:[%s6123_s0 + $0x368] sm:$0xff]  ;;  %v4397_v37 = vld [vmem:[%s6123_s0 + $0x360] sm:$0xff]  ;;  %v4403_v38 = vld [vmem:[%s6123_s0 + $0x358] sm:$0xff] }
  0x29   :  { %339 = vmatpush1.msra.mxu1 %v248_v42  ;;  %399 = vmatpush1.msra.mxu0 %v4241_v11  ;;  %v4409_v39 = vld [vmem:[%s6123_s0 + $0x350] sm:$0xff] }
  0x2a   :  { %340 = vmatprep.subr.mxu1 %v247_v43  ;;  %400 = vmatprep.subr.mxu0 %v4247_v12 }
  0x2b   :  { %341 = vmatpush1.msra.mxu1 %v246_v44  ;;  %401 = vmatpush1.msra.mxu0 %v4253_v13 }
  0x2c   :  { %358 = vmatprep.subr.mxu1 %v293_v45  ;;  %402 = vmatprep.subr.mxu0 %v4259_v14 }
  0x2d   :  { %359 = vmatpush2.msra.mxu1 %v292_v46  ;;  %403 = vmatpush1.msra.mxu0 %v4265_v15 }
  0x2e   :  { %360 = vmatprep.subr.mxu1 %v291_v47  ;;  %404 = vmatprep.subr.mxu0 %v4271_v16 }
  0x2f   :  { %361 = vmatpush2.msra.mxu1 %v290_v48  ;;  %405 = vmatpush1.msra.mxu0 %v4277_v17 }
  0x30   :  { %362 = vmatprep.subr.mxu1 %v289_v49  ;;  %406 = vmatprep.subr.mxu0 %v4283_v18 }
  0x31   :  { %363 = vmatpush2.msra.mxu1 %v288_v50  ;;  %407 = vmatpush1.msra.mxu0 %v4289_v19 }
  0x32   :  { %364 = vmatprep.subr.mxu1 %v287_v51  ;;  %408 = vmatprep.subr.mxu0 %v4295_v20 }
  0x33   :  { %365 = vmatpush2.msra.mxu1 %v286_v52  ;;  %409 = vmatpush1.msra.mxu0 %v4301_v21  ;;  %v4471_v52 = vld [vmem:[%s6123_s0 + $0x348] sm:$0xff] }
  0x34   :  { %366 = vmatprep.subr.mxu1 %v285_v53  ;;  %410 = vmatprep.subr.mxu0 %v4307_v22  ;;  %v4477_v53 = vld [vmem:[%s6123_s0 + $0x340] sm:$0xff] }
  0x35   :  { %367 = vmatpush2.msra.mxu1 %v284_v54  ;;  %411 = vmatpush1.msra.mxu0 %v4313_v23  ;;  %v4484_v54 = vld [vmem:[%s6123_s0 + $0x338] sm:$0xff] }
  0x36   :  { %368 = vmatprep.subr.mxu1 %v283_v55  ;;  %412 = vmatprep.subr.mxu0 %v4319_v24  ;;  %v4491_v55 = vld [vmem:[%s6123_s0 + $0x330] sm:$0xff] }
  0x37   :  { %369 = vmatpush2.msra.mxu1 %v282_v56  ;;  %413 = vmatpush1.msra.mxu0 %v4325_v25  ;;  %v4498_v56 = vld [vmem:[%s6123_s0 + $0x328] sm:$0xff] }
  0x38   :  { %370 = vmatprep.subr.mxu1 %v281_v57  ;;  %414 = vmatprep.subr.mxu0 %v4331_v26  ;;  %6147 = vst [vmem:[#allocation5_spill] sm:$0xff] %v4498_v56  ;;  %v4503_v57 = vld [vmem:[%s6123_s0 + $0x320] sm:$0xff] }
  0x39   :  { %371 = vmatpush2.msra.mxu1 %v280_v58  ;;  %415 = vmatpush1.msra.mxu0 %v4337_v27  ;;  %6148 = vst [vmem:[#allocation6_spill] sm:$0xff] %v4503_v57 }
  0x3a   :  { %372 = vmatprep.subr.mxu1 %v279_v59  ;;  %416 = vmatprep.subr.mxu0 %v4343_v28 }
  0x3b   :  { %373 = vmatpush2.msra.mxu1 %v278_v60  ;;  %417 = vmatpush1.msra.mxu0 %v4349_v29 }
  0x3c   :  { %464 = vmatprep.subr.mxu1 %v4164_v61  ;;  %434 = vmatprep.subr.mxu0 %v4355_v30 }
  0x3d   :  { %435 = vmatpush2.msra.mxu0 %v4361_v31 }
  0x3e   :  { %436 = vmatprep.subr.mxu0 %v4367_v32 }
  0x3f   :  { %437 = vmatpush2.msra.mxu0 %v4373_v33 }
  0x40   :  { %438 = vmatprep.subr.mxu0 %v4379_v34 }
  0x41   :  { %439 = vmatpush2.msra.mxu0 %v4385_v35 }
  0x42   :  { %440 = vmatprep.subr.mxu0 %v4391_v36 }
  0x43   :  { %441 = vmatpush2.msra.mxu0 %v4397_v37 }
  0x44   :  { %442 = vmatprep.subr.mxu0 %v4403_v38 }
  0x45   :  { %443 = vmatpush2.msra.mxu0 %v4409_v39 }
  0x46   :  { %444 = vmatprep.subr.mxu0 %v4471_v52 }
  0x47   :  { %445 = vmatpush2.msra.mxu0 %v4477_v53 }
  0x48   :  { %446 = vmatprep.subr.mxu0 %v4484_v54 }
  0x49   :  { %447 = vmatpush2.msra.mxu0 %v4491_v55 }
  0x4a   :  { %448 = vmatprep.subr.mxu0 %v4498_v56 }
  0x4b   :  { %449 = vmatpush2.msra.mxu0 %v4503_v57 }
  0x4c   :  { %3368 = vmatprep.subr.mxu0 %v6127_v1 }
  0xcb   :  { %v242_v40 = vpop.f32.mrf.mxu1 }
  0xcc   :  { %3114 = vmatprep.mubr.msk.f32.mxu1 %vm306_vm3, %v242_v40 }
  0xcd   :  { %v4415_v41 = vpop.f32.mrf.mxu0  ;;  %v3367_v42 = vpop.f32.mrf.mxu1 }
  0xce   :  { %v294_v43 = vmul.f32 %v4415_v41, %v4415_v41  ;;  %v564_v42 = vld [vmem:[%s6123_s0 + $0x7f0] sm:$0xff] }
  0xcf   :  { %v3356_v44 = vpop.f32.mrf.mxu0 }
  0xd0   :  { %v296_v45 = vrot.slane %v294_v43, 2  ;;  %v562_v44 = vld [vmem:[%s6123_s0 + $0x7d0] sm:$0xff] }
  0xd2   :  { %v4419_v46 = vadd.f32 %v296_v45, %v294_v43  ;;  %v563_v43 = vld [vmem:[%s6123_s0 + $0x7e0] sm:$0xff] }
  0xd4   :  { %3786 = vrsqrt.f32 %v4419_v46  ;;  %vm301_vm4 = vcmp.eq.f32.partialorder %v4419_v46, inf  ;;  %v304_v49 = vand.u32 2147483648, %v4419_v46  ;;  %vm303_vm5 = vcmp.eq.f32.partialorder %v4419_v46, 0.0 }
  0xe1   :  { %v3787_v47 = vpop.eup %3786 }
  0xe2   :  { %v300_v48 = vmul.f32 %v3787_v47, %v4419_v46 }
  0xe4   :  { %v302_v50 = vsel %vm301_vm4, %v4419_v46, %v300_v48 }
  0xe5   :  { %v305_v51 = vsel %vm303_vm5, %v304_v49, %v302_v50  ;;  %vm2455_vm5 = vcmask 97280  }
  0xe6   :  { %375 = vmatmul.mubr.f32.vlgmr.msra.gmra.mxu1 %v305_v51 }
  0xe7   :  { %465 = vmatpush1.msra.mxu1 %v4169_v62 }
  0xe8   :  { %466 = vmatprep.subr.mxu1 %v4174_v63 }
  0xe9   :  { %467 = vmatpush1.msra.mxu1 %v4180_v0 }
  0xea   :  { %468 = vmatprep.subr.mxu1 %v4187_v2 }
  0xeb   :  { %469 = vmatpush1.msra.mxu1 %v4193_v3 }
  0xec   :  { %470 = vmatprep.subr.mxu1 %v4199_v4 }
  0xed   :  { %471 = vmatpush1.msra.mxu1 %v4205_v5 }
  0xee   :  { %472 = vmatprep.subr.mxu1 %v4211_v6 }
  0xef   :  { %473 = vmatpush1.msra.mxu1 %v4217_v7 }
  0xf0   :  { %474 = vmatprep.subr.mxu1 %v4223_v8 }
  0xf1   :  { %475 = vmatpush1.msra.mxu1 %v4229_v9 }
  0xf2   :  { %476 = vmatprep.subr.mxu1 %v4235_v10 }
  0xf3   :  { %477 = vmatpush1.msra.mxu1 %v4241_v11 }
  0xf4   :  { %478 = vmatprep.subr.mxu1 %v4247_v12 }
  0xf5   :  { %479 = vmatpush1.msra.mxu1 %v4253_v13 }
  0xf6   :  { %480 = vmatprep.subr.mxu1 %v4259_v14 }
  0xf7   :  { %481 = vmatpush1.msra.mxu1 %v4265_v15 }
  0xf8   :  { %482 = vmatprep.subr.mxu1 %v4271_v16 }
  0xf9   :  { %483 = vmatpush1.msra.mxu1 %v4277_v17 }
  0xfa   :  { %484 = vmatprep.subr.mxu1 %v4283_v18 }
  0xfb   :  { %485 = vmatpush1.msra.mxu1 %v4289_v19 }
  0xfc   :  { %486 = vmatprep.subr.mxu1 %v4295_v20 }
  0xfd   :  { %487 = vmatpush1.msra.mxu1 %v4301_v21 }
  0xfe   :  { %488 = vmatprep.subr.mxu1 %v4307_v22 }
  0xff   :  { %489 = vmatpush1.msra.mxu1 %v4313_v23 }
 0x100   :  { %490 = vmatprep.subr.mxu1 %v4319_v24 }
 0x101   :  { %491 = vmatpush1.msra.mxu1 %v4325_v25 }
 0x102   :  { %492 = vmatprep.subr.mxu1 %v4331_v26 }
 0x103   :  { %493 = vmatpush1.msra.mxu1 %v4337_v27 }
 0x104   :  { %494 = vmatprep.subr.mxu1 %v4343_v28 }
 0x105   :  { %495 = vmatpush1.msra.mxu1 %v4349_v29 }
 0x106   :  { %512 = vmatprep.subr.mxu1 %v4355_v30 }
 0x107   :  { %513 = vmatpush2.msra.mxu1 %v4361_v31 }
 0x108   :  { %514 = vmatprep.subr.mxu1 %v4367_v32 }
 0x109   :  { %515 = vmatpush2.msra.mxu1 %v4373_v33 }
 0x10a   :  { %516 = vmatprep.subr.mxu1 %v4379_v34 }
 0x10b   :  { %517 = vmatpush2.msra.mxu1 %v4385_v35 }
 0x10c   :  { %518 = vmatprep.subr.mxu1 %v4391_v36 }
 0x10d   :  { %519 = vmatpush2.msra.mxu1 %v4397_v37 }
 0x10e   :  { %520 = vmatprep.subr.mxu1 %v4403_v38 }
 0x10f   :  { %521 = vmatpush2.msra.mxu1 %v4409_v39 }
 0x110   :  { %522 = vmatprep.subr.mxu1 %v4471_v52 }
 0x111   :  { %523 = vmatpush2.msra.mxu1 %v4477_v53 }
 0x112   :  { %524 = vmatprep.subr.mxu1 %v4484_v54 }
 0x113   :  { %525 = vmatpush2.msra.mxu1 %v4491_v55 }
 0x114   :  { %526 = vmatprep.subr.mxu1 %v4498_v56 }
 0x115   :  { %527 = vmatpush2.msra.mxu1 %v4503_v57 }
 0x1a6   :  { %v376_v58 = vpop.f32.mrf.mxu1 }
 0x1a7   :  { %v381_v40 = vmax.f32 %v376_v58, 0.0  ;;  %v561_v58 = vld [vmem:[%s6123_s0 + $0x7c0] sm:$0xff] }
 0x1a8   :  { %v378_v59 = vpop.f32.mrf.mxu1 }
 0x1a9   :  { %v382_v60 = vmax.f32 %v378_v59, 0.0  ;;  %v560_v59 = vld [vmem:[%s6123_s0 + $0x7b0] sm:$0xff] }
 0x1ab   :  { %3115 = vmatprep.mubr.msk.f32.mxu0 %vm306_vm3, %v382_v60 }
 0x1ac   :  { %451 = vmatmul.mubr.f32.vlgmr.msra.gmra.mxu0 %v381_v40 }
 0x1ad   :  { %3400 = vmatprep.mubr.msk.f32.mxu0 %vm3939_vm0, %v6127_v1  ;;  %3369 = vmatpush3.msra.mxu0 %v564_v42  ;;  %v557_v42 = vld [vmem:[%s6123_s0 + $0x780] sm:$0xff] }
 0x1ae   :  { %3370 = vmatprep.subr.mxu0 %v6127_v1 }
 0x1af   :  { %3371 = vmatpush3.msra.mxu0 %v563_v43  ;;  %v556_v43 = vld [vmem:[%s6123_s0 + $0x770] sm:$0xff] }
 0x1b0   :  { %3372 = vmatprep.subr.mxu0 %v6127_v1 }
 0x1b1   :  { %3373 = vmatpush3.msra.mxu0 %v562_v44  ;;  %v555_v44 = vld [vmem:[%s6123_s0 + $0x760] sm:$0xff] }
 0x1b2   :  { %3374 = vmatprep.subr.mxu0 %v6127_v1 }
 0x1b3   :  { %3375 = vmatpush3.msra.mxu0 %v561_v58  ;;  %v550_v58 = vld [vmem:[%s6123_s0 + $0x710] sm:$0xff] }
 0x1b4   :  { %3376 = vmatprep.subr.mxu0 %v6127_v1 }
 0x1b5   :  { %3377 = vmatpush3.msra.mxu0 %v560_v59  ;;  %v549_v59 = vld [vmem:[%s6123_s0 + $0x700] sm:$0xff] }
 0x1b6   :  { %3378 = vmatprep.subr.mxu0 %v6127_v1 }
 0x26c   :  { %v452_v45 = vpop.f32.mrf.mxu0 }
 0x26d   :  { %v4526_v47 = vsub.f32 %v381_v40, %v452_v45  ;;  %v558_v40 = vld [vmem:[%s6123_s0 + $0x790] sm:$0xff] }
 0x26e   :  { %v454_v48 = vpop.f32.mrf.mxu0  ;;  %v554_v45 = vld [vmem:[%s6123_s0 + $0x750] sm:$0xff] }
 0x26f   :  { %v4528_v49 = vsub.f32 %v382_v60, %v454_v48  ;;  %v459_v51 = vmul.f32 %v4526_v47, %v4526_v47  ;;  %v559_v60 = vld [vmem:[%s6123_s0 + $0x7a0] sm:$0xff] }
 0x270   :  { %3379 = vmatpush3.msra.mxu0 %v559_v60  ;;  %v553_v48 = vld [vmem:[%s6123_s0 + $0x740] sm:$0xff]  ;;  %v747_v60 = vld [vmem:[%s6123_s0 + $0x978] sm:$0xff] }
 0x271   :  { %v460_v50 = vmul.f32 %v4528_v49, %v4528_v49  ;;  %3380 = vmatprep.subr.mxu0 %v6127_v1  ;;  %779 = vmatprep.subr.mxu1 %v747_v60  ;;  %v736_v60 = vld [vmem:[%s6123_s0 + $0x920] sm:$0xff] }
 0x272   :  { %3381 = vmatpush3.msra.mxu0 %v558_v40  ;;  %v746_v40 = vld [vmem:[%s6123_s0 + $0x970] sm:$0xff] }
 0x273   :  { %3116 = vmatprep.mubr.msk.f32.mxu1 %vm306_vm3, %v460_v50  ;;  %3382 = vmatprep.subr.mxu0 %v6127_v1  ;;  %v552_v50 = vld [vmem:[%s6123_s0 + $0x730] sm:$0xff] }
 0x274   :  { %529 = vmatmul.mubr.f32.vlgmr.msra.gmra.mxu1 %v459_v51  ;;  %3383 = vmatpush3.msra.mxu0 %v557_v42  ;;  %v551_v51 = vld [vmem:[%s6123_s0 + $0x720] sm:$0xff]  ;;  %v745_v42 = vld [vmem:[%s6123_s0 + $0x968] sm:$0xff] }
 0x275   :  { %3384 = vmatprep.subr.mxu0 %v6127_v1  ;;  %780 = vmatpush1.msra.mxu1 %v746_v40  ;;  %v735_v40 = vld [vmem:[%s6123_s0 + $0x918] sm:$0xff] }
 0x276   :  { %3385 = vmatpush3.msra.mxu0 %v556_v43  ;;  %v744_v43 = vld [vmem:[%s6123_s0 + $0x960] sm:$0xff]  ;;  %781 = vmatprep.subr.mxu1 %v745_v42  ;;  %v734_v42 = vld [vmem:[%s6123_s0 + $0x910] sm:$0xff] }
 0x277   :  { %3386 = vmatprep.subr.mxu0 %v6127_v1  ;;  %782 = vmatpush1.msra.mxu1 %v744_v43  ;;  %v733_v43 = vld [vmem:[%s6123_s0 + $0x908] sm:$0xff] }
 0x278   :  { %3387 = vmatpush3.msra.mxu0 %v555_v44  ;;  %v743_v44 = vld [vmem:[%s6123_s0 + $0x958] sm:$0xff] }
 0x279   :  { %3388 = vmatprep.subr.mxu0 %v6127_v1  ;;  %783 = vmatprep.subr.mxu1 %v743_v44  ;;  %v732_v44 = vld [vmem:[%s6123_s0 + $0x900] sm:$0xff] }
 0x27a   :  { %3389 = vmatpush3.msra.mxu0 %v554_v45  ;;  %v742_v45 = vld [vmem:[%s6123_s0 + $0x950] sm:$0xff] }
 0x27b   :  { %3390 = vmatprep.subr.mxu0 %v6127_v1  ;;  %784 = vmatpush1.msra.mxu1 %v742_v45  ;;  %v731_v45 = vld [vmem:[%s6123_s0 + $0x8f8] sm:$0xff] }
 0x27c   :  { %3391 = vmatpush3.msra.mxu0 %v553_v48  ;;  %v741_v48 = vld [vmem:[%s6123_s0 + $0x948] sm:$0xff] }
 0x27d   :  { %3392 = vmatprep.subr.mxu0 %v6127_v1  ;;  %785 = vmatprep.subr.mxu1 %v741_v48  ;;  %v730_v48 = vld [vmem:[%s6123_s0 + $0x8f0] sm:$0xff] }
 0x27e   :  { %3393 = vmatpush3.msra.mxu0 %v552_v50  ;;  %v740_v50 = vld [vmem:[%s6123_s0 + $0x940] sm:$0xff] }
 0x27f   :  { %3394 = vmatprep.subr.mxu0 %v6127_v1  ;;  %786 = vmatpush1.msra.mxu1 %v740_v50  ;;  %v729_v50 = vld [vmem:[%s6123_s0 + $0x8e8] sm:$0xff] }
 0x280   :  { %3395 = vmatpush3.msra.mxu0 %v551_v51  ;;  %v739_v51 = vld [vmem:[%s6123_s0 + $0x938] sm:$0xff] }
 0x281   :  { %3396 = vmatprep.subr.mxu0 %v6127_v1  ;;  %787 = vmatprep.subr.mxu1 %v739_v51  ;;  %v728_v51 = vld [vmem:[%s6123_s0 + $0x8e0] sm:$0xff] }
 0x282   :  { %3397 = vmatpush3.msra.mxu0 %v550_v58  ;;  %v738_v58 = vld [vmem:[%s6123_s0 + $0x930] sm:$0xff] }
 0x283   :  { %3398 = vmatprep.subr.mxu0 %v6127_v1  ;;  %788 = vmatpush1.msra.mxu1 %v738_v58  ;;  %v727_v58 = vld [vmem:[%s6123_s0 + $0x8d8] sm:$0xff] }
 0x284   :  { %3399 = vmatpush3.msra.mxu0 %v549_v59  ;;  %v737_v59 = vld [vmem:[%s6123_s0 + $0x928] sm:$0xff] }
 0x285   :  { %3403 = vmatprep.subr.mxu0 %v6127_v1  ;;  %789 = vmatprep.subr.mxu1 %v737_v59  ;;  %v726_v59 = vld [vmem:[%s6123_s0 + $0x8d0] sm:$0xff] }
 0x286   :  { %790 = vmatpush1.msra.mxu1 %v736_v60  ;;  %v725_v60 = vld [vmem:[%s6123_s0 + $0x8c8] sm:$0xff] }
 0x287   :  { %791 = vmatprep.subr.mxu1 %v735_v40 }
 0x288   :  { %792 = vmatpush1.msra.mxu1 %v734_v42 }
 0x289   :  { %793 = vmatprep.subr.mxu1 %v733_v43  ;;  %v539_v43 = vmax.f32 %v4419_v46, 1e-12  ;;  %v642_v46 = vld [vmem:[%s6123_s0 + $0x870] sm:$0xff] }
 0x28a   :  { %794 = vmatpush1.msra.mxu1 %v732_v44 }
 0x28b   :  { %795 = vmatprep.subr.mxu1 %v731_v45 }
 0x28c   :  { %796 = vmatpush1.msra.mxu1 %v730_v48 }
 0x28d   :  { %797 = vmatprep.subr.mxu1 %v729_v50 }
 0x28e   :  { %798 = vmatpush1.msra.mxu1 %v728_v51 }
 0x28f   :  { %799 = vmatprep.subr.mxu1 %v727_v58 }
 0x290   :  { %800 = vmatpush1.msra.mxu1 %v726_v59 }
 0x291   :  { %801 = vmatprep.subr.mxu1 %v725_v60  ;;  %v6149_v60 = vmov 0.0  }
 0x334   :  { %v530_v40 = vpop.f32.mrf.mxu1 }
 0x335   :  { %v531_v42 = vadd.f32 1e-05, %v530_v40  ;;  %v636_v40 = vld [vmem:[%s6123_s0 + $0x810] sm:$0xff] }
 0x336   :  { %v532_v45 = vpop.f32.mrf.mxu1 }
 0x337   :  { %3788 = vrsqrt.f32 %v531_v42  ;;  %v533_v51 = vadd.f32 1e-05, %v532_v45  ;;  %v6151_v45 = vld [vmem:[#allocation6_spill] sm:$0xff] }
 0x338   :  { %3790 = vrsqrt.f32 %v539_v43  ;;  %v635_v43 = vld [vmem:[%s6123_s0 + $0x800] sm:$0xff] }
 0x339   :  { %3792 = vrsqrt.f32 %v533_v51  ;;  %v722_v51 = vld [vmem:[%s6123_s0 + $0x8b0] sm:$0xff] }
 0x344   :  { %v3789_v44 = vpop.eup %3788 }
 0x345   :  { %v537_v48 = vmul.f32 %v3789_v44, %v4526_v47  ;;  %v3791_v50 = vpop.eup %3790  ;;  %v641_v47 = vld [vmem:[%s6123_s0 + $0x860] sm:$0xff] }
 0x346   :  { %v3793_v42 = vpop.eup %3792 }
 0x347   :  { %v541_v1 = vmul.f32 %v3791_v50, %v537_v48  ;;  %v538_v44 = vmul.f32 %v3793_v42, %v4528_v49  ;;  %v6150_v49 = vld [vmem:[#allocation5_spill] sm:$0xff]  ;;  %v723_v50 = vld [vmem:[%s6123_s0 + $0x8b8] sm:$0xff] }
 0x348   :  { %v724_v48 = vld [vmem:[%s6123_s0 + $0x8c0] sm:$0xff] }
 0x349   :  { %v544_v57 = vrot.slane %v541_v1, 6  ;;  %v542_v56 = vmul.f32 %v541_v1, %v4415_v41  ;;  %v640_v1 = vld [vmem:[%s6123_s0 + $0x850] sm:$0xff]  ;;  %802 = vmatpush1.msra.mxu1 %v724_v48  ;;  %v760_v42 = vld [vmem:[%s6123_s0 + $0x9e0] sm:$0xff]  ;;  %v757_v48 = vld [vmem:[%s6123_s0 + $0x9c8] sm:$0xff] }
 0x34a   :  { %803 = vmatprep.subr.mxu1 %v723_v50  ;;  %v756_v50 = vld [vmem:[%s6123_s0 + $0x9c0] sm:$0xff] }
 0x34b   :  { %v546_v58 = vmul.f32 %v544_v57, %v4415_v41  ;;  %v639_v41 = vld [vmem:[%s6123_s0 + $0x840] sm:$0xff]  ;;  %804 = vmatpush1.msra.mxu1 %v722_v51  ;;  %v755_v51 = vld [vmem:[%s6123_s0 + $0x9b8] sm:$0xff] }
 0x34c   :  { %v637_v57 = vld [vmem:[%s6123_s0 + $0x820] sm:$0xff] }
 0x34d   :  { %v548_v59 = vsel %vm547_vm6, %v542_v56, %v546_v58  ;;  %v638_v56 = vld [vmem:[%s6123_s0 + $0x830] sm:$0xff]  ;;  %v721_v58 = vld [vmem:[%s6123_s0 + $0x8a8] sm:$0xff] }
 0x34e   :  { %3401 = vmatmul.mubr.f32.vlgmr.msra.gmra.mxu0 %v548_v59  ;;  %805 = vmatprep.subr.mxu1 %v721_v58  ;;  %v719_v59 = vld [vmem:[%s6123_s0 + $0x898] sm:$0xff]  ;;  %v754_v58 = vld [vmem:[%s6123_s0 + $0x9b0] sm:$0xff] }
 0x34f   :  { %3404 = vmatpush3.msra.mxu0 %v642_v46  ;;  %3419 = vmatprep.mubr.msk.f32.mxu0 %vm3939_vm0, %v6149_v60  ;;  %v720_v46 = vld [vmem:[%s6123_s0 + $0x8a0] sm:$0xff] }
 0x350   :  { %3405 = vmatprep.subr.mxu0 %v6149_v60  ;;  %806 = vmatpush1.msra.mxu1 %v720_v46  ;;  %v753_v46 = vld [vmem:[%s6123_s0 + $0x9a8] sm:$0xff] }
 0x351   :  { %3406 = vmatpush3.msra.mxu0 %v641_v47  ;;  %807 = vmatprep.subr.mxu1 %v719_v59  ;;  %v718_v47 = vld [vmem:[%s6123_s0 + $0x890] sm:$0xff]  ;;  %v752_v59 = vld [vmem:[%s6123_s0 + $0x9a0] sm:$0xff] }
 0x352   :  { %3407 = vmatprep.subr.mxu0 %v6149_v60  ;;  %808 = vmatpush1.msra.mxu1 %v718_v47  ;;  %v751_v47 = vld [vmem:[%s6123_s0 + $0x998] sm:$0xff] }
 0x353   :  { %3408 = vmatpush3.msra.mxu0 %v640_v1  ;;  %v717_v1 = vld [vmem:[%s6123_s0 + $0x888] sm:$0xff] }
 0x354   :  { %3409 = vmatprep.subr.mxu0 %v6149_v60  ;;  %809 = vmatprep.subr.mxu1 %v717_v1  ;;  %v750_v1 = vld [vmem:[%s6123_s0 + $0x990] sm:$0xff] }
 0x355   :  { %3410 = vmatpush3.msra.mxu0 %v639_v41  ;;  %v716_v41 = vld [vmem:[%s6123_s0 + $0x880] sm:$0xff] }
 0x356   :  { %3411 = vmatprep.subr.mxu0 %v6149_v60  ;;  %810 = vmatpush1.msra.mxu1 %v716_v41  ;;  %v749_v41 = vld [vmem:[%s6123_s0 + $0x988] sm:$0xff] }
 0x357   :  { %3412 = vmatpush3.msra.mxu0 %v638_v56  ;;  %v763_v56 = vld [vmem:[%s6123_s0 + $0x9f8] sm:$0xff] }
 0x358   :  { %3413 = vmatprep.subr.mxu0 %v6149_v60  ;;  %827 = vmatprep.subr.mxu1 %v763_v56  ;;  %v748_v56 = vld [vmem:[%s6123_s0 + $0x980] sm:$0xff] }
 0x359   :  { %3414 = vmatpush3.msra.mxu0 %v637_v57  ;;  %v762_v57 = vld [vmem:[%s6123_s0 + $0x9f0] sm:$0xff] }
 0x35a   :  { %3415 = vmatprep.subr.mxu0 %v6149_v60  ;;  %828 = vmatpush2.msra.mxu1 %v762_v57 }
 0x35b   :  { %3416 = vmatpush3.msra.mxu0 %v636_v40  ;;  %v761_v40 = vld [vmem:[%s6123_s0 + $0x9e8] sm:$0xff] }
 0x35c   :  { %3417 = vmatprep.subr.mxu0 %v6149_v60  ;;  %829 = vmatprep.subr.mxu1 %v761_v40 }
 0x35d   :  { %3418 = vmatpush3.msra.mxu0 %v635_v43  ;;  %v759_v43 = vld [vmem:[%s6123_s0 + $0x9d8] sm:$0xff]  ;;  %830 = vmatpush2.msra.mxu1 %v760_v42 }
 0x35e   :  { %3420 = vmatmul.mubr.msk.f32.vlgmr.msra.gmra.mxu0 %vm306_vm3, %v538_v44  ;;  %855 = vmatprep.subr.mxu0 %v4164_v61  ;;  %v758_v44 = vld [vmem:[%s6123_s0 + $0x9d0] sm:$0xff] }
 0x35f   :  { %856 = vmatpush1.msra.mxu0 %v4169_v62  ;;  %831 = vmatprep.subr.mxu1 %v759_v43 }
 0x360   :  { %857 = vmatprep.subr.mxu0 %v4174_v63  ;;  %832 = vmatpush2.msra.mxu1 %v758_v44 }
 0x361   :  { %858 = vmatpush1.msra.mxu0 %v4180_v0  ;;  %833 = vmatprep.subr.mxu1 %v757_v48 }
 0x362   :  { %859 = vmatprep.subr.mxu0 %v4187_v2  ;;  %834 = vmatpush2.msra.mxu1 %v756_v50 }
 0x363   :  { %860 = vmatpush1.msra.mxu0 %v4193_v3  ;;  %835 = vmatprep.subr.mxu1 %v755_v51 }
 0x364   :  { %861 = vmatprep.subr.mxu0 %v4199_v4  ;;  %836 = vmatpush2.msra.mxu1 %v754_v58 }
 0x365   :  { %862 = vmatpush1.msra.mxu0 %v4205_v5  ;;  %837 = vmatprep.subr.mxu1 %v753_v46 }
 0x366   :  { %863 = vmatprep.subr.mxu0 %v4211_v6  ;;  %838 = vmatpush2.msra.mxu1 %v752_v59 }
 0x367   :  { %864 = vmatpush1.msra.mxu0 %v4217_v7  ;;  %839 = vmatprep.subr.mxu1 %v751_v47 }
 0x368   :  { %865 = vmatprep.subr.mxu0 %v4223_v8  ;;  %840 = vmatpush2.msra.mxu1 %v750_v1 }
 0x369   :  { %866 = vmatpush1.msra.mxu0 %v4229_v9  ;;  %841 = vmatprep.subr.mxu1 %v749_v41 }
 0x36a   :  { %867 = vmatprep.subr.mxu0 %v4235_v10  ;;  %842 = vmatpush2.msra.mxu1 %v748_v56 }
 0x36b   :  { %868 = vmatpush1.msra.mxu0 %v4241_v11  ;;  %933 = vmatprep.subr.mxu1 %v4164_v61 }
 0x36c   :  { %869 = vmatprep.subr.mxu0 %v4247_v12 }
 0x36d   :  { %870 = vmatpush1.msra.mxu0 %v4253_v13 }
 0x36e   :  { %871 = vmatprep.subr.mxu0 %v4259_v14 }
 0x36f   :  { %872 = vmatpush1.msra.mxu0 %v4265_v15 }
 0x370   :  { %873 = vmatprep.subr.mxu0 %v4271_v16 }
 0x371   :  { %874 = vmatpush1.msra.mxu0 %v4277_v17 }
 0x372   :  { %875 = vmatprep.subr.mxu0 %v4283_v18 }
 0x373   :  { %876 = vmatpush1.msra.mxu0 %v4289_v19 }
 0x374   :  { %877 = vmatprep.subr.mxu0 %v4295_v20 }
 0x375   :  { %878 = vmatpush1.msra.mxu0 %v4301_v21 }
 0x376   :  { %879 = vmatprep.subr.mxu0 %v4307_v22 }
 0x377   :  { %880 = vmatpush1.msra.mxu0 %v4313_v23 }
 0x378   :  { %881 = vmatprep.subr.mxu0 %v4319_v24 }
 0x379   :  { %882 = vmatpush1.msra.mxu0 %v4325_v25 }
 0x37a   :  { %883 = vmatprep.subr.mxu0 %v4331_v26 }
 0x37b   :  { %884 = vmatpush1.msra.mxu0 %v4337_v27 }
 0x37c   :  { %885 = vmatprep.subr.mxu0 %v4343_v28 }
 0x37d   :  { %886 = vmatpush1.msra.mxu0 %v4349_v29 }
 0x37e   :  { %903 = vmatprep.subr.mxu0 %v4355_v30 }
 0x37f   :  { %904 = vmatpush2.msra.mxu0 %v4361_v31 }
 0x380   :  { %905 = vmatprep.subr.mxu0 %v4367_v32 }
 0x381   :  { %906 = vmatpush2.msra.mxu0 %v4373_v33 }
 0x382   :  { %907 = vmatprep.subr.mxu0 %v4379_v34 }
 0x383   :  { %908 = vmatpush2.msra.mxu0 %v4385_v35 }
 0x384   :  { %909 = vmatprep.subr.mxu0 %v4391_v36 }
 0x385   :  { %910 = vmatpush2.msra.mxu0 %v4397_v37 }
 0x386   :  { %911 = vmatprep.subr.mxu0 %v4403_v38 }
 0x387   :  { %912 = vmatpush2.msra.mxu0 %v4409_v39 }
 0x388   :  { %913 = vmatprep.subr.mxu0 %v4471_v52 }
 0x389   :  { %914 = vmatpush2.msra.mxu0 %v4477_v53 }
 0x38a   :  { %915 = vmatprep.subr.mxu0 %v4484_v54 }
 0x38b   :  { %916 = vmatpush2.msra.mxu0 %v4491_v55 }
 0x38c   :  { %917 = vmatprep.subr.mxu0 %v6150_v49 }
 0x38d   :  { %918 = vmatpush2.msra.mxu0 %v6151_v45 }
 0x38e   :  { %3422 = vmatprep.subr.mxu0 %v6149_v60 }
 0x40e   :  { %v4821_v57 = vpop.f32.mrf.mxu0 }
 0x40f   :  { %v764_v40 = vmul.f32 %v4821_v57, %v4821_v57 }
 0x410   :  { %v3402_v42 = vpop.f32.mrf.mxu0 }
 0x411   :  { %v766_v43 = vrot.slane %v764_v40, 2 }
 0x413   :  { %v4825_v44 = vadd.f32 %v766_v43, %v764_v40 }
 0x415   :  { %3794 = vrsqrt.f32 %v4825_v44  ;;  %vm771_vm7 = vcmp.eq.f32.partialorder %v4825_v44, inf  ;;  %v774_v61 = vand.u32 2147483648, %v4825_v44  ;;  %vm773_vm8 = vcmp.eq.f32.partialorder %v4825_v44, 0.0 }
 0x41e   :  { %v712_v48 = vpop.f32.mrf.mxu0 }
 0x41f   :  { %3118 = vmatprep.mubr.msk.f32.mxu1 %vm306_vm3, %v712_v48 }
 0x420   :  { %v3421_v50 = vpop.f32.mrf.mxu0 }
 0x422   :  { %v3795_v51 = vpop.eup %3794 }
 0x423   :  { %v770_v58 = vmul.f32 %v3795_v51, %v4825_v44 }
 0x425   :  { %v772_v46 = vsel %vm771_vm7, %v4825_v44, %v770_v58  ;;  %vm2533_vm7 = vcmask 58368  }
 0x426   :  { %v775_v59 = vsel %vm773_vm8, %v774_v61, %v772_v46 }
 0x427   :  { %844 = vmatmul.mubr.f32.vlgmr.msra.gmra.mxu1 %v775_v59 }
 0x428   :  { %934 = vmatpush1.msra.mxu1 %v4169_v62 }
 0x429   :  { %935 = vmatprep.subr.mxu1 %v4174_v63 }
 0x42a   :  { %936 = vmatpush1.msra.mxu1 %v4180_v0 }
 0x42b   :  { %937 = vmatprep.subr.mxu1 %v4187_v2 }
 0x42c   :  { %938 = vmatpush1.msra.mxu1 %v4193_v3 }
 0x42d   :  { %939 = vmatprep.subr.mxu1 %v4199_v4 }
 0x42e   :  { %940 = vmatpush1.msra.mxu1 %v4205_v5 }
 0x42f   :  { %941 = vmatprep.subr.mxu1 %v4211_v6 }
 0x430   :  { %942 = vmatpush1.msra.mxu1 %v4217_v7 }
 0x431   :  { %943 = vmatprep.subr.mxu1 %v4223_v8 }
 0x432   :  { %944 = vmatpush1.msra.mxu1 %v4229_v9  ;;  %v4899_v9 = vld [vmem:[%s6123_s0 + $0x510] sm:$0xff] }
 0x433   :  { %945 = vmatprep.subr.mxu1 %v4235_v10  ;;  %v4906_v10 = vld [vmem:[%s6123_s0 + $0x500] sm:$0xff] }
 0x434   :  { %946 = vmatpush1.msra.mxu1 %v4241_v11  ;;  %v4913_v11 = vld [vmem:[%s6123_s0 + $0x4f0] sm:$0xff] }
 0x435   :  { %947 = vmatprep.subr.mxu1 %v4247_v12  ;;  %v4920_v12 = vld [vmem:[%s6123_s0 + $0x4e0] sm:$0xff] }
 0x436   :  { %948 = vmatpush1.msra.mxu1 %v4253_v13  ;;  %v4927_v13 = vld [vmem:[%s6123_s0 + $0x4d0] sm:$0xff] }
 0x437   :  { %949 = vmatprep.subr.mxu1 %v4259_v14  ;;  %v4934_v14 = vld [vmem:[%s6123_s0 + $0x4c0] sm:$0xff] }
 0x438   :  { %950 = vmatpush1.msra.mxu1 %v4265_v15  ;;  %6152 = vst [vmem:[#allocation5_spill] sm:$0xff] %v4934_v14  ;;  %v4941_v15 = vld [vmem:[%s6123_s0 + $0x4b0] sm:$0xff] }
 0x439   :  { %951 = vmatprep.subr.mxu1 %v4271_v16  ;;  %6153 = vst [vmem:[#allocation6_spill] sm:$0xff] %v4941_v15  ;;  %v4947_v16 = vld [vmem:[%s6123_s0 + $0x490] sm:$0xff] }
 0x43a   :  { %952 = vmatpush1.msra.mxu1 %v4277_v17  ;;  %v4954_v17 = vld [vmem:[%s6123_s0 + $0x4a0] sm:$0xff] }
 0x43b   :  { %953 = vmatprep.subr.mxu1 %v4283_v18  ;;  %6154 = vst [vmem:[#allocation7_spill] sm:$0xff] %v4954_v17  ;;  %v4961_v18 = vld [vmem:[%s6123_s0 + $0x480] sm:$0xff] }
 0x43c   :  { %954 = vmatpush1.msra.mxu1 %v4289_v19  ;;  %v4969_v19 = vld [vmem:[%s6123_s0 + $0x470] sm:$0xff] }
 0x43d   :  { %955 = vmatprep.subr.mxu1 %v4295_v20  ;;  %v4976_v20 = vld [vmem:[%s6123_s0 + $0x460] sm:$0xff] }
 0x43e   :  { %956 = vmatpush1.msra.mxu1 %v4301_v21  ;;  %v4983_v21 = vld [vmem:[%s6123_s0 + $0x450] sm:$0xff] }
 0x43f   :  { %957 = vmatprep.subr.mxu1 %v4307_v22  ;;  %v4990_v22 = vld [vmem:[%s6123_s0 + $0x440] sm:$0xff] }
 0x440   :  { %958 = vmatpush1.msra.mxu1 %v4313_v23  ;;  %6155 = vst [vmem:[#allocation8_spill] sm:$0xff] %v4990_v22  ;;  %v4996_v23 = vld [vmem:[%s6123_s0 + $0x430] sm:$0xff] }
 0x441   :  { %959 = vmatprep.subr.mxu1 %v4319_v24  ;;  %6156 = vst [vmem:[#allocation9_spill] sm:$0xff] %v4996_v23  ;;  %v5002_v24 = vld [vmem:[%s6123_s0 + $0x420] sm:$0xff] }
 0x442   :  { %960 = vmatpush1.msra.mxu1 %v4325_v25  ;;  %6157 = vst [vmem:[#allocation10_spill] sm:$0xff] %v5002_v24  ;;  %v5009_v25 = vld [vmem:[%s6123_s0 + $0x410] sm:$0xff] }
 0x443   :  { %961 = vmatprep.subr.mxu1 %v4331_v26  ;;  %6158 = vst [vmem:[#allocation11_spill] sm:$0xff] %v5009_v25  ;;  %v5016_v26 = vld [vmem:[%s6123_s0 + $0x400] sm:$0xff] }
 0x444   :  { %962 = vmatpush1.msra.mxu1 %v4337_v27  ;;  %6159 = vst [vmem:[#allocation12_spill] sm:$0xff] %v5016_v26  ;;  %v5023_v27 = vld [vmem:[%s6123_s0 + $0x3f0] sm:$0xff] }
 0x445   :  { %963 = vmatprep.subr.mxu1 %v4343_v28  ;;  %6160 = vst [vmem:[#allocation13_spill] sm:$0xff] %v5023_v27  ;;  %v5030_v28 = vld [vmem:[%s6123_s0 + $0x3e0] sm:$0xff] }
 0x446   :  { %964 = vmatpush1.msra.mxu1 %v4349_v29  ;;  %6161 = vst [vmem:[#allocation14_spill] sm:$0xff] %v5030_v28  ;;  %v5037_v29 = vld [vmem:[%s6123_s0 + $0x3d0] sm:$0xff] }
 0x447   :  { %981 = vmatprep.subr.mxu1 %v4355_v30  ;;  %6162 = vst [vmem:[#allocation15_spill] sm:$0xff] %v5037_v29  ;;  %v5044_v30 = vld [vmem:[%s6123_s0 + $0x3c0] sm:$0xff] }
 0x448   :  { %982 = vmatpush2.msra.mxu1 %v4361_v31  ;;  %6163 = vst [vmem:[#allocation16_spill] sm:$0xff] %v5044_v30  ;;  %v5051_v31 = vld [vmem:[%s6123_s0 + $0x3b0] sm:$0xff] }
 0x449   :  { %983 = vmatprep.subr.mxu1 %v4367_v32  ;;  %6164 = vst [vmem:[#allocation17_spill] sm:$0xff] %v5051_v31  ;;  %v5058_v32 = vld [vmem:[%s6123_s0 + $0x3a0] sm:$0xff] }
 0x44a   :  { %984 = vmatpush2.msra.mxu1 %v4373_v33  ;;  %6165 = vst [vmem:[#allocation18_spill] sm:$0xff] %v5058_v32  ;;  %v1008_v33 = vmax.f32 %v4825_v44, 1e-12 }
 0x44b   :  { %985 = vmatprep.subr.mxu1 %v4379_v34 }
 0x44c   :  { %986 = vmatpush2.msra.mxu1 %v4385_v35 }
 0x44d   :  { %987 = vmatprep.subr.mxu1 %v4391_v36 }
 0x44e   :  { %988 = vmatpush2.msra.mxu1 %v4397_v37 }
 0x44f   :  { %989 = vmatprep.subr.mxu1 %v4403_v38 }
 0x450   :  { %990 = vmatpush2.msra.mxu1 %v4409_v39 }
 0x451   :  { %991 = vmatprep.subr.mxu1 %v4471_v52 }
 0x452   :  { %992 = vmatpush2.msra.mxu1 %v4477_v53 }
 0x453   :  { %993 = vmatprep.subr.mxu1 %v4484_v54 }
 0x454   :  { %994 = vmatpush2.msra.mxu1 %v4491_v55 }
 0x455   :  { %995 = vmatprep.subr.mxu1 %v6150_v49 }
 0x456   :  { %996 = vmatpush2.msra.mxu1 %v6151_v45 }
 0x457   :  { %3492 = vmatprep.subr.mxu1 %v6149_v60 }
 0x4e7   :  { %v845_v62 = vpop.f32.mrf.mxu1 }
 0x4e8   :  { %v850_v2 = vmax.f32 %v845_v62, 0.0 }
 0x4e9   :  { %v847_v63 = vpop.f32.mrf.mxu1 }
 0x4ea   :  { %v851_v0 = vmax.f32 %v847_v63, 0.0 }
 0x4ec   :  { %3119 = vmatprep.mubr.msk.f32.mxu0 %vm306_vm3, %v851_v0 }
 0x4ed   :  { %920 = vmatmul.mubr.f32.vlgmr.msra.gmra.mxu0 %v850_v2 }
 0x4ee   :  { %3454 = vmatprep.mubr.msk.f32.mxu0 %vm3939_vm0, %v6149_v60  ;;  %3423 = vmatpush3.msra.mxu0 %v4947_v16 }
 0x4ef   :  { %3424 = vmatprep.subr.mxu0 %v6149_v60 }
 0x4f0   :  { %3425 = vmatpush3.msra.mxu0 %v4961_v18 }
 0x4f1   :  { %3426 = vmatprep.subr.mxu0 %v6149_v60 }
 0x4f2   :  { %3427 = vmatpush3.msra.mxu0 %v4969_v19 }
 0x4f3   :  { %3428 = vmatprep.subr.mxu0 %v6149_v60 }
 0x4f4   :  { %3429 = vmatpush3.msra.mxu0 %v4976_v20 }
 0x4f5   :  { %3430 = vmatprep.subr.mxu0 %v6149_v60 }
 0x4f6   :  { %3431 = vmatpush3.msra.mxu0 %v4983_v21 }
 0x4f7   :  { %3432 = vmatprep.subr.mxu0 %v6149_v60 }
 0x4f8   :  { %3433 = vmatpush3.msra.mxu0 %v4990_v22 }
 0x4f9   :  { %3434 = vmatprep.subr.mxu0 %v6149_v60 }
 0x4fa   :  { %3435 = vmatpush3.msra.mxu0 %v4996_v23 }
 0x4fb   :  { %3436 = vmatprep.subr.mxu0 %v6149_v60 }
 0x4fc   :  { %3437 = vmatpush3.msra.mxu0 %v5002_v24 }
 0x4fd   :  { %3438 = vmatprep.subr.mxu0 %v6149_v60 }
 0x4fe   :  { %3439 = vmatpush3.msra.mxu0 %v5009_v25 }
 0x4ff   :  { %3440 = vmatprep.subr.mxu0 %v6149_v60 }
 0x500   :  { %3441 = vmatpush3.msra.mxu0 %v5016_v26 }
 0x501   :  { %3442 = vmatprep.subr.mxu0 %v6149_v60 }
 0x502   :  { %3443 = vmatpush3.msra.mxu0 %v5023_v27 }
 0x503   :  { %3444 = vmatprep.subr.mxu0 %v6149_v60 }
 0x504   :  { %3445 = vmatpush3.msra.mxu0 %v5030_v28 }
 0x505   :  { %3446 = vmatprep.subr.mxu0 %v6149_v60 }
 0x506   :  { %3447 = vmatpush3.msra.mxu0 %v5037_v29 }
 0x507   :  { %3448 = vmatprep.subr.mxu0 %v6149_v60 }
 0x508   :  { %3449 = vmatpush3.msra.mxu0 %v5044_v30 }
 0x509   :  { %3450 = vmatprep.subr.mxu0 %v6149_v60 }
 0x50a   :  { %3451 = vmatpush3.msra.mxu0 %v5051_v31 }
 0x50b   :  { %3452 = vmatprep.subr.mxu0 %v6149_v60 }
 0x50c   :  { %3453 = vmatpush3.msra.mxu0 %v5058_v32 }
 0x50d   :  { %3457 = vmatprep.subr.mxu0 %v6149_v60 }
 0x5ad   :  { %v921_v3 = vpop.f32.mrf.mxu0 }
 0x5ae   :  { %v4885_v4 = vsub.f32 %v850_v2, %v921_v3  ;;  %v1424_v2 = vld [vmem:[%s6123_s0 + $0xb60] sm:$0xff]  ;;  %v1423_v3 = vld [vmem:[%s6123_s0 + $0xb50] sm:$0xff] }
 0x5af   :  { %v923_v5 = vpop.f32.mrf.mxu0 }
 0x5b0   :  { %v4887_v6 = vsub.f32 %v851_v0, %v923_v5  ;;  %v928_v8 = vmul.f32 %v4885_v4, %v4885_v4  ;;  %v1425_v0 = vld [vmem:[%s6123_s0 + $0xb70] sm:$0xff] }
 0x5b1   :  { %v1421_v5 = vld [vmem:[%s6123_s0 + $0xb30] sm:$0xff] }
 0x5b2   :  { %v929_v7 = vmul.f32 %v4887_v6, %v4887_v6 }
 0x5b4   :  { %3120 = vmatprep.mubr.msk.f32.mxu1 %vm306_vm3, %v929_v7  ;;  %v1419_v7 = vld [vmem:[%s6123_s0 + $0xb10] sm:$0xff] }
 0x5b5   :  { %998 = vmatmul.mubr.f32.vlgmr.msra.gmra.mxu1 %v928_v8  ;;  %v1418_v8 = vld [vmem:[%s6123_s0 + $0xb00] sm:$0xff] }
 0x5b6   :  { %3508 = vmatprep.mubr.msk.f32.mxu1 %vm3939_vm0, %v6149_v60  ;;  %3493 = vmatpush3.msra.mxu1 %v4899_v9 }
 0x5b7   :  { %3494 = vmatprep.subr.mxu1 %v6149_v60 }
 0x5b8   :  { %3495 = vmatpush3.msra.mxu1 %v4906_v10 }
 0x5b9   :  { %3496 = vmatprep.subr.mxu1 %v6149_v60 }
 0x5ba   :  { %3497 = vmatpush3.msra.mxu1 %v4913_v11 }
 0x5bb   :  { %3498 = vmatprep.subr.mxu1 %v6149_v60 }
 0x5bc   :  { %3499 = vmatpush3.msra.mxu1 %v4920_v12 }
 0x5bd   :  { %3500 = vmatprep.subr.mxu1 %v6149_v60 }
 0x5be   :  { %3501 = vmatpush3.msra.mxu1 %v4927_v13 }
 0x5bf   :  { %3502 = vmatprep.subr.mxu1 %v6149_v60 }
 0x5c0   :  { %3503 = vmatpush3.msra.mxu1 %v4934_v14 }
 0x5c1   :  { %3504 = vmatprep.subr.mxu1 %v6149_v60 }
 0x5c2   :  { %3505 = vmatpush3.msra.mxu1 %v4941_v15 }
 0x5c3   :  { %3506 = vmatprep.subr.mxu1 %v6149_v60 }
 0x5c4   :  { %3507 = vmatpush3.msra.mxu1 %v4954_v17 }
 0x5c5   :  { %3511 = vmatprep.subr.mxu1 %v6149_v60 }
 0x675   :  { %v999_v34 = vpop.f32.mrf.mxu1 }
 0x676   :  { %v1000_v35 = vadd.f32 1e-05, %v999_v34  ;;  %v1341_v34 = vld [vmem:[%s6123_s0 + $0xa90] sm:$0xff] }
 0x677   :  { %v1001_v36 = vpop.f32.mrf.mxu1 }
 0x678   :  { %3796 = vrsqrt.f32 %v1000_v35  ;;  %v1002_v37 = vadd.f32 1e-05, %v1001_v36  ;;  %v1340_v35 = vld [vmem:[%s6123_s0 + $0xa80] sm:$0xff]  ;;  %v1339_v36 = vld [vmem:[%s6123_s0 + $0xa70] sm:$0xff] }
 0x679   :  { %3798 = vrsqrt.f32 %v1008_v33  ;;  %v1342_v33 = vld [vmem:[%s6123_s0 + $0xaa0] sm:$0xff] }
 0x67a   :  { %3800 = vrsqrt.f32 %v1002_v37  ;;  %v1338_v37 = vld [vmem:[%s6123_s0 + $0xa60] sm:$0xff] }
 0x685   :  { %v3797_v38 = vpop.eup %3796 }
 0x686   :  { %v3799_v39 = vpop.eup %3798  ;;  %v1006_v52 = vmul.f32 %v3797_v38, %v4885_v4  ;;  %v1422_v4 = vld [vmem:[%s6123_s0 + $0xb40] sm:$0xff]  ;;  %v1337_v38 = vld [vmem:[%s6123_s0 + $0xa50] sm:$0xff] }
 0x687   :  { %v3801_v53 = vpop.eup %3800 }
 0x688   :  { %v1010_v54 = vmul.f32 %v3799_v39, %v1006_v52  ;;  %v5067_v55 = vmul.f32 %v3801_v53, %v4887_v6  ;;  %v1420_v6 = vld [vmem:[%s6123_s0 + $0xb20] sm:$0xff]  ;;  %v1335_v52 = vld [vmem:[%s6123_s0 + $0xa30] sm:$0xff] }
 0x689   :  { %v1336_v39 = vld [vmem:[%s6123_s0 + $0xa40] sm:$0xff] }
 0x68a   :  { %v1013_v49 = vrot.slane %v1010_v54, 6  ;;  %3509 = vmatmul.mubr.msk.f32.vlgmr.msra.gmra.mxu1 %vm306_vm3, %v5067_v55  ;;  %v1011_v45 = vmul.f32 %v1010_v54, %v4821_v57  ;;  %v1334_v53 = vld [vmem:[%s6123_s0 + $0xa20] sm:$0xff]  ;;  %v1333_v54 = vld [vmem:[%s6123_s0 + $0xa10] sm:$0xff] }
 0x68b   :  { %3512 = vmatpush3.msra.mxu1 %v4899_v9  ;;  %3527 = vmatprep.mubr.msk.f32.mxu1 %vm3939_vm0, %v6149_v60  ;;  %v1347_v9 = vld [vmem:[%s6123_s0 + $0xaf0] sm:$0xff] }
 0x68c   :  { %v1015_v47 = vmul.f32 %v1013_v49, %v4821_v57  ;;  %3513 = vmatprep.subr.mxu1 %v6149_v60  ;;  %v5249_v49 = vld [vmem:[%s6123_s0 + $0x318] sm:$0xff] }
 0x68d   :  { %3514 = vmatpush3.msra.mxu1 %v4906_v10  ;;  %v1346_v10 = vld [vmem:[%s6123_s0 + $0xae0] sm:$0xff] }
 0x68e   :  { %v5079_v1 = vsel %vm547_vm6, %v1011_v45, %v1015_v47  ;;  %3515 = vmatprep.subr.mxu1 %v6149_v60 }
 0x68f   :  { %v1017_v41 = vmul.f32 %v5079_v1, %v5079_v1  ;;  %3516 = vmatpush3.msra.mxu1 %v4913_v11  ;;  %v1345_v11 = vld [vmem:[%s6123_s0 + $0xad0] sm:$0xff] }
 0x690   :  { %3517 = vmatprep.subr.mxu1 %v6149_v60 }
 0x691   :  { %v1019_v56 = vrot.slane %v1017_v41, 2  ;;  %3518 = vmatpush3.msra.mxu1 %v4920_v12  ;;  %v1344_v12 = vld [vmem:[%s6123_s0 + $0xac0] sm:$0xff] }
 0x692   :  { %3519 = vmatprep.subr.mxu1 %v6149_v60 }
 0x693   :  { %v5088_v57 = vadd.f32 %v1019_v56, %v1017_v41  ;;  %3520 = vmatpush3.msra.mxu1 %v4927_v13  ;;  %v1343_v13 = vld [vmem:[%s6123_s0 + $0xab0] sm:$0xff] }
 0x694   :  { %3521 = vmatprep.subr.mxu1 %v6149_v60 }
 0x695   :  { %3802 = vrsqrt.f32 %v5088_v57  ;;  %3522 = vmatpush3.msra.mxu1 %v4934_v14  ;;  %vm1024_vm9 = vcmp.eq.f32.partialorder %v5088_v57, inf  ;;  %v1027_v43 = vand.u32 2147483648, %v5088_v57  ;;  %vm1026_vm10 = vcmp.eq.f32.partialorder %v5088_v57, 0.0  ;;  %v1516_v14 = vld [vmem:[%s6123_s0 + $0xc08] sm:$0xff] }
 0x696   :  { %3523 = vmatprep.subr.mxu1 %v6149_v60 }
 0x697   :  { %3524 = vmatpush3.msra.mxu1 %v4941_v15  ;;  %v1517_v15 = vld [vmem:[%s6123_s0 + $0xc10] sm:$0xff] }
 0x698   :  { %3525 = vmatprep.subr.mxu1 %v6149_v60 }
 0x699   :  { %3526 = vmatpush3.msra.mxu1 %v4954_v17  ;;  %v1518_v17 = vld [vmem:[%s6123_s0 + $0xc18] sm:$0xff] }
 0x69a   :  { %3565 = vmatprep.subr.mxu1 %v6149_v60 }
 0x6a2   :  { %v3803_v40 = vpop.eup %3802 }
 0x6a3   :  { %v1023_v42 = vmul.f32 %v3803_v40, %v5088_v57 }
 0x6a5   :  { %v1025_v44 = vsel %vm1024_vm9, %v5088_v57, %v1023_v42  ;;  %vm2798_vm9 = vcmask 7168  }
 0x6a6   :  { %v1028_v48 = vsel %vm1026_vm10, %v1027_v43, %v1025_v44  ;;  %v1173_v44 = vmax.f32 %v5088_v57, 1e-12  ;;  %v5262_v57 = vld [vmem:[%s6123_s0 + $0x310] sm:$0xff]  ;;  %vm2800_vm10 = vcmask 15360  }
 0x6a7   :  { %3455 = vmatmul.mubr.f32.vlgmr.msra.gmra.mxu0 %v1028_v48 }
 0x6a8   :  { %3458 = vmatpush3.msra.mxu0 %v4947_v16  ;;  %3489 = vmatprep.mubr.msk.f32.mxu0 %vm3939_vm0, %v6149_v60 }
 0x6a9   :  { %3459 = vmatprep.subr.mxu0 %v6149_v60 }
 0x6aa   :  { %3460 = vmatpush3.msra.mxu0 %v4961_v18 }
 0x6ab   :  { %3461 = vmatprep.subr.mxu0 %v6149_v60 }
 0x6ac   :  { %3462 = vmatpush3.msra.mxu0 %v4969_v19 }
 0x6ad   :  { %3463 = vmatprep.subr.mxu0 %v6149_v60 }
 0x6ae   :  { %3464 = vmatpush3.msra.mxu0 %v4976_v20 }
 0x6af   :  { %3465 = vmatprep.subr.mxu0 %v6149_v60 }
 0x6b0   :  { %3466 = vmatpush3.msra.mxu0 %v4983_v21 }
 0x6b1   :  { %3467 = vmatprep.subr.mxu0 %v6149_v60 }
 0x6b2   :  { %3468 = vmatpush3.msra.mxu0 %v4990_v22 }
 0x6b3   :  { %3469 = vmatprep.subr.mxu0 %v6149_v60 }
 0x6b4   :  { %3470 = vmatpush3.msra.mxu0 %v4996_v23 }
 0x6b5   :  { %3471 = vmatprep.subr.mxu0 %v6149_v60 }
 0x6b6   :  { %3472 = vmatpush3.msra.mxu0 %v5002_v24 }
 0x6b7   :  { %3473 = vmatprep.subr.mxu0 %v6149_v60 }
 0x6b8   :  { %3474 = vmatpush3.msra.mxu0 %v5009_v25  ;;  %v1540_v25 = vld [vmem:[%s6123_s0 + $0xcc8] sm:$0xff] }
 0x6b9   :  { %3475 = vmatprep.subr.mxu0 %v6149_v60 }
 0x6ba   :  { %3476 = vmatpush3.msra.mxu0 %v5016_v26  ;;  %v1508_v26 = vld [vmem:[%s6123_s0 + $0xbc8] sm:$0xff] }
 0x6bb   :  { %3477 = vmatprep.subr.mxu0 %v6149_v60 }
 0x6bc   :  { %3478 = vmatpush3.msra.mxu0 %v5023_v27  ;;  %v1510_v27 = vld [vmem:[%s6123_s0 + $0xbd8] sm:$0xff] }
 0x6bd   :  { %3479 = vmatprep.subr.mxu0 %v6149_v60 }
 0x6be   :  { %3480 = vmatpush3.msra.mxu0 %v5030_v28  ;;  %v1511_v28 = vld [vmem:[%s6123_s0 + $0xbe0] sm:$0xff] }
 0x6bf   :  { %3481 = vmatprep.subr.mxu0 %v6149_v60 }
 0x6c0   :  { %3482 = vmatpush3.msra.mxu0 %v5037_v29  ;;  %v1512_v29 = vld [vmem:[%s6123_s0 + $0xbe8] sm:$0xff] }
 0x6c1   :  { %3483 = vmatprep.subr.mxu0 %v6149_v60 }
 0x6c2   :  { %3484 = vmatpush3.msra.mxu0 %v5044_v30  ;;  %v1513_v30 = vld [vmem:[%s6123_s0 + $0xbf0] sm:$0xff] }
 0x6c3   :  { %3485 = vmatprep.subr.mxu0 %v6149_v60 }
 0x6c4   :  { %3486 = vmatpush3.msra.mxu0 %v5051_v31  ;;  %v1514_v31 = vld [vmem:[%s6123_s0 + $0xbf8] sm:$0xff] }
 0x6c5   :  { %3487 = vmatprep.subr.mxu0 %v6149_v60 }
 0x6c6   :  { %3488 = vmatpush3.msra.mxu0 %v5058_v32  ;;  %v1515_v32 = vld [vmem:[%s6123_s0 + $0xc00] sm:$0xff] }
 0x6c7   :  { %3530 = vmatprep.subr.mxu0 %v6149_v60 }
 0x74a   :  { %v1251_v50 = vpop.f32.mrf.mxu1 }
 0x74b   :  { %v5139_v51 = vsub.f32 %v5067_v55, %v1251_v50  ;;  %v1332_v55 = vld [vmem:[%s6123_s0 + $0xa00] sm:$0xff] }
 0x74c   :  { %v3510_v58 = vpop.f32.mrf.mxu1 }
 0x74d   :  { %v1256_v61 = vmul.f32 %v5139_v51, %v5139_v51 }
 0x74f   :  { %3528 = vmatmul.mubr.msk.f32.vlgmr.msra.gmra.mxu1 %vm306_vm3, %v1256_v61 }
 0x750   :  { %3581 = vmatprep.mubr.msk.f32.mxu1 %vm3939_vm0, %v6149_v60  ;;  %3566 = vmatpush3.msra.mxu1 %v1425_v0 }
 0x751   :  { %3567 = vmatprep.subr.mxu1 %v6149_v60 }
 0x752   :  { %3568 = vmatpush3.msra.mxu1 %v1424_v2  ;;  %v5280_v2 = vld [vmem:[%s6123_s0 + $0x2f8] sm:$0xff] }
 0x753   :  { %3569 = vmatprep.subr.mxu1 %v6149_v60 }
 0x754   :  { %3570 = vmatpush3.msra.mxu1 %v1423_v3  ;;  %v5286_v3 = vld [vmem:[%s6123_s0 + $0x2f0] sm:$0xff] }
 0x755   :  { %3571 = vmatprep.subr.mxu1 %v6149_v60 }
 0x756   :  { %3572 = vmatpush3.msra.mxu1 %v1422_v4  ;;  %v5292_v4 = vld [vmem:[%s6123_s0 + $0x2e8] sm:$0xff] }
 0x757   :  { %3573 = vmatprep.subr.mxu1 %v6149_v60 }
 0x758   :  { %3574 = vmatpush3.msra.mxu1 %v1421_v5  ;;  %v5298_v5 = vld [vmem:[%s6123_s0 + $0x2e0] sm:$0xff] }
 0x759   :  { %3575 = vmatprep.subr.mxu1 %v6149_v60 }
 0x75a   :  { %3576 = vmatpush3.msra.mxu1 %v1420_v6  ;;  %v5304_v6 = vld [vmem:[%s6123_s0 + $0x2d8] sm:$0xff] }
 0x75b   :  { %3577 = vmatprep.subr.mxu1 %v6149_v60 }
 0x75c   :  { %3578 = vmatpush3.msra.mxu1 %v1419_v7  ;;  %v5310_v7 = vld [vmem:[%s6123_s0 + $0x2d0] sm:$0xff] }
 0x75d   :  { %3579 = vmatprep.subr.mxu1 %v6149_v60 }
 0x75e   :  { %3580 = vmatpush3.msra.mxu1 %v1418_v8  ;;  %v5316_v8 = vld [vmem:[%s6123_s0 + $0x2c8] sm:$0xff] }
 0x767   :  { %v1095_v46 = vpop.f32.mrf.mxu0 }
 0x768   :  { %v5146_v59 = vsub.f32 %v1028_v48, %v1095_v46 }
 0x769   :  { %v3456_v62 = vpop.f32.mrf.mxu0 }
 0x76a   :  { %v1100_v63 = vmul.f32 %v5146_v59, %v5146_v59 }
 0x76c   :  { %3490 = vmatmul.mubr.f32.vlgmr.msra.gmra.mxu0 %v1100_v63 }
 0x76d   :  { %3562 = vmatprep.mubr.msk.f32.mxu0 %vm3939_vm0, %v6149_v60  ;;  %3531 = vmatpush3.msra.mxu0 %v1347_v9  ;;  %v5322_v9 = vld [vmem:[%s6123_s0 + $0x2c0] sm:$0xff] }
 0x76e   :  { %3532 = vmatprep.subr.mxu0 %v6149_v60 }
 0x76f   :  { %3533 = vmatpush3.msra.mxu0 %v1346_v10  ;;  %v5328_v10 = vld [vmem:[%s6123_s0 + $0x2b8] sm:$0xff] }
 0x770   :  { %3534 = vmatprep.subr.mxu0 %v6149_v60 }
 0x771   :  { %3535 = vmatpush3.msra.mxu0 %v1345_v11  ;;  %v5334_v11 = vld [vmem:[%s6123_s0 + $0x2b0] sm:$0xff] }
 0x772   :  { %3536 = vmatprep.subr.mxu0 %v6149_v60 }
 0x773   :  { %3537 = vmatpush3.msra.mxu0 %v1344_v12  ;;  %v5340_v12 = vld [vmem:[%s6123_s0 + $0x2a8] sm:$0xff] }
 0x774   :  { %3538 = vmatprep.subr.mxu0 %v6149_v60 }
 0x775   :  { %3539 = vmatpush3.msra.mxu0 %v1343_v13  ;;  %v5346_v13 = vld [vmem:[%s6123_s0 + $0x2a0] sm:$0xff] }
 0x776   :  { %3540 = vmatprep.subr.mxu0 %v6149_v60 }
 0x777   :  { %3541 = vmatpush3.msra.mxu0 %v1342_v33  ;;  %v5352_v33 = vld [vmem:[%s6123_s0 + $0x298] sm:$0xff] }
 0x778   :  { %3542 = vmatprep.subr.mxu0 %v6149_v60 }
 0x779   :  { %3543 = vmatpush3.msra.mxu0 %v1341_v34  ;;  %v5358_v34 = vld [vmem:[%s6123_s0 + $0x290] sm:$0xff] }
 0x77a   :  { %3544 = vmatprep.subr.mxu0 %v6149_v60 }
 0x77b   :  { %3545 = vmatpush3.msra.mxu0 %v1340_v35  ;;  %v5364_v35 = vld [vmem:[%s6123_s0 + $0x288] sm:$0xff] }
 0x77c   :  { %3546 = vmatprep.subr.mxu0 %v6149_v60 }
 0x77d   :  { %3547 = vmatpush3.msra.mxu0 %v1339_v36  ;;  %v5370_v36 = vld [vmem:[%s6123_s0 + $0x280] sm:$0xff] }
 0x77e   :  { %3548 = vmatprep.subr.mxu0 %v6149_v60 }
 0x77f   :  { %3549 = vmatpush3.msra.mxu0 %v1338_v37  ;;  %v5376_v37 = vld [vmem:[%s6123_s0 + $0x278] sm:$0xff] }
 0x780   :  { %3550 = vmatprep.subr.mxu0 %v6149_v60 }
 0x781   :  { %3551 = vmatpush3.msra.mxu0 %v1337_v38  ;;  %v5382_v38 = vld [vmem:[%s6123_s0 + $0x270] sm:$0xff] }
 0x782   :  { %3552 = vmatprep.subr.mxu0 %v6149_v60 }
 0x783   :  { %3553 = vmatpush3.msra.mxu0 %v1336_v39  ;;  %v5388_v39 = vld [vmem:[%s6123_s0 + $0x268] sm:$0xff] }
 0x784   :  { %3554 = vmatprep.subr.mxu0 %v6149_v60 }
 0x785   :  { %3555 = vmatpush3.msra.mxu0 %v1335_v52  ;;  %v5394_v52 = vld [vmem:[%s6123_s0 + $0x260] sm:$0xff] }
 0x786   :  { %3556 = vmatprep.subr.mxu0 %v6149_v60 }
 0x787   :  { %3557 = vmatpush3.msra.mxu0 %v1334_v53  ;;  %v5400_v53 = vld [vmem:[%s6123_s0 + $0x258] sm:$0xff] }
 0x788   :  { %3558 = vmatprep.subr.mxu0 %v6149_v60 }
 0x789   :  { %3559 = vmatpush3.msra.mxu0 %v1333_v54  ;;  %v5406_v54 = vld [vmem:[%s6123_s0 + $0x250] sm:$0xff] }
 0x78a   :  { %3560 = vmatprep.subr.mxu0 %v6149_v60 }
 0x78b   :  { %3561 = vmatpush3.msra.mxu0 %v1332_v55  ;;  %v5412_v55 = vld [vmem:[%s6123_s0 + $0x248] sm:$0xff] }
 0x78c   :  { %1638 = vmatprep.subr.mxu0 %v5249_v49 }
 0x80f   :  { %v1326_v45 = vpop.f32.mrf.mxu1 }
 0x810   :  { %v1327_v47 = vadd.f32 1e-05, %v1326_v45  ;;  %v5418_v45 = vld [vmem:[%s6123_s0 + $0x240] sm:$0xff] }
 0x811   :  { %v3529_v41 = vpop.f32.mrf.mxu1 }
 0x812   :  { %3804 = vrsqrt.f32 %v1327_v47  ;;  %v5424_v47 = vld [vmem:[%s6123_s0 + $0x238] sm:$0xff]  ;;  %v5430_v41 = vld [vmem:[%s6123_s0 + $0x230] sm:$0xff] }
 0x81f   :  { %v3805_v56 = vpop.eup %3804 }
 0x820   :  { %v1331_v40 = vmul.f32 %v3805_v56, %v5139_v51  ;;  %v1530_v56 = vld [vmem:[%s6123_s0 + $0xc78] sm:$0xff] }
 0x821   :  { %1562 = vmatprep.subr.mxu1 %v1530_v56  ;;  %v1522_v56 = vld [vmem:[%s6123_s0 + $0xc38] sm:$0xff] }
 0x822   :  { %3582 = vmatmul.mubr.msk.f32.vlgmr.msra.gmra.mxu1 %vm306_vm3, %v1331_v40  ;;  %v1529_v40 = vld [vmem:[%s6123_s0 + $0xc70] sm:$0xff] }
 0x823   :  { %1563 = vmatpush1.msra.mxu1 %v1529_v40  ;;  %v5499_v40 = vld [vmem:[%s6123_s0 + $0x378] sm:$0xff] }
 0x82c   :  { %v1167_v42 = vpop.f32.mrf.mxu0 }
 0x82d   :  { %v1168_v43 = vadd.f32 1e-05, %v1167_v42  ;;  %v1528_v42 = vld [vmem:[%s6123_s0 + $0xc68] sm:$0xff] }
 0x82e   :  { %v3491_v48 = vpop.f32.mrf.mxu0  ;;  %1564 = vmatprep.subr.mxu1 %v1528_v42  ;;  %v1521_v42 = vld [vmem:[%s6123_s0 + $0xc30] sm:$0xff] }
 0x82f   :  { %3806 = vrsqrt.f32 %v1168_v43  ;;  %v5445_v43 = vld [vmem:[%s6123_s0 + $0x228] sm:$0xff]  ;;  %v5454_v48 = vld [vmem:[%s6123_s0 + $0x220] sm:$0xff] }
 0x830   :  { %3808 = vrsqrt.f32 %v1173_v44  ;;  %v1527_v44 = vld [vmem:[%s6123_s0 + $0xc60] sm:$0xff] }
 0x831   :  { %1565 = vmatpush1.msra.mxu1 %v1527_v44  ;;  %v5508_v44 = vld [vmem:[%s6123_s0 + $0x370] sm:$0xff] }
 0x83c   :  { %v3807_v50 = vpop.eup %3806 }
 0x83d   :  { %v1172_v58 = vmul.f32 %v3807_v50, %v5146_v59  ;;  %v3809_v61 = vpop.eup %3808  ;;  %v5268_v59 = vld [vmem:[%s6123_s0 + $0x308] sm:$0xff]  ;;  %v1526_v50 = vld [vmem:[%s6123_s0 + $0xc58] sm:$0xff] }
 0x83e   :  { %1566 = vmatprep.subr.mxu1 %v1526_v50  ;;  %v1520_v50 = vld [vmem:[%s6123_s0 + $0xc28] sm:$0xff] }
 0x83f   :  { %v1175_v46 = vmul.f32 %v3809_v61, %v1172_v58  ;;  %v5463_v58 = vld [vmem:[%s6123_s0 + $0x398] sm:$0xff]  ;;  %v1525_v61 = vld [vmem:[%s6123_s0 + $0xc50] sm:$0xff] }
 0x840   :  { %1567 = vmatpush1.msra.mxu1 %v1525_v61  ;;  %v5517_v61 = vld [vmem:[%s6123_s0 + $0x368] sm:$0xff] }
 0x841   :  { %v1178_v62 = vrot.slane %v1175_v46, 6  ;;  %v1176_v63 = vmul.f32 %v1175_v46, %v5079_v1  ;;  %v5472_v46 = vld [vmem:[%s6123_s0 + $0x390] sm:$0xff] }
 0x843   :  { %v1180_v0 = vmul.f32 %v1178_v62, %v5079_v1  ;;  %v5274_v1 = vld [vmem:[%s6123_s0 + $0x300] sm:$0xff]  ;;  %v1524_v62 = vld [vmem:[%s6123_s0 + $0xc48] sm:$0xff] }
 0x844   :  { %1568 = vmatprep.subr.mxu1 %v1524_v62  ;;  %v1519_v62 = vld [vmem:[%s6123_s0 + $0xc20] sm:$0xff] }
 0x845   :  { %v1181_v51 = vsel %vm547_vm6, %v1176_v63, %v1180_v0  ;;  %v5481_v63 = vld [vmem:[%s6123_s0 + $0x388] sm:$0xff]  ;;  %v1523_v0 = vld [vmem:[%s6123_s0 + $0xc40] sm:$0xff] }
 0x846   :  { %3563 = vmatmul.mubr.f32.vlgmr.msra.gmra.mxu0 %v1181_v51  ;;  %v5490_v51 = vld [vmem:[%s6123_s0 + $0x380] sm:$0xff]  ;;  %1569 = vmatpush1.msra.mxu1 %v1523_v0 }
 0x847   :  { %1639 = vmatpush1.msra.mxu0 %v5262_v57  ;;  %1570 = vmatprep.subr.mxu1 %v1522_v56  ;;  %v5526_v0 = vld [vmem:[%s6123_s0 + $0x360] sm:$0xff]  ;;  %v5535_v56 = vld [vmem:[%s6123_s0 + $0x358] sm:$0xff] }
 0x848   :  { %1640 = vmatprep.subr.mxu0 %v5268_v59  ;;  %1571 = vmatpush1.msra.mxu1 %v1521_v42  ;;  %v5544_v42 = vld [vmem:[%s6123_s0 + $0x350] sm:$0xff] }
 0x849   :  { %1641 = vmatpush1.msra.mxu0 %v5274_v1  ;;  %1572 = vmatprep.subr.mxu1 %v1520_v50  ;;  %v5553_v50 = vld [vmem:[%s6123_s0 + $0x348] sm:$0xff] }
 0x84a   :  { %1642 = vmatprep.subr.mxu0 %v5280_v2  ;;  %1573 = vmatpush1.msra.mxu1 %v1519_v62  ;;  %v5562_v62 = vld [vmem:[%s6123_s0 + $0x340] sm:$0xff] }
 0x84b   :  { %1643 = vmatpush1.msra.mxu0 %v5286_v3  ;;  %1574 = vmatprep.subr.mxu1 %v1518_v17  ;;  %v5571_v17 = vld [vmem:[%s6123_s0 + $0x338] sm:$0xff] }
 0x84c   :  { %1644 = vmatprep.subr.mxu0 %v5292_v4  ;;  %1575 = vmatpush1.msra.mxu1 %v1517_v15  ;;  %v5580_v15 = vld [vmem:[%s6123_s0 + $0x330] sm:$0xff] }
 0x84d   :  { %1645 = vmatpush1.msra.mxu0 %v5298_v5  ;;  %1576 = vmatprep.subr.mxu1 %v1516_v14  ;;  %v5589_v14 = vld [vmem:[%s6123_s0 + $0x328] sm:$0xff] }
 0x84e   :  { %1646 = vmatprep.subr.mxu0 %v5304_v6  ;;  %1577 = vmatpush1.msra.mxu1 %v1515_v32  ;;  %v5598_v32 = vld [vmem:[%s6123_s0 + $0x320] sm:$0xff] }
 0x84f   :  { %1647 = vmatpush1.msra.mxu0 %v5310_v7  ;;  %1578 = vmatprep.subr.mxu1 %v1514_v31  ;;  %v1509_v31 = vld [vmem:[%s6123_s0 + $0xbd0] sm:$0xff] }
 0x850   :  { %1648 = vmatprep.subr.mxu0 %v5316_v8  ;;  %1579 = vmatpush1.msra.mxu1 %v1513_v30  ;;  %v1507_v30 = vld [vmem:[%s6123_s0 + $0xbc0] sm:$0xff] }
 0x851   :  { %1649 = vmatpush1.msra.mxu0 %v5322_v9  ;;  %1580 = vmatprep.subr.mxu1 %v1512_v29  ;;  %v1506_v29 = vld [vmem:[%s6123_s0 + $0xbb8] sm:$0xff] }
 0x852   :  { %1650 = vmatprep.subr.mxu0 %v5328_v10  ;;  %1581 = vmatpush1.msra.mxu1 %v1511_v28  ;;  %v1505_v28 = vld [vmem:[%s6123_s0 + $0xbb0] sm:$0xff] }
 0x853   :  { %1651 = vmatpush1.msra.mxu0 %v5334_v11  ;;  %1582 = vmatprep.subr.mxu1 %v1510_v27  ;;  %v1504_v27 = vld [vmem:[%s6123_s0 + $0xba8] sm:$0xff] }
 0x854   :  { %1652 = vmatprep.subr.mxu0 %v5340_v12  ;;  %1583 = vmatpush1.msra.mxu1 %v1509_v31  ;;  %v1502_v31 = vld [vmem:[%s6123_s0 + $0xb98] sm:$0xff] }
 0x855   :  { %1653 = vmatpush1.msra.mxu0 %v5346_v13  ;;  %1584 = vmatprep.subr.mxu1 %v1508_v26  ;;  %v1503_v26 = vld [vmem:[%s6123_s0 + $0xba0] sm:$0xff] }
 0x856   :  { %1654 = vmatprep.subr.mxu0 %v5352_v33  ;;  %1585 = vmatpush1.msra.mxu1 %v1507_v30  ;;  %v1501_v30 = vld [vmem:[%s6123_s0 + $0xb90] sm:$0xff] }
 0x857   :  { %1655 = vmatpush1.msra.mxu0 %v5358_v34  ;;  %1586 = vmatprep.subr.mxu1 %v1506_v29  ;;  %v1500_v29 = vld [vmem:[%s6123_s0 + $0xb88] sm:$0xff] }
 0x858   :  { %1656 = vmatprep.subr.mxu0 %v5364_v35  ;;  %1587 = vmatpush1.msra.mxu1 %v1505_v28  ;;  %v1499_v28 = vld [vmem:[%s6123_s0 + $0xb80] sm:$0xff] }
 0x859   :  { %1657 = vmatpush1.msra.mxu0 %v5370_v36  ;;  %1588 = vmatprep.subr.mxu1 %v1504_v27  ;;  %v1546_v27 = vld [vmem:[%s6123_s0 + $0xcf8] sm:$0xff] }
 0x85a   :  { %1658 = vmatprep.subr.mxu0 %v5376_v37  ;;  %1589 = vmatpush1.msra.mxu1 %v1503_v26  ;;  %v1545_v26 = vld [vmem:[%s6123_s0 + $0xcf0] sm:$0xff] }
 0x85b   :  { %1659 = vmatpush1.msra.mxu0 %v5382_v38  ;;  %1590 = vmatprep.subr.mxu1 %v1502_v31  ;;  %v1544_v31 = vld [vmem:[%s6123_s0 + $0xce8] sm:$0xff] }
 0x85c   :  { %1660 = vmatprep.subr.mxu0 %v5388_v39  ;;  %1591 = vmatpush1.msra.mxu1 %v1501_v30  ;;  %v1543_v30 = vld [vmem:[%s6123_s0 + $0xce0] sm:$0xff] }
 0x85d   :  { %1661 = vmatpush1.msra.mxu0 %v5394_v52  ;;  %1592 = vmatprep.subr.mxu1 %v1500_v29  ;;  %v1542_v29 = vld [vmem:[%s6123_s0 + $0xcd8] sm:$0xff] }
 0x85e   :  { %1662 = vmatprep.subr.mxu0 %v5400_v53  ;;  %1593 = vmatpush1.msra.mxu1 %v1499_v28  ;;  %v1541_v28 = vld [vmem:[%s6123_s0 + $0xcd0] sm:$0xff] }
 0x85f   :  { %1663 = vmatpush1.msra.mxu0 %v5406_v54  ;;  %1610 = vmatprep.subr.mxu1 %v1546_v27  ;;  %v1539_v27 = vld [vmem:[%s6123_s0 + $0xcc0] sm:$0xff] }
 0x860   :  { %1664 = vmatprep.subr.mxu0 %v5412_v55  ;;  %1611 = vmatpush2.msra.mxu1 %v1545_v26  ;;  %v1538_v26 = vld [vmem:[%s6123_s0 + $0xcb8] sm:$0xff] }
 0x861   :  { %1665 = vmatpush1.msra.mxu0 %v5418_v45  ;;  %1612 = vmatprep.subr.mxu1 %v1544_v31  ;;  %v1537_v31 = vld [vmem:[%s6123_s0 + $0xcb0] sm:$0xff] }
 0x862   :  { %1666 = vmatprep.subr.mxu0 %v5424_v47  ;;  %1613 = vmatpush2.msra.mxu1 %v1543_v30  ;;  %v1536_v30 = vld [vmem:[%s6123_s0 + $0xca8] sm:$0xff] }
 0x863   :  { %1667 = vmatpush1.msra.mxu0 %v5430_v41  ;;  %1614 = vmatprep.subr.mxu1 %v1542_v29  ;;  %v1535_v29 = vld [vmem:[%s6123_s0 + $0xca0] sm:$0xff] }
 0x864   :  { %1668 = vmatprep.subr.mxu0 %v5445_v43  ;;  %1615 = vmatpush2.msra.mxu1 %v1541_v28  ;;  %v1534_v28 = vld [vmem:[%s6123_s0 + $0xc98] sm:$0xff] }
 0x865   :  { %1669 = vmatpush1.msra.mxu0 %v5454_v48  ;;  %1616 = vmatprep.subr.mxu1 %v1540_v25  ;;  %v1533_v25 = vld [vmem:[%s6123_s0 + $0xc90] sm:$0xff] }
 0x866   :  { %1686 = vmatprep.subr.mxu0 %v5463_v58  ;;  %1617 = vmatpush2.msra.mxu1 %v1539_v27  ;;  %v1532_v27 = vld [vmem:[%s6123_s0 + $0xc88] sm:$0xff] }
 0x867   :  { %1687 = vmatpush2.msra.mxu0 %v5472_v46  ;;  %1618 = vmatprep.subr.mxu1 %v1538_v26  ;;  %v1531_v26 = vld [vmem:[%s6123_s0 + $0xc80] sm:$0xff] }
 0x868   :  { %1688 = vmatprep.subr.mxu0 %v5481_v63  ;;  %1619 = vmatpush2.msra.mxu1 %v1537_v31 }
 0x869   :  { %1689 = vmatpush2.msra.mxu0 %v5490_v51  ;;  %1620 = vmatprep.subr.mxu1 %v1536_v30 }
 0x86a   :  { %1690 = vmatprep.subr.mxu0 %v5499_v40  ;;  %1621 = vmatpush2.msra.mxu1 %v1535_v29 }
 0x86b   :  { %1691 = vmatpush2.msra.mxu0 %v5508_v44  ;;  %1622 = vmatprep.subr.mxu1 %v1534_v28 }
 0x86c   :  { %1692 = vmatprep.subr.mxu0 %v5517_v61  ;;  %1623 = vmatpush2.msra.mxu1 %v1533_v25 }
 0x86d   :  { %1693 = vmatpush2.msra.mxu0 %v5526_v0  ;;  %1624 = vmatprep.subr.mxu1 %v1532_v27 }
 0x86e   :  { %1694 = vmatprep.subr.mxu0 %v5535_v56  ;;  %1625 = vmatpush2.msra.mxu1 %v1531_v26 }
 0x86f   :  { %1695 = vmatpush2.msra.mxu0 %v5544_v42  ;;  %1716 = vmatprep.subr.mxu1 %v5249_v49 }
 0x870   :  { %1696 = vmatprep.subr.mxu0 %v5553_v50 }
 0x871   :  { %1697 = vmatpush2.msra.mxu0 %v5562_v62 }
 0x872   :  { %1698 = vmatprep.subr.mxu0 %v5571_v17 }
 0x873   :  { %1699 = vmatpush2.msra.mxu0 %v5580_v15 }
 0x874   :  { %1700 = vmatprep.subr.mxu0 %v5589_v14 }
 0x875   :  { %1701 = vmatpush2.msra.mxu0 %v5598_v32 }
 0x876   :  { %3584 = vmatprep.subr.mxu0 %v6149_v60 }
 0x8e2   :  { %v1495_v31 = vpop.f32.mrf.mxu1 }
 0x8e3   :  { %3124 = vmatprep.mubr.msk.f32.mxu1 %vm306_vm3, %v1495_v31 }
 0x8e4   :  { %v3583_v30 = vpop.f32.mrf.mxu1 }
 0x8e5   :  { %v3900_v30 = vld [vmem:[%s6123_s0 + $0x490] sm:$0xff] }
 0x906   :  { %v5688_v24 = vpop.f32.mrf.mxu0 }
 0x907   :  { %v1547_v29 = vmul.f32 %v5688_v24, %v5688_v24 }
 0x908   :  { %v3564_v23 = vpop.f32.mrf.mxu0 }
 0x909   :  { %v1549_v28 = vrot.slane %v1547_v29, 2 }
 0x90b   :  { %v5692_v22 = vadd.f32 %v1549_v28, %v1547_v29  ;;  %v3901_v29 = vld [vmem:[%s6123_s0 + $0x480] sm:$0xff]  ;;  %v3902_v28 = vld [vmem:[%s6123_s0 + $0x470] sm:$0xff] }
 0x90d   :  { %3810 = vrsqrt.f32 %v5692_v22  ;;  %vm1554_vm11 = vcmp.eq.f32.partialorder %v5692_v22, inf  ;;  %v1557_v49 = vand.u32 2147483648, %v5692_v22  ;;  %vm1556_vm12 = vcmp.eq.f32.partialorder %v5692_v22, 0.0 }
 0x91a   :  { %v3811_v25 = vpop.eup %3810 }
 0x91b   :  { %v1553_v27 = vmul.f32 %v3811_v25, %v5692_v22  ;;  %v3903_v25 = vld [vmem:[%s6123_s0 + $0x460] sm:$0xff] }
 0x91d   :  { %v1555_v26 = vsel %vm1554_vm11, %v5692_v22, %v1553_v27  ;;  %v3904_v27 = vld [vmem:[%s6123_s0 + $0x450] sm:$0xff]  ;;  %vm2802_vm11 = vcmask 23552  }
 0x91e   :  { %v1558_v31 = vsel %vm1556_vm12, %v1557_v49, %v1555_v26  ;;  %v3905_v49 = vld [vmem:[%s6123_s0 + $0x440] sm:$0xff]  ;;  %v3906_v26 = vld [vmem:[%s6123_s0 + $0x430] sm:$0xff]  ;;  %vm2804_vm12 = vcmask 25600  }
 0x91f   :  { %1627 = vmatmul.mubr.f32.vlgmr.msra.gmra.mxu1 %v1558_v31  ;;  %v3907_v31 = vld [vmem:[%s6123_s0 + $0x420] sm:$0xff] }
 0x920   :  { %1717 = vmatpush1.msra.mxu1 %v5262_v57 }
 0x921   :  { %1718 = vmatprep.subr.mxu1 %v5268_v59 }
 0x922   :  { %1719 = vmatpush1.msra.mxu1 %v5274_v1 }
 0x923   :  { %1720 = vmatprep.subr.mxu1 %v5280_v2  ;;  %v6167_v2 = vld [vmem:[#allocation9_spill] sm:$0xff] }
 0x924   :  { %1721 = vmatpush1.msra.mxu1 %v5286_v3  ;;  %v6172_v3 = vld [vmem:[#allocation14_spill] sm:$0xff] }
 0x925   :  { %1722 = vmatprep.subr.mxu1 %v5292_v4  ;;  %v6173_v4 = vld [vmem:[#allocation15_spill] sm:$0xff] }
 0x926   :  { %1723 = vmatpush1.msra.mxu1 %v5298_v5  ;;  %v6174_v5 = vld [vmem:[#allocation16_spill] sm:$0xff] }
 0x927   :  { %1724 = vmatprep.subr.mxu1 %v5304_v6  ;;  %v6175_v6 = vld [vmem:[#allocation17_spill] sm:$0xff] }
 0x928   :  { %1725 = vmatpush1.msra.mxu1 %v5310_v7  ;;  %v6176_v7 = vld [vmem:[#allocation18_spill] sm:$0xff] }
 0x929   :  { %1726 = vmatprep.subr.mxu1 %v5316_v8 }
 0x92a   :  { %1727 = vmatpush1.msra.mxu1 %v5322_v9 }
 0x92b   :  { %1728 = vmatprep.subr.mxu1 %v5328_v10 }
 0x92c   :  { %1729 = vmatpush1.msra.mxu1 %v5334_v11 }
 0x92d   :  { %1730 = vmatprep.subr.mxu1 %v5340_v12 }
 0x92e   :  { %1731 = vmatpush1.msra.mxu1 %v5346_v13 }
 0x92f   :  { %1732 = vmatprep.subr.mxu1 %v5352_v33  ;;  %v3892_v33 = vld [vmem:[%s6123_s0 + $0x510] sm:$0xff] }
 0x930   :  { %1733 = vmatpush1.msra.mxu1 %v5358_v34  ;;  %v3893_v34 = vld [vmem:[%s6123_s0 + $0x500] sm:$0xff] }
 0x931   :  { %1734 = vmatprep.subr.mxu1 %v5364_v35  ;;  %v3894_v35 = vld [vmem:[%s6123_s0 + $0x4f0] sm:$0xff] }
 0x932   :  { %1735 = vmatpush1.msra.mxu1 %v5370_v36  ;;  %v3895_v36 = vld [vmem:[%s6123_s0 + $0x4e0] sm:$0xff] }
 0x933   :  { %1736 = vmatprep.subr.mxu1 %v5376_v37  ;;  %v3896_v37 = vld [vmem:[%s6123_s0 + $0x4d0] sm:$0xff] }
 0x934   :  { %1737 = vmatpush1.msra.mxu1 %v5382_v38  ;;  %v6177_v38 = vld [vmem:[#allocation5_spill] sm:$0xff] }
 0x935   :  { %1738 = vmatprep.subr.mxu1 %v5388_v39  ;;  %v6178_v39 = vld [vmem:[#allocation6_spill] sm:$0xff] }
 0x936   :  { %1739 = vmatpush1.msra.mxu1 %v5394_v52  ;;  %v6179_v52 = vld [vmem:[#allocation7_spill] sm:$0xff] }
 0x937   :  { %1740 = vmatprep.subr.mxu1 %v5400_v53  ;;  %v1791_v53 = vmax.f32 %v5692_v22, 1e-12 }
 0x938   :  { %1741 = vmatpush1.msra.mxu1 %v5406_v54 }
 0x939   :  { %1742 = vmatprep.subr.mxu1 %v5412_v55 }
 0x93a   :  { %1743 = vmatpush1.msra.mxu1 %v5418_v45 }
 0x93b   :  { %1744 = vmatprep.subr.mxu1 %v5424_v47 }
 0x93c   :  { %1745 = vmatpush1.msra.mxu1 %v5430_v41 }
 0x93d   :  { %1746 = vmatprep.subr.mxu1 %v5445_v43 }
 0x93e   :  { %1747 = vmatpush1.msra.mxu1 %v5454_v48 }
 0x93f   :  { %1764 = vmatprep.subr.mxu1 %v5463_v58 }
 0x940   :  { %1765 = vmatpush2.msra.mxu1 %v5472_v46 }
 0x941   :  { %1766 = vmatprep.subr.mxu1 %v5481_v63 }
 0x942   :  { %1767 = vmatpush2.msra.mxu1 %v5490_v51 }
 0x943   :  { %1768 = vmatprep.subr.mxu1 %v5499_v40 }
 0x944   :  { %1769 = vmatpush2.msra.mxu1 %v5508_v44 }
 0x945   :  { %1770 = vmatprep.subr.mxu1 %v5517_v61 }
 0x946   :  { %1771 = vmatpush2.msra.mxu1 %v5526_v0 }
 0x947   :  { %1772 = vmatprep.subr.mxu1 %v5535_v56 }
 0x948   :  { %1773 = vmatpush2.msra.mxu1 %v5544_v42  ;;  %v3898_v42 = vld [vmem:[%s6123_s0 + $0x4b0] sm:$0xff] }
 0x949   :  { %1774 = vmatprep.subr.mxu1 %v5553_v50  ;;  %v3899_v50 = vld [vmem:[%s6123_s0 + $0x4a0] sm:$0xff] }
 0x94a   :  { %1775 = vmatpush2.msra.mxu1 %v5562_v62 }
 0x94b   :  { %1776 = vmatprep.subr.mxu1 %v5571_v17 }
 0x94c   :  { %1777 = vmatpush2.msra.mxu1 %v5580_v15 }
 0x94d   :  { %1778 = vmatprep.subr.mxu1 %v5589_v14 }
 0x94e   :  { %1779 = vmatpush2.msra.mxu1 %v5598_v32 }
 0x94f   :  { %3654 = vmatprep.subr.mxu1 %v6149_v60 }
 0x9df   :  { %v1628_v23 = vpop.f32.mrf.mxu1 }
 0x9e0   :  { %v1633_v1 = vmax.f32 %v1628_v23, 0.0  ;;  %v3908_v23 = vld [vmem:[%s6123_s0 + $0x410] sm:$0xff] }
 0x9e1   :  { %v1630_v57 = vpop.f32.mrf.mxu1 }
 0x9e2   :  { %v1634_v59 = vmax.f32 %v1630_v57, 0.0  ;;  %v3909_v57 = vld [vmem:[%s6123_s0 + $0x400] sm:$0xff] }
 0x9e4   :  { %3125 = vmatprep.mubr.msk.f32.mxu0 %vm306_vm3, %v1634_v59 }
 0x9e5   :  { %1703 = vmatmul.mubr.f32.vlgmr.msra.gmra.mxu0 %v1633_v1 }
 0x9e6   :  { %3585 = vmatpush3.msra.mxu0 %v4947_v16  ;;  %3616 = vmatprep.mubr.msk.f32.mxu0 %vm3939_vm0, %v6149_v60  ;;  %v6166_v16 = vld [vmem:[#allocation8_spill] sm:$0xff] }
 0x9e7   :  { %3586 = vmatprep.subr.mxu0 %v6149_v60 }
 0x9e8   :  { %3587 = vmatpush3.msra.mxu0 %v4961_v18  ;;  %v6168_v18 = vld [vmem:[#allocation10_spill] sm:$0xff] }
 0x9e9   :  { %3588 = vmatprep.subr.mxu0 %v6149_v60 }
 0x9ea   :  { %3589 = vmatpush3.msra.mxu0 %v4969_v19  ;;  %v6169_v19 = vld [vmem:[#allocation11_spill] sm:$0xff] }
 0x9eb   :  { %3590 = vmatprep.subr.mxu0 %v6149_v60 }
 0x9ec   :  { %3591 = vmatpush3.msra.mxu0 %v4976_v20  ;;  %v6170_v20 = vld [vmem:[#allocation12_spill] sm:$0xff] }
 0x9ed   :  { %3592 = vmatprep.subr.mxu0 %v6149_v60 }
 0x9ee   :  { %3593 = vmatpush3.msra.mxu0 %v4983_v21  ;;  %v6171_v21 = vld [vmem:[#allocation13_spill] sm:$0xff] }
 0x9ef   :  { %3594 = vmatprep.subr.mxu0 %v6149_v60 }
 0x9f0   :  { %3595 = vmatpush3.msra.mxu0 %v6166_v16  ;;  %v3912_v16 = vld [vmem:[%s6123_s0 + $0x3d0] sm:$0xff] }
 0x9f1   :  { %3596 = vmatprep.subr.mxu0 %v6149_v60 }
 0x9f2   :  { %3597 = vmatpush3.msra.mxu0 %v6167_v2  ;;  %v3913_v2 = vld [vmem:[%s6123_s0 + $0x3c0] sm:$0xff] }
 0x9f3   :  { %3598 = vmatprep.subr.mxu0 %v6149_v60 }
 0x9f4   :  { %3599 = vmatpush3.msra.mxu0 %v6168_v18  ;;  %v3914_v18 = vld [vmem:[%s6123_s0 + $0x3b0] sm:$0xff] }
 0x9f5   :  { %3600 = vmatprep.subr.mxu0 %v6149_v60 }
 0x9f6   :  { %3601 = vmatpush3.msra.mxu0 %v6169_v19  ;;  %v3915_v19 = vld [vmem:[%s6123_s0 + $0x3a0] sm:$0xff] }
 0x9f7   :  { %3602 = vmatprep.subr.mxu0 %v6149_v60 }
 0x9f8   :  { %3603 = vmatpush3.msra.mxu0 %v6170_v20 }
 0x9f9   :  { %3604 = vmatprep.subr.mxu0 %v6149_v60 }
 0x9fa   :  { %3605 = vmatpush3.msra.mxu0 %v6171_v21 }
 0x9fb   :  { %3606 = vmatprep.subr.mxu0 %v6149_v60 }
 0x9fc   :  { %3607 = vmatpush3.msra.mxu0 %v6172_v3 }
 0x9fd   :  { %3608 = vmatprep.subr.mxu0 %v6149_v60 }
 0x9fe   :  { %3609 = vmatpush3.msra.mxu0 %v6173_v4 }
 0x9ff   :  { %3610 = vmatprep.subr.mxu0 %v6149_v60 }
 0xa00   :  { %3611 = vmatpush3.msra.mxu0 %v6174_v5 }
 0xa01   :  { %3612 = vmatprep.subr.mxu0 %v6149_v60 }
 0xa02   :  { %3613 = vmatpush3.msra.mxu0 %v6175_v6 }
 0xa03   :  { %3614 = vmatprep.subr.mxu0 %v6149_v60 }
 0xa04   :  { %3615 = vmatpush3.msra.mxu0 %v6176_v7 }
 0xa05   :  { %3619 = vmatprep.subr.mxu0 %v6149_v60 }
 0xaa5   :  { %v1704_v8 = vpop.f32.mrf.mxu0 }
 0xaa6   :  { %v1709_v9 = vsub.f32 %v1633_v1, %v1704_v8  ;;  %v3911_v1 = vld [vmem:[%s6123_s0 + $0x3e0] sm:$0xff] }
 0xaa7   :  { %v1706_v10 = vpop.f32.mrf.mxu0 }
 0xaa8   :  { %v1710_v11 = vsub.f32 %v1634_v59, %v1706_v10  ;;  %v1711_v13 = vmul.f32 %v1709_v9, %v1709_v9  ;;  %v3910_v59 = vld [vmem:[%s6123_s0 + $0x3f0] sm:$0xff]  ;;  %v2207_v10 = vld [vmem:[%s6123_s0 + $0x680] sm:$0xff] }
 0xaaa   :  { %v1712_v12 = vmul.f32 %v1710_v11, %v1710_v11 }
 0xaac   :  { %3126 = vmatprep.mubr.msk.f32.mxu1 %vm306_vm3, %v1712_v12  ;;  %v2205_v12 = vld [vmem:[%s6123_s0 + $0x660] sm:$0xff] }
 0xaad   :  { %1781 = vmatmul.mubr.f32.vlgmr.msra.gmra.mxu1 %v1711_v13  ;;  %v2204_v13 = vld [vmem:[%s6123_s0 + $0x650] sm:$0xff] }
 0xaae   :  { %3655 = vmatpush3.msra.mxu1 %v3892_v33  ;;  %3670 = vmatprep.mubr.msk.f32.mxu1 %vm3939_vm0, %v6149_v60 }
 0xaaf   :  { %3656 = vmatprep.subr.mxu1 %v6149_v60 }
 0xab0   :  { %3657 = vmatpush3.msra.mxu1 %v3893_v34 }
 0xab1   :  { %3658 = vmatprep.subr.mxu1 %v6149_v60 }
 0xab2   :  { %3659 = vmatpush3.msra.mxu1 %v3894_v35 }
 0xab3   :  { %3660 = vmatprep.subr.mxu1 %v6149_v60 }
 0xab4   :  { %3661 = vmatpush3.msra.mxu1 %v3895_v36 }
 0xab5   :  { %3662 = vmatprep.subr.mxu1 %v6149_v60 }
 0xab6   :  { %3663 = vmatpush3.msra.mxu1 %v3896_v37 }
 0xab7   :  { %3664 = vmatprep.subr.mxu1 %v6149_v60 }
 0xab8   :  { %3665 = vmatpush3.msra.mxu1 %v6177_v38  ;;  %v2128_v38 = vld [vmem:[%s6123_s0 + $0x5f0] sm:$0xff] }
 0xab9   :  { %3666 = vmatprep.subr.mxu1 %v6149_v60 }
 0xaba   :  { %3667 = vmatpush3.msra.mxu1 %v6178_v39  ;;  %v2127_v39 = vld [vmem:[%s6123_s0 + $0x5e0] sm:$0xff] }
 0xabb   :  { %3668 = vmatprep.subr.mxu1 %v6149_v60 }
 0xabc   :  { %3669 = vmatpush3.msra.mxu1 %v6179_v52  ;;  %v2126_v52 = vld [vmem:[%s6123_s0 + $0x5d0] sm:$0xff] }
 0xabd   :  { %3673 = vmatprep.subr.mxu1 %v6149_v60 }
 0xb6d   :  { %v1782_v54 = vpop.f32.mrf.mxu1 }
 0xb6e   :  { %v1783_v55 = vadd.f32 1e-05, %v1782_v54  ;;  %v2124_v54 = vld [vmem:[%s6123_s0 + $0x5b0] sm:$0xff] }
 0xb6f   :  { %v1784_v45 = vpop.f32.mrf.mxu1 }
 0xb70   :  { %3812 = vrsqrt.f32 %v1783_v55  ;;  %v1785_v47 = vadd.f32 1e-05, %v1784_v45  ;;  %v2123_v55 = vld [vmem:[%s6123_s0 + $0x5a0] sm:$0xff]  ;;  %v2122_v45 = vld [vmem:[%s6123_s0 + $0x590] sm:$0xff] }
 0xb71   :  { %3814 = vrsqrt.f32 %v1791_v53  ;;  %v2125_v53 = vld [vmem:[%s6123_s0 + $0x5c0] sm:$0xff] }
 0xb72   :  { %3816 = vrsqrt.f32 %v1785_v47  ;;  %v2121_v47 = vld [vmem:[%s6123_s0 + $0x580] sm:$0xff] }
 0xb7d   :  { %v3813_v41 = vpop.eup %3812 }
 0xb7e   :  { %v3815_v43 = vpop.eup %3814  ;;  %v1789_v48 = vmul.f32 %v3813_v41, %v1709_v9  ;;  %v2208_v9 = vld [vmem:[%s6123_s0 + $0x690] sm:$0xff] }
 0xb7f   :  { %v3817_v58 = vpop.eup %3816  ;;  %v2120_v41 = vld [vmem:[%s6123_s0 + $0x570] sm:$0xff] }
 0xb80   :  { %v1793_v46 = vmul.f32 %v3815_v43, %v1789_v48  ;;  %v5813_v63 = vmul.f32 %v3817_v58, %v1710_v11  ;;  %v2206_v11 = vld [vmem:[%s6123_s0 + $0x670] sm:$0xff]  ;;  %v2119_v43 = vld [vmem:[%s6123_s0 + $0x560] sm:$0xff] }
 0xb81   :  { %v2118_v48 = vld [vmem:[%s6123_s0 + $0x550] sm:$0xff]  ;;  %v2117_v58 = vld [vmem:[%s6123_s0 + $0x540] sm:$0xff] }
 0xb82   :  { %v1796_v51 = vrot.slane %v1793_v46, 6  ;;  %3671 = vmatmul.mubr.msk.f32.vlgmr.msra.gmra.mxu1 %vm306_vm3, %v5813_v63  ;;  %v1794_v22 = vmul.f32 %v1793_v46, %v5688_v24  ;;  %v2116_v46 = vld [vmem:[%s6123_s0 + $0x530] sm:$0xff] }
 0xb83   :  { %3674 = vmatpush3.msra.mxu1 %v3892_v33  ;;  %3689 = vmatprep.mubr.msk.f32.mxu1 %vm3939_vm0, %v6149_v60  ;;  %v2203_v33 = vld [vmem:[%s6123_s0 + $0x640] sm:$0xff] }
 0xb84   :  { %v1798_v40 = vmul.f32 %v1796_v51, %v5688_v24  ;;  %3675 = vmatprep.subr.mxu1 %v6149_v60  ;;  %v3897_v24 = vld [vmem:[%s6123_s0 + $0x4c0] sm:$0xff] }
 0xb85   :  { %3676 = vmatpush3.msra.mxu1 %v3893_v34  ;;  %v2202_v34 = vld [vmem:[%s6123_s0 + $0x630] sm:$0xff] }
 0xb86   :  { %v5823_v44 = vsel %vm547_vm6, %v1794_v22, %v1798_v40  ;;  %3677 = vmatprep.subr.mxu1 %v6149_v60 }
 0xb87   :  { %v1800_v61 = vmul.f32 %v5823_v44, %v5823_v44  ;;  %3678 = vmatpush3.msra.mxu1 %v3894_v35  ;;  %v2201_v35 = vld [vmem:[%s6123_s0 + $0x620] sm:$0xff] }
 0xb88   :  { %3679 = vmatprep.subr.mxu1 %v6149_v60 }
 0xb89   :  { %v1802_v0 = vrot.slane %v1800_v61, 2  ;;  %3680 = vmatpush3.msra.mxu1 %v3895_v36  ;;  %v2130_v36 = vld [vmem:[%s6123_s0 + $0x610] sm:$0xff] }
 0xb8a   :  { %3681 = vmatprep.subr.mxu1 %v6149_v60 }
 0xb8b   :  { %v5830_v56 = vadd.f32 %v1802_v0, %v1800_v61  ;;  %3682 = vmatpush3.msra.mxu1 %v3896_v37  ;;  %v2129_v37 = vld [vmem:[%s6123_s0 + $0x600] sm:$0xff] }
 0xb8c   :  { %3683 = vmatprep.subr.mxu1 %v6149_v60 }
 0xb8d   :  { %3818 = vrsqrt.f32 %v5830_v56  ;;  %3684 = vmatpush3.msra.mxu1 %v3897_v24  ;;  %vm1807_vm13 = vcmp.eq.f32.partialorder %v5830_v56, inf  ;;  %v1810_v15 = vand.u32 2147483648, %v5830_v56  ;;  %vm1809_vm14 = vcmp.eq.f32.partialorder %v5830_v56, 0.0 }
 0xb8e   :  { %3685 = vmatprep.subr.mxu1 %v6149_v60 }
 0xb8f   :  { %3686 = vmatpush3.msra.mxu1 %v3898_v42 }
 0xb90   :  { %3687 = vmatprep.subr.mxu1 %v6149_v60 }
 0xb91   :  { %3688 = vmatpush3.msra.mxu1 %v3899_v50  ;;  %v1956_v50 = vmax.f32 %v5830_v56, 1e-12 }
 0xb92   :  { %3727 = vmatprep.subr.mxu1 %v6149_v60 }
 0xb9a   :  { %v3819_v62 = vpop.eup %3818 }
 0xb9b   :  { %v1806_v17 = vmul.f32 %v3819_v62, %v5830_v56 }
 0xb9d   :  { %v1808_v14 = vsel %vm1807_vm13, %v5830_v56, %v1806_v17 }
 0xb9e   :  { %v1811_v32 = vsel %vm1809_vm14, %v1810_v15, %v1808_v14 }
 0xb9f   :  { %3617 = vmatmul.mubr.f32.vlgmr.msra.gmra.mxu0 %v1811_v32 }
 0xba0   :  { %3620 = vmatpush3.msra.mxu0 %v3900_v30  ;;  %3651 = vmatprep.mubr.msk.f32.mxu0 %vm3939_vm0, %v6149_v60 }
 0xba1   :  { %3621 = vmatprep.subr.mxu0 %v6149_v60 }
 0xba2   :  { %3622 = vmatpush3.msra.mxu0 %v3901_v29 }
 0xba3   :  { %3623 = vmatprep.subr.mxu0 %v6149_v60 }
 0xba4   :  { %3624 = vmatpush3.msra.mxu0 %v3902_v28 }
 0xba5   :  { %3625 = vmatprep.subr.mxu0 %v6149_v60 }
 0xba6   :  { %3626 = vmatpush3.msra.mxu0 %v3903_v25  ;;  %v2357_v25 = vld [vmem:[%s6123_s0 + $0x6b0] sm:$0xf] }
 0xba7   :  { %3627 = vmatprep.subr.mxu0 %v6149_v60 }
 0xba8   :  { %3628 = vmatpush3.msra.mxu0 %v3904_v27  ;;  %v2282_v27 = vld [vmem:[%s6123_s0 + $0x6a0] sm:$0xff] }
 0xba9   :  { %3629 = vmatprep.subr.mxu0 %v6149_v60 }
 0xbaa   :  { %3630 = vmatpush3.msra.mxu0 %v3905_v49 }
 0xbab   :  { %3631 = vmatprep.subr.mxu0 %v6149_v60 }
 0xbac   :  { %3632 = vmatpush3.msra.mxu0 %v3906_v26 }
 0xbad   :  { %3633 = vmatprep.subr.mxu0 %v6149_v60 }
 0xbae   :  { %3634 = vmatpush3.msra.mxu0 %v3907_v31 }
 0xbaf   :  { %3635 = vmatprep.subr.mxu0 %v6149_v60 }
 0xbb0   :  { %3636 = vmatpush3.msra.mxu0 %v3908_v23  ;;  %v2437_v23 = vld [vmem:[%s6123_s0 + $0x6d0] sm:$0xf] }
 0xbb1   :  { %3637 = vmatprep.subr.mxu0 %v6149_v60 }
 0xbb2   :  { %3638 = vmatpush3.msra.mxu0 %v3909_v57  ;;  %v2436_v57 = vld [vmem:[%s6123_s0 + $0x6c0] sm:$0xff] }
 0xbb3   :  { %3639 = vmatprep.subr.mxu0 %v6149_v60 }
 0xbb4   :  { %3640 = vmatpush3.msra.mxu0 %v3910_v59 }
 0xbb5   :  { %3641 = vmatprep.subr.mxu0 %v6149_v60 }
 0xbb6   :  { %3642 = vmatpush3.msra.mxu0 %v3911_v1 }
 0xbb7   :  { %3643 = vmatprep.subr.mxu0 %v6149_v60 }
 0xbb8   :  { %3644 = vmatpush3.msra.mxu0 %v3912_v16 }
 0xbb9   :  { %3645 = vmatprep.subr.mxu0 %v6149_v60 }
 0xbba   :  { %3646 = vmatpush3.msra.mxu0 %v3913_v2 }
 0xbbb   :  { %3647 = vmatprep.subr.mxu0 %v6149_v60 }
 0xbbc   :  { %3648 = vmatpush3.msra.mxu0 %v3914_v18 }
 0xbbd   :  { %3649 = vmatprep.subr.mxu0 %v6149_v60 }
 0xbbe   :  { %3650 = vmatpush3.msra.mxu0 %v3915_v19 }
 0xbbf   :  { %3692 = vmatprep.subr.mxu0 %v6149_v60 }
 0xc42   :  { %v2034_v20 = vpop.f32.mrf.mxu1 }
 0xc43   :  { %v5918_v21 = vsub.f32 %v5813_v63, %v2034_v20  ;;  %v2115_v63 = vld [vmem:[%s6123_s0 + $0x520] sm:$0xff] }
 0xc44   :  { %v3672_v3 = vpop.f32.mrf.mxu1 }
 0xc45   :  { %v2039_v4 = vmul.f32 %v5918_v21, %v5918_v21 }
 0xc47   :  { %3690 = vmatmul.mubr.msk.f32.vlgmr.msra.gmra.mxu1 %vm306_vm3, %v2039_v4 }
 0xc48   :  { %3743 = vmatprep.mubr.msk.f32.mxu1 %vm3939_vm0, %v6149_v60  ;;  %3728 = vmatpush3.msra.mxu1 %v2208_v9 }
 0xc49   :  { %3729 = vmatprep.subr.mxu1 %v6149_v60 }
 0xc4a   :  { %3730 = vmatpush3.msra.mxu1 %v2207_v10 }
 0xc4b   :  { %3731 = vmatprep.subr.mxu1 %v6149_v60 }
 0xc4c   :  { %3732 = vmatpush3.msra.mxu1 %v2206_v11 }
 0xc4d   :  { %3733 = vmatprep.subr.mxu1 %v6149_v60 }
 0xc4e   :  { %3734 = vmatpush3.msra.mxu1 %v2205_v12 }
 0xc4f   :  { %3735 = vmatprep.subr.mxu1 %v6149_v60 }
 0xc50   :  { %3736 = vmatpush3.msra.mxu1 %v2204_v13 }
 0xc51   :  { %3737 = vmatprep.subr.mxu1 %v6149_v60 }
 0xc52   :  { %3738 = vmatpush3.msra.mxu1 %v2203_v33 }
 0xc53   :  { %3739 = vmatprep.subr.mxu1 %v6149_v60 }
 0xc54   :  { %3740 = vmatpush3.msra.mxu1 %v2202_v34 }
 0xc55   :  { %3741 = vmatprep.subr.mxu1 %v6149_v60 }
 0xc56   :  { %3742 = vmatpush3.msra.mxu1 %v2201_v35 }
 0xc57   :  { %3746 = vmatprep.subr.mxu1 %v6149_v60 }
 0xc5f   :  { %v1878_v5 = vpop.f32.mrf.mxu0 }
 0xc60   :  { %v5925_v6 = vsub.f32 %v1811_v32, %v1878_v5 }
 0xc61   :  { %v3618_v7 = vpop.f32.mrf.mxu0 }
 0xc62   :  { %v1883_v8 = vmul.f32 %v5925_v6, %v5925_v6 }
 0xc64   :  { %3652 = vmatmul.mubr.f32.vlgmr.msra.gmra.mxu0 %v1883_v8 }
 0xc65   :  { %3724 = vmatprep.mubr.msk.f32.mxu0 %vm3939_vm0, %v6149_v60  ;;  %3693 = vmatpush3.msra.mxu0 %v2130_v36 }
 0xc66   :  { %3694 = vmatprep.subr.mxu0 %v6149_v60 }
 0xc67   :  { %3695 = vmatpush3.msra.mxu0 %v2129_v37  ;;  %v2557_v37 = vld [vmem:[%s6123_s0 + $0x6e0] sm:$0xff] }
 0xc68   :  { %3696 = vmatprep.subr.mxu0 %v6149_v60 }
 0xc69   :  { %3697 = vmatpush3.msra.mxu0 %v2128_v38 }
 0xc6a   :  { %3698 = vmatprep.subr.mxu0 %v6149_v60 }
 0xc6b   :  { %3699 = vmatpush3.msra.mxu0 %v2127_v39 }
 0xc6c   :  { %3700 = vmatprep.subr.mxu0 %v6149_v60 }
 0xc6d   :  { %3701 = vmatpush3.msra.mxu0 %v2126_v52 }
 0xc6e   :  { %3702 = vmatprep.subr.mxu0 %v6149_v60 }
 0xc6f   :  { %3703 = vmatpush3.msra.mxu0 %v2125_v53 }
 0xc70   :  { %3704 = vmatprep.subr.mxu0 %v6149_v60 }
 0xc71   :  { %3705 = vmatpush3.msra.mxu0 %v2124_v54 }
 0xc72   :  { %3706 = vmatprep.subr.mxu0 %v6149_v60 }
 0xc73   :  { %3707 = vmatpush3.msra.mxu0 %v2123_v55 }
 0xc74   :  { %3708 = vmatprep.subr.mxu0 %v6149_v60 }
 0xc75   :  { %3709 = vmatpush3.msra.mxu0 %v2122_v45 }
 0xc76   :  { %3710 = vmatprep.subr.mxu0 %v6149_v60 }
 0xc77   :  { %3711 = vmatpush3.msra.mxu0 %v2121_v47 }
 0xc78   :  { %3712 = vmatprep.subr.mxu0 %v6149_v60 }
 0xc79   :  { %3713 = vmatpush3.msra.mxu0 %v2120_v41 }
 0xc7a   :  { %3714 = vmatprep.subr.mxu0 %v6149_v60 }
 0xc7b   :  { %3715 = vmatpush3.msra.mxu0 %v2119_v43 }
 0xc7c   :  { %3716 = vmatprep.subr.mxu0 %v6149_v60 }
 0xc7d   :  { %3717 = vmatpush3.msra.mxu0 %v2118_v48 }
 0xc7e   :  { %3718 = vmatprep.subr.mxu0 %v6149_v60 }
 0xc7f   :  { %3719 = vmatpush3.msra.mxu0 %v2117_v58 }
 0xc80   :  { %3720 = vmatprep.subr.mxu0 %v6149_v60 }
 0xc81   :  { %3721 = vmatpush3.msra.mxu0 %v2116_v46 }
 0xc82   :  { %3722 = vmatprep.subr.mxu0 %v6149_v60 }
 0xc83   :  { %3723 = vmatpush3.msra.mxu0 %v2115_v63 }
 0xc84   :  { %3751 = vmatprep.subr.mxu0 %v6149_v60 }
 0xd07   :  { %v2109_v51 = vpop.f32.mrf.mxu1 }
 0xd08   :  { %v2110_v22 = vadd.f32 1e-05, %v2109_v51 }
 0xd09   :  { %v3691_v40 = vpop.f32.mrf.mxu1 }
 0xd0a   :  { %3820 = vrsqrt.f32 %v2110_v22 }
 0xd17   :  { %v3821_v61 = vpop.eup %3820 }
 0xd18   :  { %v2114_v0 = vmul.f32 %v3821_v61, %v5918_v21 }
 0xd1a   :  { %3744 = vmatmul.mubr.msk.f32.vlgmr.msra.gmra.mxu1 %vm306_vm3, %v2114_v0 }
 0xd1b   :  { %3748 = vmatprep.mubr.msk.f32.mxu1 %vm3939_vm0, %v6149_v60  ;;  %3747 = vmatpush3.msra.mxu1 %v2282_v27 }
 0xd1c   :  { %3756 = vmatprep.subr.mxu1 %v6149_v60 }
 0xd24   :  { %v1950_v24 = vpop.f32.mrf.mxu0 }
 0xd25   :  { %v1951_v42 = vadd.f32 1e-05, %v1950_v24 }
 0xd26   :  { %v3653_v62 = vpop.f32.mrf.mxu0 }
 0xd27   :  { %3822 = vrsqrt.f32 %v1951_v42 }
 0xd28   :  { %3824 = vrsqrt.f32 %v1956_v50 }
 0xd34   :  { %v3823_v17 = vpop.eup %3822 }
 0xd35   :  { %v1955_v15 = vmul.f32 %v3823_v17, %v5925_v6  ;;  %v3825_v14 = vpop.eup %3824 }
 0xd37   :  { %v1958_v32 = vmul.f32 %v3825_v14, %v1955_v15 }
 0xd39   :  { %v1961_v30 = vrot.slane %v1958_v32, 6  ;;  %v1959_v29 = vmul.f32 %v1958_v32, %v5823_v44 }
 0xd3b   :  { %v1963_v28 = vmul.f32 %v1961_v30, %v5823_v44  ;;  %v2665_v30 = vld [vmem:[%s6123_s0 + $0x6f0] sm:$0xff]  ;;  %s3942_s0 = smov 1  }
 0xd3d   :  { %v1964_v56 = vsel %vm547_vm6, %v1959_v29, %v1963_v28 }
 0xd3e   :  { %3725 = vmatmul.mubr.f32.vlgmr.msra.gmra.mxu0 %v1964_v56 }
 0xd3f   :  { %3752 = vmatpush3.msk.msra.mxu0 %vm2362_vm15, %v2357_v25  ;;  %3753 = vmatprep.mubr.msk.f32.mxu0 %vm3939_vm0, %v6149_v60 }
 0xd40   :  { %3763 = vmatprep.subr.mxu0 %v6149_v60 }
 0xdda   :  { %v2278_v44 = vpop.f32.mrf.mxu1 }
 0xddb   :  { %3754 = vmatmul.mubr.msk.f32.vlgmr.msra.gmra.mxu0 %vm2358_vm1, %v2278_v44 }
 0xddc   :  { %v3745_v49 = vpop.f32.mrf.mxu1  ;;  %3765 = vmatprep.mubr.msk.f32.mxu0 %vm3939_vm0, %v6149_v60  ;;  %3764 = vmatpush3.msra.mxu0 %v2557_v37 }
 0xdfe   :  { %v2197_v26 = vpop.f32.mrf.mxu0 }
 0xdff   :  { %3749 = vmatmul.mubr.msk.f32.vlgmr.msra.gmra.mxu1 %vm2283_vm2, %v2197_v26 }
 0xe00   :  { %v3726_v31 = vpop.f32.mrf.mxu0  ;;  %3760 = vmatprep.mubr.msk.f32.mxu1 %vm3939_vm0, %v6149_v60  ;;  %3757 = vmatpush3.msk.msra.mxu1 %vm2362_vm15, %v2437_v23 }
 0xe01   :  { %3758 = vmatprep.subr.mxu1 %v6149_v60 }
 0xe02   :  { %3759 = vmatpush3.msra.mxu1 %v2436_v57 }
 0xe03   :  { %3768 = vmatprep.subr.mxu1 %v6149_v60 }
 0xe9b   :  { %v2432_v59 = vpop.f32.mrf.mxu0 }
 0xe9c   :  { %2451 = vrot.lane.b32.xlu0 %v2432_v59, %s3940_s8 }
 0xe9d   :  { %v3755_v1 = vpop.f32.mrf.mxu0 }
 0xe9e   :  { %v3941_v1 = vmov 0  }
 0xe9f   :  { %3782 = vset.pattern.permute.xlu0 %v3941_v1  ;;  %3783 = vset.pattern.permute.xlu1 %v3941_v1 }
 0xebf   :  { %v2353_v16 = vpop.f32.mrf.mxu1 }
 0xec0   :  { %v2438_v18 = vmul.f32 %v2353_v16, %v2353_v16 }
 0xec1   :  { %v3750_v2 = vpop.f32.mrf.mxu1 }
 0xec2   :  { %v2440_v19 = vrot.slane %v2438_v18, 2 }
 0xec4   :  { %v2442_v20 = vadd.f32 %v2440_v19, %v2438_v18 }
 0xec6   :  { %3826 = vrsqrt.f32 %v2442_v20  ;;  %vm2445_vm3 = vcmp.eq.f32.partialorder %v2442_v20, inf  ;;  %v2448_v5 = vand.u32 2147483648, %v2442_v20  ;;  %vm2447_vm4 = vcmp.eq.f32.partialorder %v2442_v20, 0.0 }
 0xec7   :  { %v2548_v52 = vmax.f32 %v2442_v20, 1e-12 }
 0xed3   :  { %v3827_v21 = vpop.eup %3826 }
 0xed4   :  { %v2444_v3 = vmul.f32 %v3827_v21, %v2442_v20 }
 0xed6   :  { %v2446_v4 = vsel %vm2445_vm3, %v2442_v20, %v2444_v3 }
 0xed7   :  { %v2449_v6 = vsel %vm2447_vm4, %v2448_v5, %v2446_v4 }
 0xf0e   :  { %v2452_v7 = vpop.permute.xlu0 %2451 }
 0xf0f   :  { %v2454_v8 = vsel %vm2283_vm2, %v2449_v6, %v2452_v7 }
 0xf10   :  { %3761 = vmatmul.mubr.msk.f32.vlgmr.msra.gmra.mxu1 %vm2455_vm5, %v2454_v8 }
 0xf11   :  { %3770 = vmatprep.mubr.msk.f32.mxu1 %vm3939_vm0, %v6149_v60  ;;  %3769 = vmatpush3.msra.mxu1 %v2665_v30  ;;  %v2806_v30 = vld [vmem:[%s6124_s1 + $0x10] sm:$0x3f] }
 0xfd0   :  { %v2528_v9 = vpop.f32.mrf.mxu1 }
 0xfd1   :  { %v2532_v10 = vmax.f32 %v2528_v9, 0.0 }
 0xfd2   :  { %v3762_v11 = vpop.f32.mrf.mxu1 }
 0xfd3   :  { %v2534_v12 = vsel %vm2533_vm7, %v2532_v10, 0.0 }
 0xfd4   :  { %2535 = vadd.xlane.f32.xlu0 %v2534_v12 }
0x105d   :  { %v2536_v13 = vpop.xlane.xlu0 %2535 }
0x105e   :  { %v2538_v33 = vmul.f32 0.125, %v2536_v13 }
0x1060   :  { %v2539_v34 = vsub.f32 %v2532_v10, %v2538_v33 }
0x1062   :  { %v2540_v35 = vmul.f32 %v2539_v34, %v2539_v34 }
0x1064   :  { %v2541_v36 = vsel %vm2533_vm7, %v2540_v35, 0.0 }
0x1065   :  { %2542 = vadd.xlane.f32.xlu1 %v2541_v36 }
0x10ee   :  { %v2543_v60 = vpop.xlane.xlu1 %2542 }
0x10ef   :  { %v2544_v38 = vmul.f32 0.125, %v2543_v60 }
0x10f1   :  { %v2545_v39 = vadd.f32 1e-05, %v2544_v38 }
0x10f3   :  { %3828 = vrsqrt.f32 %v2545_v39 }
0x10f4   :  { %3830 = vrsqrt.f32 %v2548_v52 }
0x1100   :  { %v3829_v53 = vpop.eup %3828 }
0x1101   :  { %v2547_v54 = vmul.f32 %v3829_v53, %v2539_v34  ;;  %v3831_v55 = vpop.eup %3830  ;;  %v3943_v34 = vmov 1  }
0x1103   :  { %v2550_v45 = vmul.f32 %v3831_v55, %v2547_v54 }
0x1105   :  { %v2553_v47 = vrot.slane %v2550_v45, 6  ;;  %v2551_v41 = vmul.f32 %v2550_v45, %v2353_v16 }
0x1107   :  { %v2555_v43 = vmul.f32 %v2553_v47, %v2353_v16 }
0x1109   :  { %v2556_v48 = vsel %vm547_vm6, %v2551_v41, %v2555_v43 }
0x110a   :  { %3766 = vmatmul.mubr.msk.f32.vlgmr.msra.gmra.mxu0 %vm2283_vm2, %v2556_v48 }
0x11ca   :  { %v2627_v58 = vpop.f32.mrf.mxu0 }
0x11cb   :  { %v2631_v46 = vmul.f32 %v2627_v58, %v2627_v58 }
0x11cc   :  { %v3767_v63 = vpop.f32.mrf.mxu0 }
0x11cd   :  { %v2633_v51 = vrot.slane %v2631_v46, 2 }
0x11cf   :  { %v2635_v22 = vadd.f32 %v2633_v51, %v2631_v46 }
0x11d1   :  { %3832 = vrsqrt.f32 %v2635_v22  ;;  %vm2638_vm0 = vcmp.eq.f32.partialorder %v2635_v22, inf  ;;  %v2641_v0 = vand.u32 2147483648, %v2635_v22  ;;  %vm2640_vm8 = vcmp.eq.f32.partialorder %v2635_v22, 0.0 }
0x11d2   :  { %v2656_v56 = vmax.f32 %v2635_v22, 1e-12 }
0x11de   :  { %v3833_v40 = vpop.eup %3832 }
0x11df   :  { %v2637_v61 = vmul.f32 %v3833_v40, %v2635_v22 }
0x11e1   :  { %v2639_v24 = vsel %vm2638_vm0, %v2635_v22, %v2637_v61 }
0x11e2   :  { %v2642_v42 = vsel %vm2640_vm8, %v2641_v0, %v2639_v24 }
0x11e3   :  { %v2643_v50 = vsel %vm2533_vm7, %v2642_v42, 0.0 }
0x11e4   :  { %2644 = vadd.xlane.f32.xlu1 %v2643_v50 }
0x126d   :  { %v2645_v62 = vpop.xlane.xlu1 %2644 }
0x126e   :  { %v2646_v17 = vmul.f32 0.125, %v2645_v62 }
0x1270   :  { %v2647_v15 = vsub.f32 %v2642_v42, %v2646_v17 }
0x1272   :  { %v2648_v14 = vmul.f32 %v2647_v15, %v2647_v15 }
0x1274   :  { %v2649_v32 = vsel %vm2533_vm7, %v2648_v14, 0.0 }
0x1275   :  { %2650 = vadd.xlane.f32.xlu1 %v2649_v32  ;;  %v2807_v32 = vld [vmem:[%s6124_s1 + $0x18] sm:$0x3f] }
0x12fe   :  { %v2651_v29 = vpop.xlane.xlu1 %2650 }
0x12ff   :  { %v2652_v28 = vmul.f32 0.125, %v2651_v29 }
0x1301   :  { %v2653_v25 = vadd.f32 1e-05, %v2652_v28 }
0x1303   :  { %3834 = vrsqrt.f32 %v2653_v25 }
0x1304   :  { %3836 = vrsqrt.f32 %v2656_v56 }
0x1310   :  { %v3835_v27 = vpop.eup %3834 }
0x1311   :  { %v2655_v44 = vmul.f32 %v3835_v27, %v2647_v15  ;;  %v3837_v49 = vpop.eup %3836 }
0x1313   :  { %v2658_v26 = vmul.f32 %v3837_v49, %v2655_v44 }
0x1315   :  { %v2661_v31 = vrot.slane %v2658_v26, 6  ;;  %v2659_v23 = vmul.f32 %v2658_v26, %v2627_v58 }
0x1317   :  { %v2663_v57 = vmul.f32 %v2661_v31, %v2627_v58 }
0x1319   :  { %v2664_v59 = vsel %vm547_vm6, %v2659_v23, %v2663_v57  ;;  %v2808_v23 = vld [vmem:[%s6124_s1 + $0x20] sm:$0x3f]  ;;  %s3916_s1 = scalar_lea.vmem %s3101_s21, 32 }
0x131a   :  { %3771 = vmatmul.mubr.msk.f32.vlgmr.msra.gmra.mxu1 %vm2283_vm2, %v2664_v59  ;;  %v2860_v1 = vmul.f32 %v2808_v23, %v2808_v23  ;;  %p3917_p0 = scmp.ne.s32.totalorder %s3101_s21, %s3916_s1  ;;  %p3922_p2 = scmp.lt.s32.totalorder %s3916_s1, %s3916_s1 }
0x131c   :  { %p3923_p3 = por %p3922_p2, %p3921_p1 }
0x131e   :  { %p3924_p4 = pnand %p3923_p3, %p3917_p0 }
0x13da   :  { %v2735_v16 = vpop.f32.mrf.mxu1 }
0x13db   :  { %v2739_v2 = vmul.f32 %v2735_v16, %v2735_v16 }
0x13dc   :  { %v3772_v18 = vpop.f32.mrf.mxu1 }
0x13dd   :  { %v2741_v19 = vrot.slane %v2739_v2, 2 }
0x13df   :  { %v2743_v20 = vadd.f32 %v2741_v19, %v2739_v2  ;;  %v3946_v19 = vmov 1966171168  }
0x13e1   :  { %v2744_v21 = vmax.f32 %v2743_v20, 1e-16  ;;  %v2886_v20 = vunpack.c.l.s4 %v3946_v19 }
0x13e3   :  { %3838 = vrsqrt.f32 %v2744_v21  ;;  %v2888_v21 = vlaneseq }
0x13f0   :  { %v3839_v3 = vpop.eup %3838 }
0x13f1   :  { %v6078_v4 = vmul.f32 %v3839_v3, %v2735_v16  ;;  %v2748_v5 = vrot.slane %v3839_v3, 6 }
0x13f3   :  { %v2750_v6 = vmul.f32 %v2748_v5, %v2735_v16  ;;  %v2809_v7 = vrot.slane %v6078_v4, 6  ;;  %v2811_v8 = vrot.slane %v6078_v4, 4 }
0x13f5   :  { %2757 = vrot.lane.b32.xlu1 %v2750_v6, %s3942_s0  ;;  %v2813_v9 = vsel %vm547_vm6, %v6078_v4, %v2809_v7  ;;  %v2767_v11 = vrot.slane %v2750_v6, 2  ;;  %v2816_v12 = vrot.slane %v2750_v6, 6 }
0x13f6   :  { %v2814_v10 = vsel %vm2362_vm15, %v2813_v9, %v2811_v8 }
0x13f7   :  { %2833 = vperm.xlu0 %3782, %v2814_v10   ;;  %v2818_v13 = vsel %vm547_vm6, %v2767_v11, %v2750_v6 }
0x13f8   :  { %v2819_v33 = vsel %vm2362_vm15, %v2818_v13, %v2816_v12 }
0x13f9   :  { %2752 = vrot.lane.b32.xlu1 %v6078_v4, %s3942_s0 }
0x13fb   :  { %3785 = vset.pattern.permute.xlu0 %v3943_v34 }
0x13fd   :  { %2768 = vrot.lane.b32.xlu1 %v2767_v11, %s3942_s0 }
0x1401   :  { %2839 = vperm.xlu1 %3783, %v2819_v33  }
0x1405   :  { %3784 = vset.pattern.permute.xlu1 %v3943_v34 }
0x1467   :  { %v2758_v35 = vpop.permute.xlu1 %2757 }
0x1468   :  { %v2760_v36 = vmul.f32 %v2758_v35, %v2735_v16 }
0x146a   :  { %v2762_v60 = vrot.slane %v2760_v36, 2 }
0x146b   :  { %v2753_v37 = vpop.permute.xlu1 %2752 }
0x146c   :  { %v2755_v38 = vmul.f32 %v2753_v37, %v2735_v16 }
0x146e   :  { %v2764_v39 = vadd.f32 %v2762_v60, %v2755_v38 }
0x146f   :  { %v2769_v52 = vpop.permute.xlu1 %2768 }
0x1470   :  { %v2765_v53 = vmul.f32 %v2764_v39, %v2753_v37  ;;  %v2771_v54 = vmul.f32 %v2769_v52, %v2764_v39  ;;  %v2799_v2 = vsel %vm2798_vm9, %v6078_v4, %v2769_v52 }
0x1472   :  { %v2773_v55 = vrot.slane %v2771_v54, 6  ;;  %v2766_v45 = vsub.f32 %v2735_v16, %v2765_v53  ;;  %v2834_v29 = vpop.permute.xlu0 %2833 }
0x1473   :  { %v2836_v56 = vmul.f32 %v2834_v29, %v2806_v30 }
0x1474   :  { %v2775_v47 = vsub.f32 %v2735_v16, %v2773_v55  ;;  %v2776_v43 = vmul.f32 %v2766_v45, %v2766_v45 }
0x1476   :  { %v2777_v41 = vmul.f32 %v2775_v47, %v2775_v47 }
0x1478   :  { %v2779_v48 = vrot.slane %v2777_v41, 2 }
0x147a   :  { %v2781_v58 = vadd.f32 %v2779_v48, %v2776_v43 }
0x147c   :  { %v2782_v46 = vmax.f32 %v2781_v58, 1e-16  ;;  %v2840_v14 = vpop.permute.xlu1 %2839 }
0x147d   :  { %v2842_v25 = vmul.f32 %v2840_v14, %v2807_v32 }
0x147e   :  { %3840 = vrsqrt.f32 %v2782_v46 }
0x147f   :  { %v2843_v44 = vadd.f32 %v2842_v25, %v2836_v56 }
0x1481   :  { %v2857_v59 = vmul.f32 %v2843_v44, %v2843_v44 }
0x148b   :  { %v3841_v63 = vpop.eup %3840 }
0x148c   :  { %v2786_v51 = vrot.slane %v3841_v63, 6  ;;  %v2784_v22 = vmul.f32 %v3841_v63, %v2766_v45 }
0x148e   :  { %v2788_v40 = vmul.f32 %v2786_v51, %v2775_v47  ;;  %v2820_v61 = vrot.slane %v2784_v22, 6  ;;  %v2822_v0 = vrot.slane %v2784_v22, 4 }
0x1490   :  { %v2824_v24 = vsel %vm547_vm6, %v2784_v22, %v2820_v61  ;;  %v2794_v42 = vrot.slane %v2788_v40, 2  ;;  %v2827_v62 = vrot.slane %v2788_v40, 6 }
0x1491   :  { %v2825_v50 = vsel %vm2362_vm15, %v2824_v24, %v2822_v0 }
0x1492   :  { %2846 = vperm.xlu1 %3784, %v2825_v50   ;;  %v2829_v17 = vsel %vm547_vm6, %v2794_v42, %v2788_v40 }
0x1493   :  { %v2830_v15 = vsel %vm2362_vm15, %v2829_v17, %v2827_v62 }
0x1496   :  { %2852 = vperm.xlu1 %3784, %v2830_v15  }
0x149a   :  { %2790 = vrot.lane.b32.xlu1 %v2784_v22, %s3942_s0 }
0x149e   :  { %2795 = vrot.lane.b32.xlu1 %v2794_v42, %s3944_s13 }
0x150d   :  { %v2847_v28 = vpop.permute.xlu1 %2846 }
0x150e   :  { %v2849_v49 = vmul.f32 %v2847_v28, %v2806_v30 }
0x1511   :  { %v2853_v27 = vpop.permute.xlu1 %2852 }
0x1512   :  { %v2855_v26 = vmul.f32 %v2853_v27, %v2807_v32 }
0x1514   :  { %v2856_v31 = vadd.f32 %v2855_v26, %v2849_v49 }
0x1515   :  { %v2791_v57 = vpop.permute.xlu1 %2790 }
0x1516   :  { %v2858_v16 = vmul.f32 %v2856_v31, %v2856_v31  ;;  %v2801_v3 = vsel %vm2800_vm10, %v2799_v2, %v2791_v57 }
0x1518   :  { %v2859_v18 = vadd.f32 %v2858_v16, %v2857_v59 }
0x1519   :  { %v2796_v5 = vpop.permute.xlu1 %2795 }
0x151a   :  { %v2861_v6 = vadd.f32 %v2860_v1, %v2859_v18  ;;  %v2803_v7 = vsel %vm2802_vm11, %v2801_v3, %v2796_v5 }
0x151b   :  { %2805 = vst.msk [vmem:[#allocation2] sm:$0x3] %vm2804_vm12, %v2803_v7 }
0x151c   :  { %v2862_v8 = vmax.f32 %v2861_v6, 1e-16 }
0x151d   :  { %3927 = shalt.err (!%p3924_p4)
}
0x151e   :  { %3103 = dma.vmem_to_hbm [thread:$0]  %s3101_s21, 32, %s6125_s2, [#allocation3]   ;;  %v2887_v4 = vunpack.c.0.s8 %v2886_v20  ;;  %v2889_v9 = vshrl.u32 %v2888_v21, 7  ;;  %3842 = vrsqrt.f32 %v2862_v8  ;;  %v2875_v11 = vrot.slane %v2843_v44, 2 }
0x151f   :  { %v2869_v12 = vrot.slane %v2856_v31, 2  ;;  %v2865_v33 = vrot.slane %v2808_v23, 2  ;;  %vm3078_vm13 = vcmask 1040384   ;;  %vm3083_vm14 = vcmask 1042432  }
0x1520   :  { %v2890_v10 = vsub.s32 %v2887_v4, %v2889_v9  ;;  %v2877_v35 = vmul.f32 %v2875_v11, %v2808_v23  ;;  %v2882_v53 = vmul.f32 %v2875_v11, %v2856_v31  ;;  %v3030_v55 = vsub.s32 0, %v2889_v9 }
0x1521   :  { %v2871_v36 = vmul.f32 %v2869_v12, %v2808_v23  ;;  %v2881_v37 = vmul.f32 %v2869_v12, %v2843_v44  ;;  %v2878_v39 = vmul.f32 %v2865_v33, %v2843_v44  ;;  %v2867_v52 = vmul.f32 %v2865_v33, %v2856_v31 }
0x1522   :  { %v2915_v13 = vrot.slane %v2856_v31, %v2890_v10  ;;  %v2937_v34 = vrot.slane %v2808_v23, %v2890_v10  ;;  %v2891_v60 = vrot.slane %v2843_v44, %v2890_v10  ;;  %vm3088_vm1 = vcmask 1044480  }
0x1523   :  { %v2879_v47 = vsub.f32 %v2877_v35, %v2878_v39  ;;  %v2872_v41 = vsub.f32 %v2867_v52, %v2871_v36  ;;  %v2883_v43 = vsub.f32 %v2881_v37, %v2882_v53  ;;  %vm3091_vm2 = vcmask 128000  }
0x1524   :  { %v2916_v38 = vcombine.high %v2915_v13, %v2915_v13  ;;  %v2938_v54 = vcombine.high %v2937_v34, %v2937_v34  ;;  %v2923_v45 = vrot.slane %v2915_v13, %v2890_v10  ;;  %v2892_v58 = vcombine.high %v2891_v60, %v2891_v60 }
0x1525   :  { %v2945_v40 = vrot.slane %v2937_v34, %v2890_v10  ;;  %v2899_v62 = vrot.slane %v2891_v60, %v2890_v10 }
0x1526   :  { %v2930_v46 = vrot.slane %v2916_v38, %v2890_v10  ;;  %v2952_v61 = vrot.slane %v2938_v54, %v2890_v10  ;;  %v3031_v0 = vrot.slane %v2923_v45, %v3030_v55  ;;  %v2906_v17 = vrot.slane %v2892_v58, %v2890_v10 }
0x1527   :  { %v3041_v28 = vrot.slane %v2945_v40, %v3030_v55 }
0x1528   :  { %v3035_v15 = vrot.slane %v2930_v46, %v3030_v55  ;;  %v3079_v27 = vsel %vm3078_vm13, %v2899_v62, %v3031_v0  ;;  %v3045_v23 = vrot.slane %v2952_v61, %v3030_v55 }
0x1529   :  { %v3081_v21 = vsel %vm547_vm6, %v3079_v27, %v3041_v28 }
0x152a   :  { %v3080_v1 = vsel %vm3078_vm13, %v2906_v17, %v3035_v15 }
0x152b   :  { %v3843_v48 = vpop.eup %3842  ;;  %v3082_v8 = vsel %vm547_vm6, %v3080_v1, %v3045_v23 }
0x152c   :  { %v2873_v63 = vmul.f32 %v3843_v48, %v2872_v41  ;;  %v2880_v51 = vmul.f32 %v3843_v48, %v2879_v47  ;;  %v2884_v22 = vmul.f32 %v3843_v48, %v2883_v43 }
0x152e   :  { %v2960_v24 = vrot.slane %v2873_v63, %v2890_v10  ;;  %v2985_v42 = vrot.slane %v2880_v51, %v2890_v10  ;;  %v3010_v50 = vrot.slane %v2884_v22, %v2890_v10 }
0x1530   :  { %v2961_v14 = vcombine.high %v2960_v24, %v2960_v24  ;;  %v2968_v32 = vrot.slane %v2960_v24, %v2890_v10  ;;  %v2986_v30 = vcombine.high %v2985_v42, %v2985_v42  ;;  %v2993_v29 = vrot.slane %v2985_v42, %v2890_v10 }
0x1531   :  { %v3011_v25 = vcombine.high %v3010_v50, %v3010_v50  ;;  %v3018_v56 = vrot.slane %v3010_v50, %v2890_v10 }
0x1532   :  { %v2975_v44 = vrot.slane %v2961_v14, %v2890_v10  ;;  %v2976_v49 = vcombine.high %v2968_v32, %v2968_v32  ;;  %v3000_v26 = vrot.slane %v2986_v30, %v2890_v10  ;;  %v3001_v31 = vcombine.high %v2993_v29, %v2993_v29 }
0x1533   :  { %v3025_v57 = vrot.slane %v3011_v25, %v2890_v10  ;;  %v3026_v59 = vcombine.high %v3018_v56, %v3018_v56 }
0x1534   :  { %v2977_v16 = vcombine.high %v2975_v44, %v2975_v44  ;;  %v3002_v2 = vcombine.high %v3000_v26, %v3000_v26  ;;  %v3051_v18 = vrot.slane %v2976_v49, %v3030_v55  ;;  %v3061_v19 = vrot.slane %v3001_v31, %v3030_v55 }
0x1535   :  { %v3027_v20 = vcombine.high %v3025_v57, %v3025_v57  ;;  %v3071_v6 = vrot.slane %v3026_v59, %v3030_v55 }
0x1536   :  { %v3055_v3 = vrot.slane %v2977_v16, %v3030_v55  ;;  %v3065_v5 = vrot.slane %v3002_v2, %v3030_v55  ;;  %v3084_v7 = vsel %vm3083_vm14, %v3081_v21, %v3051_v18 }
0x1537   :  { %v3086_v4 = vsel %vm2362_vm15, %v3084_v7, %v3061_v19  ;;  %v3075_v9 = vrot.slane %v3027_v20, %v3030_v55 }
0x1538   :  { %v3085_v10 = vsel %vm3083_vm14, %v3082_v8, %v3055_v3  ;;  %v3089_v11 = vsel %vm3088_vm1, %v3086_v4, %v3071_v6 }
0x1539   :  { %v3087_v12 = vsel %vm2362_vm15, %v3085_v10, %v3065_v5  ;;  %3092 = vst.msk [vmem:[%s6126_s3] sm:$0x3f] %vm3091_vm2, %v3089_v11 }
0x153a   :  { %v3090_v13 = vsel %vm3088_vm1, %v3087_v12, %v3075_v9 }
0x153b   :  { %3093 = vst.msk [vmem:[%s6126_s3 + $0x8] sm:$0x3f] %vm3091_vm2, %v3090_v13 }
0x153c   :  { %3936 = dma.done.wait [#allocation3], 32  }
0x153d   :  { %3937 = vsyncadd [#allocation3], 4294967264 }
0x153e   :  { %3111 = vsyncpa [#allocation3], 1 }

</bundles_post_ra>
